<compile_context>
chip_gen: v6e
topology: v6e:2x2x1
jax: 0.10.0
libtpu: 0.0.40
codegen_flags: <defaults>
</compile_context>

<pallas_src>
import functools

import jax
import jax.numpy as jnp
from jax import lax
from jax.experimental import pallas as pl
from jax.experimental.pallas import tpu as pltpu

LANE = 128  # lane width: Cout is padded to a multiple of this


def _round_up(x, m):
    return ((x + m - 1) // m) * m


# ---------------------------------------------------------------------------
# Tap-reduction conv kernel
#
#   x_ref : (Dp, L, Cx)   padded sample, H*W flattened to L rows (VMEM-resident
#                         across the Do grid axis; same block for every `do`)
#   w_ref : (k^3, Cx, CP) per-tap weight matrices (resident)
#   b_ref : (1, CP)
#   r_ref : (R, CP)       optional residual (already in the R-row layout)
#   o_ref : (R, CP)       R = Ho*Wp rows; columns wo in [Wo, Wp) are don't-care
#
# For output row r = ho*Wp + wo and tap (kd, kh, kw):
#   input row  = kh*Wp + kw + stride*r   in plane  do*stride + kd
# which is a single (strided) contiguous pl.ds slice per tap.
# ---------------------------------------------------------------------------
def _conv_tap_kernel(x_ref, w_ref, b_ref, *rest, ksize, stride, Wp,
                     apply_relu, has_residual):
    if has_residual:
        r_ref, o_ref = rest
    else:
        (o_ref,) = rest
    R, CP = o_ref.shape
    do = pl.program_id(1)

    acc = jnp.zeros((R, CP), jnp.float32)
    for kd in range(ksize):
        d_idx = do * stride + kd
        for kh in range(ksize):
            for kw in range(ksize):
                t = (kd * ksize + kh) * ksize + kw
                col = kh * Wp + kw
                if stride == 1:
                    rows = pl.ds(col, R)
                else:
                    rows = pl.ds(col, R, stride)
                patch = x_ref[d_idx, rows, :]            # (R, Cx)
                acc = acc + jnp.dot(patch, w_ref[t],
                                    preferred_element_type=jnp.float32)

    acc = acc + b_ref[...]
    if has_residual:
        acc = acc + r_ref[...]
    if apply_relu:
        acc = jnp.maximum(acc, 0.0)
    o_ref[...] = acc.astype(o_ref.dtype)


# ---------------------------------------------------------------------------
# Conv3d wrapper: glue (pad / flatten, 1x traffic) + the Pallas kernel.
# Returns channel-padded NDHWC output: (N, Do, Ho, Wo, CP), CP = 128*ceil.
# ---------------------------------------------------------------------------
def conv3d_pallas(x, w_pt, b, *, stride, pad, apply_relu=False, residual=None):
    N, Din, Hin, Win, Cx = x.shape
    Cout, Cin_w, k = w_pt.shape[0], w_pt.shape[1], w_pt.shape[2]
    CP = _round_up(max(Cout, 1), LANE)

    Dp, Hp, Wp = Din + 2 * pad, Hin + 2 * pad, Win + 2 * pad
    Do = (Dp - k) // stride + 1
    Ho = (Hp - k) // stride + 1
    Wo = (Wp - k) // stride + 1
    R = Ho * Wp  # rows of the per-step GEMM (columns Wo..Wp-1 are discarded)

    # --- glue: pad + flatten H*W (1x traffic, no im2col) ---
    xp = jnp.pad(x, ((0, 0), (pad, pad), (pad, pad), (pad, pad), (0, 0)))
    x_flat = xp.reshape(N, Dp, Hp * Wp, Cx)
    max_idx = (k - 1) * Wp + (k - 1) + stride * (R - 1)
    L = _round_up(max(Hp * Wp, max_idx + 1), 8)
    if L > Hp * Wp:
        x_flat = jnp.pad(x_flat, ((0, 0), (0, 0), (0, L - Hp * Wp), (0, 0)))

    # --- weights -> (k^3, Cx, CP), taps in (kd, kh, kw) order; bias -> (1, CP)
    w_k = jnp.transpose(w_pt, (2, 3, 4, 1, 0)).reshape(k ** 3, Cin_w, Cout)
    w_k = jnp.pad(w_k, ((0, 0), (0, Cx - Cin_w), (0, CP - Cout)))
    b2 = jnp.pad(b, (0, CP - Cout)).reshape(1, CP)

    in_specs = [
        pl.BlockSpec((None, Dp, L, Cx), lambda n, d: (n, 0, 0, 0)),
        pl.BlockSpec((k ** 3, Cx, CP), lambda n, d: (0, 0, 0)),
        pl.BlockSpec((1, CP), lambda n, d: (0, 0)),
    ]
    args = [x_flat, w_k, b2]

    if residual is not None:
        # residual is (N, Do, Ho, Wo, CP); embed it in the R-row layout.
        res = jnp.pad(residual,
                      ((0, 0), (0, 0), (0, 0), (0, Wp - Wo), (0, 0)))
        res = res.reshape(N, Do, R, CP)
        in_specs.append(
            pl.BlockSpec((None, None, R, CP), lambda n, d: (n, d, 0, 0)))
        args.append(res)

    kernel = functools.partial(
        _conv_tap_kernel, ksize=k, stride=stride, Wp=Wp,
        apply_relu=apply_relu, has_residual=residual is not None)

    # VMEM budget: only raise the limit when the default scoped limit is tight.
    est = 4 * 2 * (Dp * L * Cx + k ** 3 * Cx * CP + CP
                   + R * CP * (2 if residual is not None else 1))
    vlimit = None
    if est > 14 * (1 << 20):
        vlimit = min(est + (4 << 20), 64 * (1 << 20))

    out_full = pl.pallas_call(
        kernel,
        out_shape=jax.ShapeDtypeStruct((N, Do, R, CP), jnp.float32),
        grid=(N, Do),
        in_specs=in_specs,
        out_specs=pl.BlockSpec((None, None, R, CP), lambda n, d: (n, d, 0, 0)),
        compiler_params=pltpu.CompilerParams(
            dimension_semantics=("parallel", "parallel"),
            vmem_limit_bytes=vlimit),
    )(*args)

    # Drop the don't-care width columns; keep channels padded to CP.
    out = out_full.reshape(N, Do, Ho, Wp, CP)[:, :, :, :Wo, :]
    return out


# ---------------------------------------------------------------------------
# ResNetBlock
# ---------------------------------------------------------------------------
class ResNetBlockPallas:
    def __init__(self, in_channels, out_channels, downsample=False, key=None):
        self.in_channels = in_channels
        self.out_channels = out_channels
        self.downsample = downsample
        self.has_shortcut = (in_channels != out_channels) or downsample
        key = jax.random.PRNGKey(0) if key is None else key
        k1, k2, k3, k4, k5, k6 = jax.random.split(key, 6)
        s1 = 1.0 / jnp.sqrt(in_channels * 27.0)
        s2 = 1.0 / jnp.sqrt(out_channels * 27.0)
        s3 = 1.0 / jnp.sqrt(in_channels * 1.0)
        self.w1 = jax.random.uniform(k1, (out_channels, in_channels, 3, 3, 3),
                                     jnp.float32, -s1, s1)
        self.b1 = jax.random.uniform(k2, (out_channels,), jnp.float32, -s1, s1)
        self.w2 = jax.random.uniform(k3, (out_channels, out_channels, 3, 3, 3),
                                     jnp.float32, -s2, s2)
        self.b2 = jax.random.uniform(k4, (out_channels,), jnp.float32, -s2, s2)
        if self.has_shortcut:
            self.w_sc = jax.random.uniform(
                k5, (out_channels, in_channels, 1, 1, 1), jnp.float32, -s3, s3)
            self.b_sc = jax.random.uniform(k6, (out_channels,), jnp.float32,
                                           -s3, s3)

    def __call__(self, x_ncdhw):
        x = jnp.transpose(x_ncdhw, (0, 2, 3, 4, 1)).astype(jnp.float32)
        s1 = 2 if self.downsample else 1
        CP = _round_up(self.out_channels, LANE)

        # conv1 + ReLU (stride s1, pad 1), channel-padded output.
        out1 = conv3d_pallas(x, self.w1, self.b1, stride=s1, pad=1,
                             apply_relu=True)

        # residual branch
        if self.has_shortcut:
            # 1x1x1 conv: strided subsample in glue, then ksize=1 kernel.
            x_sc = x[:, ::s1, ::s1, ::s1, :] if s1 > 1 else x
            residual = conv3d_pallas(x_sc, self.w_sc, self.b_sc,
                                     stride=1, pad=0, apply_relu=False)
        else:
            residual = jnp.pad(
                x, ((0, 0), (0, 0), (0, 0), (0, 0),
                    (0, CP - self.out_channels)))

        # conv2 + residual add + ReLU fused in one kernel.
        out2 = conv3d_pallas(out1, self.w2, self.b2, stride=1, pad=1,
                             apply_relu=True, residual=residual)

        out = out2[..., :self.out_channels]
        return jnp.transpose(out, (0, 4, 1, 2, 3))  # NDHWC -> NCDHW


# ---------------------------------------------------------------------------
# Pure-JAX reference (XLA conv) for correctness check
# ---------------------------------------------------------------------------
def _conv3d_ref(x, w, b, stride, pad):
    out = lax.conv_general_dilated(
        x, w, window_strides=(stride,) * 3, padding=[(pad, pad)] * 3,
        dimension_numbers=('NCDHW', 'OIDHW', 'NCDHW'),
        precision=lax.Precision.HIGHEST)
    return out + b.reshape(1, -1, 1, 1, 1)


def _block_ref(block, x):
    s = 2 if block.downsample else 1
    if block.has_shortcut:
        residual = _conv3d_ref(x, block.w_sc, block.b_sc, s, 0)
    else:
        residual = x
    out = jnp.maximum(_conv3d_ref(x, block.w1, block.b1, s, 1), 0.0)
    out = _conv3d_ref(out, block.w2, block.b2, 1, 1)
    return jnp.maximum(out + residual, 0.0)


if __name__ == "__main__":
    key = jax.random.PRNGKey(0)
    kx, kp, kx2, kp2 = jax.random.split(key, 4)

    # Config 1: channel change + downsample (conv shortcut, stride-2 conv1).
    N, Cin, Cout, D, H, W = 2, 4, 8, 8, 8, 8
    x = jax.random.normal(kx, (N, Cin, D, H, W), jnp.float32)
    block = ResNetBlockPallas(Cin, Cout, downsample=True, key=kp)
    out = jax.block_until_ready(jax.jit(block.__call__)(x))
    assert out.shape == (N, Cout, D // 2, H // 2, W // 2), out.shape
    ref = _block_ref(block, x)
    # default-precision MXU matmuls (bf16 inputs, f32 accum) vs f32 reference
    assert jnp.allclose(out, ref, atol=2e-2, rtol=2e-2), (
        float(jnp.max(jnp.abs(out - ref))))

    # Config 2: identity shortcut (in == out channels, no downsample).
    block2 = ResNetBlockPallas(8, 8, downsample=False, key=kp2)
    x2 = jax.random.normal(kx2, (2, 8, D, H, W), jnp.float32)
    out2 = jax.block_until_ready(jax.jit(block2.__call__)(x2))
    assert out2.shape == x2.shape, out2.shape
    ref2 = _block_ref(block2, x2)
    assert jnp.allclose(out2, ref2, atol=2e-2, rtol=2e-2), (
        float(jnp.max(jnp.abs(out2 - ref2))))

    print("KERNEL_OK")
</pallas_src>

<mosaic_0001>
module attributes {stable_mosaic.version = 11 : i64} {
  func.func @_conv_tap_kernel(%arg0: i32, %arg1: i32, %arg2: memref<1x10x104x4xf32, #tpu.memory_space<vmem>>, %arg3: memref<27x4x128xf32, #tpu.memory_space<vmem>>, %arg4: memref<1x128xf32, #tpu.memory_space<vmem>>, %arg5: memref<1x1x40x128xf32, #tpu.memory_space<vmem>>) attributes {dimension_semantics = [#tpu.dimension_semantics<parallel>, #tpu.dimension_semantics<parallel>], iteration_bounds = array<i64: 2, 4>, scalar_prefetch = 0 : i64, scratch_operands = 0 : i64, tpu.core_type = #tpu.core_type<tc>, window_params = [{transform_indices = @transform_0, window_bounds = array<i64: 1, 10, 104, 4>}, {pipeline_mode = #tpu.pipeline_mode<synchronous>, transform_indices = @transform_1, window_bounds = array<i64: 27, 4, 128>}, {pipeline_mode = #tpu.pipeline_mode<synchronous>, transform_indices = @transform_2, window_bounds = array<i64: 1, 128>}, {transform_indices = @transform_3, window_bounds = array<i64: 1, 1, 40, 128>}]} {
    %cst = arith.constant 0.000000e+00 : f32
    %0 = vector.broadcast %cst : f32 to vector<40x128xf32>
    %c2_i32 = arith.constant 2 : i32
    %1 = arith.muli %arg1, %c2_i32 : i32
    %c0_i32 = arith.constant 0 : i32
    %2 = arith.addi %1, %c0_i32 : i32
    %c0 = arith.constant 0 : index
    %3 = arith.index_cast %2 : i32 to index
    %c0_0 = arith.constant 0 : index
    %c0_1 = arith.constant 0 : index
    %4 = tpu.strided_load %arg2[%c0, %3, %c0_0, %c0_1] {strides = array<i32: 1, 1, 2, 1>} : memref<1x10x104x4xf32, #tpu.memory_space<vmem>>, vector<1x1x40x4xf32>
    %5 = vector.shape_cast %4 : vector<1x1x40x4xf32> to vector<40x4xf32>
    %c0_2 = arith.constant 0 : index
    %c0_3 = arith.constant 0 : index
    %c0_4 = arith.constant 0 : index
    %6 = vector.load %arg3[%c0_2, %c0_3, %c0_4] : memref<27x4x128xf32, #tpu.memory_space<vmem>>, vector<1x4x128xf32>
    %7 = vector.shape_cast %6 : vector<1x4x128xf32> to vector<4x128xf32>
    %cst_5 = arith.constant dense<0.000000e+00> : vector<40x128xf32>
    %8 = tpu.matmul %5, %7, %cst_5 {dimension_numbers = #tpu.dot_dimension_numbers<[1], [0], [0], [1], [0, 0, 1, 1], [], []>} : vector<40x4xf32>, vector<4x128xf32>, vector<40x128xf32> -> vector<40x128xf32>
    %9 = arith.addf %0, %8 : vector<40x128xf32>
    %c0_6 = arith.constant 0 : index
    %10 = arith.index_cast %2 : i32 to index
    %c1 = arith.constant 1 : index
    %c0_7 = arith.constant 0 : index
    %11 = tpu.strided_load %arg2[%c0_6, %10, %c1, %c0_7] {strides = array<i32: 1, 1, 2, 1>} : memref<1x10x104x4xf32, #tpu.memory_space<vmem>>, vector<1x1x40x4xf32>
    %12 = vector.shape_cast %11 : vector<1x1x40x4xf32> to vector<40x4xf32>
    %c1_8 = arith.constant 1 : index
    %c0_9 = arith.constant 0 : index
    %c0_10 = arith.constant 0 : index
    %13 = vector.load %arg3[%c1_8, %c0_9, %c0_10] : memref<27x4x128xf32, #tpu.memory_space<vmem>>, vector<1x4x128xf32>
    %14 = vector.shape_cast %13 : vector<1x4x128xf32> to vector<4x128xf32>
    %cst_11 = arith.constant dense<0.000000e+00> : vector<40x128xf32>
    %15 = tpu.matmul %12, %14, %cst_11 {dimension_numbers = #tpu.dot_dimension_numbers<[1], [0], [0], [1], [0, 0, 1, 1], [], []>} : vector<40x4xf32>, vector<4x128xf32>, vector<40x128xf32> -> vector<40x128xf32>
    %16 = arith.addf %9, %15 : vector<40x128xf32>
    %c0_12 = arith.constant 0 : index
    %17 = arith.index_cast %2 : i32 to index
    %c2 = arith.constant 2 : index
    %c0_13 = arith.constant 0 : index
    %18 = tpu.strided_load %arg2[%c0_12, %17, %c2, %c0_13] {strides = array<i32: 1, 1, 2, 1>} : memref<1x10x104x4xf32, #tpu.memory_space<vmem>>, vector<1x1x40x4xf32>
    %19 = vector.shape_cast %18 : vector<1x1x40x4xf32> to vector<40x4xf32>
    %c2_14 = arith.constant 2 : index
    %c0_15 = arith.constant 0 : index
    %c0_16 = arith.constant 0 : index
    %20 = vector.load %arg3[%c2_14, %c0_15, %c0_16] : memref<27x4x128xf32, #tpu.memory_space<vmem>>, vector<1x4x128xf32>
    %21 = vector.shape_cast %20 : vector<1x4x128xf32> to vector<4x128xf32>
    %cst_17 = arith.constant dense<0.000000e+00> : vector<40x128xf32>
    %22 = tpu.matmul %19, %21, %cst_17 {dimension_numbers = #tpu.dot_dimension_numbers<[1], [0], [0], [1], [0, 0, 1, 1], [], []>} : vector<40x4xf32>, vector<4x128xf32>, vector<40x128xf32> -> vector<40x128xf32>
    %23 = arith.addf %16, %22 : vector<40x128xf32>
    %c0_18 = arith.constant 0 : index
    %24 = arith.index_cast %2 : i32 to index
    %c10 = arith.constant 10 : index
    %c0_19 = arith.constant 0 : index
    %25 = tpu.strided_load %arg2[%c0_18, %24, %c10, %c0_19] {strides = array<i32: 1, 1, 2, 1>} : memref<1x10x104x4xf32, #tpu.memory_space<vmem>>, vector<1x1x40x4xf32>
    %26 = vector.shape_cast %25 : vector<1x1x40x4xf32> to vector<40x4xf32>
    %c3 = arith.constant 3 : index
    %c0_20 = arith.constant 0 : index
    %c0_21 = arith.constant 0 : index
    %27 = vector.load %arg3[%c3, %c0_20, %c0_21] : memref<27x4x128xf32, #tpu.memory_space<vmem>>, vector<1x4x128xf32>
    %28 = vector.shape_cast %27 : vector<1x4x128xf32> to vector<4x128xf32>
    %cst_22 = arith.constant dense<0.000000e+00> : vector<40x128xf32>
    %29 = tpu.matmul %26, %28, %cst_22 {dimension_numbers = #tpu.dot_dimension_numbers<[1], [0], [0], [1], [0, 0, 1, 1], [], []>} : vector<40x4xf32>, vector<4x128xf32>, vector<40x128xf32> -> vector<40x128xf32>
    %30 = arith.addf %23, %29 : vector<40x128xf32>
    %c0_23 = arith.constant 0 : index
    %31 = arith.index_cast %2 : i32 to index
    %c11 = arith.constant 11 : index
    %c0_24 = arith.constant 0 : index
    %32 = tpu.strided_load %arg2[%c0_23, %31, %c11, %c0_24] {strides = array<i32: 1, 1, 2, 1>} : memref<1x10x104x4xf32, #tpu.memory_space<vmem>>, vector<1x1x40x4xf32>
    %33 = vector.shape_cast %32 : vector<1x1x40x4xf32> to vector<40x4xf32>
    %c4 = arith.constant 4 : index
    %c0_25 = arith.constant 0 : index
    %c0_26 = arith.constant 0 : index
    %34 = vector.load %arg3[%c4, %c0_25, %c0_26] : memref<27x4x128xf32, #tpu.memory_space<vmem>>, vector<1x4x128xf32>
    %35 = vector.shape_cast %34 : vector<1x4x128xf32> to vector<4x128xf32>
    %cst_27 = arith.constant dense<0.000000e+00> : vector<40x128xf32>
    %36 = tpu.matmul %33, %35, %cst_27 {dimension_numbers = #tpu.dot_dimension_numbers<[1], [0], [0], [1], [0, 0, 1, 1], [], []>} : vector<40x4xf32>, vector<4x128xf32>, vector<40x128xf32> -> vector<40x128xf32>
    %37 = arith.addf %30, %36 : vector<40x128xf32>
    %c0_28 = arith.constant 0 : index
    %38 = arith.index_cast %2 : i32 to index
    %c12 = arith.constant 12 : index
    %c0_29 = arith.constant 0 : index
    %39 = tpu.strided_load %arg2[%c0_28, %38, %c12, %c0_29] {strides = array<i32: 1, 1, 2, 1>} : memref<1x10x104x4xf32, #tpu.memory_space<vmem>>, vector<1x1x40x4xf32>
    %40 = vector.shape_cast %39 : vector<1x1x40x4xf32> to vector<40x4xf32>
    %c5 = arith.constant 5 : index
    %c0_30 = arith.constant 0 : index
    %c0_31 = arith.constant 0 : index
    %41 = vector.load %arg3[%c5, %c0_30, %c0_31] : memref<27x4x128xf32, #tpu.memory_space<vmem>>, vector<1x4x128xf32>
    %42 = vector.shape_cast %41 : vector<1x4x128xf32> to vector<4x128xf32>
    %cst_32 = arith.constant dense<0.000000e+00> : vector<40x128xf32>
    %43 = tpu.matmul %40, %42, %cst_32 {dimension_numbers = #tpu.dot_dimension_numbers<[1], [0], [0], [1], [0, 0, 1, 1], [], []>} : vector<40x4xf32>, vector<4x128xf32>, vector<40x128xf32> -> vector<40x128xf32>
    %44 = arith.addf %37, %43 : vector<40x128xf32>
    %c0_33 = arith.constant 0 : index
    %45 = arith.index_cast %2 : i32 to index
    %c20 = arith.constant 20 : index
    %c0_34 = arith.constant 0 : index
    %46 = tpu.strided_load %arg2[%c0_33, %45, %c20, %c0_34] {strides = array<i32: 1, 1, 2, 1>} : memref<1x10x104x4xf32, #tpu.memory_space<vmem>>, vector<1x1x40x4xf32>
    %47 = vector.shape_cast %46 : vector<1x1x40x4xf32> to vector<40x4xf32>
    %c6 = arith.constant 6 : index
    %c0_35 = arith.constant 0 : index
    %c0_36 = arith.constant 0 : index
    %48 = vector.load %arg3[%c6, %c0_35, %c0_36] : memref<27x4x128xf32, #tpu.memory_space<vmem>>, vector<1x4x128xf32>
    %49 = vector.shape_cast %48 : vector<1x4x128xf32> to vector<4x128xf32>
    %cst_37 = arith.constant dense<0.000000e+00> : vector<40x128xf32>
    %50 = tpu.matmul %47, %49, %cst_37 {dimension_numbers = #tpu.dot_dimension_numbers<[1], [0], [0], [1], [0, 0, 1, 1], [], []>} : vector<40x4xf32>, vector<4x128xf32>, vector<40x128xf32> -> vector<40x128xf32>
    %51 = arith.addf %44, %50 : vector<40x128xf32>
    %c0_38 = arith.constant 0 : index
    %52 = arith.index_cast %2 : i32 to index
    %c21 = arith.constant 21 : index
    %c0_39 = arith.constant 0 : index
    %53 = tpu.strided_load %arg2[%c0_38, %52, %c21, %c0_39] {strides = array<i32: 1, 1, 2, 1>} : memref<1x10x104x4xf32, #tpu.memory_space<vmem>>, vector<1x1x40x4xf32>
    %54 = vector.shape_cast %53 : vector<1x1x40x4xf32> to vector<40x4xf32>
    %c7 = arith.constant 7 : index
    %c0_40 = arith.constant 0 : index
    %c0_41 = arith.constant 0 : index
    %55 = vector.load %arg3[%c7, %c0_40, %c0_41] : memref<27x4x128xf32, #tpu.memory_space<vmem>>, vector<1x4x128xf32>
    %56 = vector.shape_cast %55 : vector<1x4x128xf32> to vector<4x128xf32>
    %cst_42 = arith.constant dense<0.000000e+00> : vector<40x128xf32>
    %57 = tpu.matmul %54, %56, %cst_42 {dimension_numbers = #tpu.dot_dimension_numbers<[1], [0], [0], [1], [0, 0, 1, 1], [], []>} : vector<40x4xf32>, vector<4x128xf32>, vector<40x128xf32> -> vector<40x128xf32>
    %58 = arith.addf %51, %57 : vector<40x128xf32>
    %c0_43 = arith.constant 0 : index
    %59 = arith.index_cast %2 : i32 to index
    %c22 = arith.constant 22 : index
    %c0_44 = arith.constant 0 : index
    %60 = tpu.strided_load %arg2[%c0_43, %59, %c22, %c0_44] {strides = array<i32: 1, 1, 2, 1>} : memref<1x10x104x4xf32, #tpu.memory_space<vmem>>, vector<1x1x40x4xf32>
    %61 = vector.shape_cast %60 : vector<1x1x40x4xf32> to vector<40x4xf32>
    %c8 = arith.constant 8 : index
    %c0_45 = arith.constant 0 : index
    %c0_46 = arith.constant 0 : index
    %62 = vector.load %arg3[%c8, %c0_45, %c0_46] : memref<27x4x128xf32, #tpu.memory_space<vmem>>, vector<1x4x128xf32>
    %63 = vector.shape_cast %62 : vector<1x4x128xf32> to vector<4x128xf32>
    %cst_47 = arith.constant dense<0.000000e+00> : vector<40x128xf32>
    %64 = tpu.matmul %61, %63, %cst_47 {dimension_numbers = #tpu.dot_dimension_numbers<[1], [0], [0], [1], [0, 0, 1, 1], [], []>} : vector<40x4xf32>, vector<4x128xf32>, vector<40x128xf32> -> vector<40x128xf32>
    %65 = arith.addf %58, %64 : vector<40x128xf32>
    %c2_i32_48 = arith.constant 2 : i32
    %66 = arith.muli %arg1, %c2_i32_48 : i32
    %c1_i32 = arith.constant 1 : i32
    %67 = arith.addi %66, %c1_i32 : i32
    %c0_49 = arith.constant 0 : index
    %68 = arith.index_cast %67 : i32 to index
    %c0_50 = arith.constant 0 : index
    %c0_51 = arith.constant 0 : index
    %69 = tpu.strided_load %arg2[%c0_49, %68, %c0_50, %c0_51] {strides = array<i32: 1, 1, 2, 1>} : memref<1x10x104x4xf32, #tpu.memory_space<vmem>>, vector<1x1x40x4xf32>
    %70 = vector.shape_cast %69 : vector<1x1x40x4xf32> to vector<40x4xf32>
    %c9 = arith.constant 9 : index
    %c0_52 = arith.constant 0 : index
    %c0_53 = arith.constant 0 : index
    %71 = vector.load %arg3[%c9, %c0_52, %c0_53] : memref<27x4x128xf32, #tpu.memory_space<vmem>>, vector<1x4x128xf32>
    %72 = vector.shape_cast %71 : vector<1x4x128xf32> to vector<4x128xf32>
    %cst_54 = arith.constant dense<0.000000e+00> : vector<40x128xf32>
    %73 = tpu.matmul %70, %72, %cst_54 {dimension_numbers = #tpu.dot_dimension_numbers<[1], [0], [0], [1], [0, 0, 1, 1], [], []>} : vector<40x4xf32>, vector<4x128xf32>, vector<40x128xf32> -> vector<40x128xf32>
    %74 = arith.addf %65, %73 : vector<40x128xf32>
    %c0_55 = arith.constant 0 : index
    %75 = arith.index_cast %67 : i32 to index
    %c1_56 = arith.constant 1 : index
    %c0_57 = arith.constant 0 : index
    %76 = tpu.strided_load %arg2[%c0_55, %75, %c1_56, %c0_57] {strides = array<i32: 1, 1, 2, 1>} : memref<1x10x104x4xf32, #tpu.memory_space<vmem>>, vector<1x1x40x4xf32>
    %77 = vector.shape_cast %76 : vector<1x1x40x4xf32> to vector<40x4xf32>
    %c10_58 = arith.constant 10 : index
    %c0_59 = arith.constant 0 : index
    %c0_60 = arith.constant 0 : index
    %78 = vector.load %arg3[%c10_58, %c0_59, %c0_60] : memref<27x4x128xf32, #tpu.memory_space<vmem>>, vector<1x4x128xf32>
    %79 = vector.shape_cast %78 : vector<1x4x128xf32> to vector<4x128xf32>
    %cst_61 = arith.constant dense<0.000000e+00> : vector<40x128xf32>
    %80 = tpu.matmul %77, %79, %cst_61 {dimension_numbers = #tpu.dot_dimension_numbers<[1], [0], [0], [1], [0, 0, 1, 1], [], []>} : vector<40x4xf32>, vector<4x128xf32>, vector<40x128xf32> -> vector<40x128xf32>
    %81 = arith.addf %74, %80 : vector<40x128xf32>
    %c0_62 = arith.constant 0 : index
    %82 = arith.index_cast %67 : i32 to index
    %c2_63 = arith.constant 2 : index
    %c0_64 = arith.constant 0 : index
    %83 = tpu.strided_load %arg2[%c0_62, %82, %c2_63, %c0_64] {strides = array<i32: 1, 1, 2, 1>} : memref<1x10x104x4xf32, #tpu.memory_space<vmem>>, vector<1x1x40x4xf32>
    %84 = vector.shape_cast %83 : vector<1x1x40x4xf32> to vector<40x4xf32>
    %c11_65 = arith.constant 11 : index
    %c0_66 = arith.constant 0 : index
    %c0_67 = arith.constant 0 : index
    %85 = vector.load %arg3[%c11_65, %c0_66, %c0_67] : memref<27x4x128xf32, #tpu.memory_space<vmem>>, vector<1x4x128xf32>
    %86 = vector.shape_cast %85 : vector<1x4x128xf32> to vector<4x128xf32>
    %cst_68 = arith.constant dense<0.000000e+00> : vector<40x128xf32>
    %87 = tpu.matmul %84, %86, %cst_68 {dimension_numbers = #tpu.dot_dimension_numbers<[1], [0], [0], [1], [0, 0, 1, 1], [], []>} : vector<40x4xf32>, vector<4x128xf32>, vector<40x128xf32> -> vector<40x128xf32>
    %88 = arith.addf %81, %87 : vector<40x128xf32>
    %c0_69 = arith.constant 0 : index
    %89 = arith.index_cast %67 : i32 to index
    %c10_70 = arith.constant 10 : index
    %c0_71 = arith.constant 0 : index
    %90 = tpu.strided_load %arg2[%c0_69, %89, %c10_70, %c0_71] {strides = array<i32: 1, 1, 2, 1>} : memref<1x10x104x4xf32, #tpu.memory_space<vmem>>, vector<1x1x40x4xf32>
    %91 = vector.shape_cast %90 : vector<1x1x40x4xf32> to vector<40x4xf32>
    %c12_72 = arith.constant 12 : index
    %c0_73 = arith.constant 0 : index
    %c0_74 = arith.constant 0 : index
    %92 = vector.load %arg3[%c12_72, %c0_73, %c0_74] : memref<27x4x128xf32, #tpu.memory_space<vmem>>, vector<1x4x128xf32>
    %93 = vector.shape_cast %92 : vector<1x4x128xf32> to vector<4x128xf32>
    %cst_75 = arith.constant dense<0.000000e+00> : vector<40x128xf32>
    %94 = tpu.matmul %91, %93, %cst_75 {dimension_numbers = #tpu.dot_dimension_numbers<[1], [0], [0], [1], [0, 0, 1, 1], [], []>} : vector<40x4xf32>, vector<4x128xf32>, vector<40x128xf32> -> vector<40x128xf32>
    %95 = arith.addf %88, %94 : vector<40x128xf32>
    %c0_76 = arith.constant 0 : index
    %96 = arith.index_cast %67 : i32 to index
    %c11_77 = arith.constant 11 : index
    %c0_78 = arith.constant 0 : index
    %97 = tpu.strided_load %arg2[%c0_76, %96, %c11_77, %c0_78] {strides = array<i32: 1, 1, 2, 1>} : memref<1x10x104x4xf32, #tpu.memory_space<vmem>>, vector<1x1x40x4xf32>
    %98 = vector.shape_cast %97 : vector<1x1x40x4xf32> to vector<40x4xf32>
    %c13 = arith.constant 13 : index
    %c0_79 = arith.constant 0 : index
    %c0_80 = arith.constant 0 : index
    %99 = vector.load %arg3[%c13, %c0_79, %c0_80] : memref<27x4x128xf32, #tpu.memory_space<vmem>>, vector<1x4x128xf32>
    %100 = vector.shape_cast %99 : vector<1x4x128xf32> to vector<4x128xf32>
    %cst_81 = arith.constant dense<0.000000e+00> : vector<40x128xf32>
    %101 = tpu.matmul %98, %100, %cst_81 {dimension_numbers = #tpu.dot_dimension_numbers<[1], [0], [0], [1], [0, 0, 1, 1], [], []>} : vector<40x4xf32>, vector<4x128xf32>, vector<40x128xf32> -> vector<40x128xf32>
    %102 = arith.addf %95, %101 : vector<40x128xf32>
    %c0_82 = arith.constant 0 : index
    %103 = arith.index_cast %67 : i32 to index
    %c12_83 = arith.constant 12 : index
    %c0_84 = arith.constant 0 : index
    %104 = tpu.strided_load %arg2[%c0_82, %103, %c12_83, %c0_84] {strides = array<i32: 1, 1, 2, 1>} : memref<1x10x104x4xf32, #tpu.memory_space<vmem>>, vector<1x1x40x4xf32>
    %105 = vector.shape_cast %104 : vector<1x1x40x4xf32> to vector<40x4xf32>
    %c14 = arith.constant 14 : index
    %c0_85 = arith.constant 0 : index
    %c0_86 = arith.constant 0 : index
    %106 = vector.load %arg3[%c14, %c0_85, %c0_86] : memref<27x4x128xf32, #tpu.memory_space<vmem>>, vector<1x4x128xf32>
    %107 = vector.shape_cast %106 : vector<1x4x128xf32> to vector<4x128xf32>
    %cst_87 = arith.constant dense<0.000000e+00> : vector<40x128xf32>
    %108 = tpu.matmul %105, %107, %cst_87 {dimension_numbers = #tpu.dot_dimension_numbers<[1], [0], [0], [1], [0, 0, 1, 1], [], []>} : vector<40x4xf32>, vector<4x128xf32>, vector<40x128xf32> -> vector<40x128xf32>
    %109 = arith.addf %102, %108 : vector<40x128xf32>
    %c0_88 = arith.constant 0 : index
    %110 = arith.index_cast %67 : i32 to index
    %c20_89 = arith.constant 20 : index
    %c0_90 = arith.constant 0 : index
    %111 = tpu.strided_load %arg2[%c0_88, %110, %c20_89, %c0_90] {strides = array<i32: 1, 1, 2, 1>} : memref<1x10x104x4xf32, #tpu.memory_space<vmem>>, vector<1x1x40x4xf32>
    %112 = vector.shape_cast %111 : vector<1x1x40x4xf32> to vector<40x4xf32>
    %c15 = arith.constant 15 : index
    %c0_91 = arith.constant 0 : index
    %c0_92 = arith.constant 0 : index
    %113 = vector.load %arg3[%c15, %c0_91, %c0_92] : memref<27x4x128xf32, #tpu.memory_space<vmem>>, vector<1x4x128xf32>
    %114 = vector.shape_cast %113 : vector<1x4x128xf32> to vector<4x128xf32>
    %cst_93 = arith.constant dense<0.000000e+00> : vector<40x128xf32>
    %115 = tpu.matmul %112, %114, %cst_93 {dimension_numbers = #tpu.dot_dimension_numbers<[1], [0], [0], [1], [0, 0, 1, 1], [], []>} : vector<40x4xf32>, vector<4x128xf32>, vector<40x128xf32> -> vector<40x128xf32>
    %116 = arith.addf %109, %115 : vector<40x128xf32>
    %c0_94 = arith.constant 0 : index
    %117 = arith.index_cast %67 : i32 to index
    %c21_95 = arith.constant 21 : index
    %c0_96 = arith.constant 0 : index
    %118 = tpu.strided_load %arg2[%c0_94, %117, %c21_95, %c0_96] {strides = array<i32: 1, 1, 2, 1>} : memref<1x10x104x4xf32, #tpu.memory_space<vmem>>, vector<1x1x40x4xf32>
    %119 = vector.shape_cast %118 : vector<1x1x40x4xf32> to vector<40x4xf32>
    %c16 = arith.constant 16 : index
    %c0_97 = arith.constant 0 : index
    %c0_98 = arith.constant 0 : index
    %120 = vector.load %arg3[%c16, %c0_97, %c0_98] : memref<27x4x128xf32, #tpu.memory_space<vmem>>, vector<1x4x128xf32>
    %121 = vector.shape_cast %120 : vector<1x4x128xf32> to vector<4x128xf32>
    %cst_99 = arith.constant dense<0.000000e+00> : vector<40x128xf32>
    %122 = tpu.matmul %119, %121, %cst_99 {dimension_numbers = #tpu.dot_dimension_numbers<[1], [0], [0], [1], [0, 0, 1, 1], [], []>} : vector<40x4xf32>, vector<4x128xf32>, vector<40x128xf32> -> vector<40x128xf32>
    %123 = arith.addf %116, %122 : vector<40x128xf32>
    %c0_100 = arith.constant 0 : index
    %124 = arith.index_cast %67 : i32 to index
    %c22_101 = arith.constant 22 : index
    %c0_102 = arith.constant 0 : index
    %125 = tpu.strided_load %arg2[%c0_100, %124, %c22_101, %c0_102] {strides = array<i32: 1, 1, 2, 1>} : memref<1x10x104x4xf32, #tpu.memory_space<vmem>>, vector<1x1x40x4xf32>
    %126 = vector.shape_cast %125 : vector<1x1x40x4xf32> to vector<40x4xf32>
    %c17 = arith.constant 17 : index
    %c0_103 = arith.constant 0 : index
    %c0_104 = arith.constant 0 : index
    %127 = vector.load %arg3[%c17, %c0_103, %c0_104] : memref<27x4x128xf32, #tpu.memory_space<vmem>>, vector<1x4x128xf32>
    %128 = vector.shape_cast %127 : vector<1x4x128xf32> to vector<4x128xf32>
    %cst_105 = arith.constant dense<0.000000e+00> : vector<40x128xf32>
    %129 = tpu.matmul %126, %128, %cst_105 {dimension_numbers = #tpu.dot_dimension_numbers<[1], [0], [0], [1], [0, 0, 1, 1], [], []>} : vector<40x4xf32>, vector<4x128xf32>, vector<40x128xf32> -> vector<40x128xf32>
    %130 = arith.addf %123, %129 : vector<40x128xf32>
    %c2_i32_106 = arith.constant 2 : i32
    %131 = arith.muli %arg1, %c2_i32_106 : i32
    %c2_i32_107 = arith.constant 2 : i32
    %132 = arith.addi %131, %c2_i32_107 : i32
    %c0_108 = arith.constant 0 : index
    %133 = arith.index_cast %132 : i32 to index
    %c0_109 = arith.constant 0 : index
    %c0_110 = arith.constant 0 : index
    %134 = tpu.strided_load %arg2[%c0_108, %133, %c0_109, %c0_110] {strides = array<i32: 1, 1, 2, 1>} : memref<1x10x104x4xf32, #tpu.memory_space<vmem>>, vector<1x1x40x4xf32>
    %135 = vector.shape_cast %134 : vector<1x1x40x4xf32> to vector<40x4xf32>
    %c18 = arith.constant 18 : index
    %c0_111 = arith.constant 0 : index
    %c0_112 = arith.constant 0 : index
    %136 = vector.load %arg3[%c18, %c0_111, %c0_112] : memref<27x4x128xf32, #tpu.memory_space<vmem>>, vector<1x4x128xf32>
    %137 = vector.shape_cast %136 : vector<1x4x128xf32> to vector<4x128xf32>
    %cst_113 = arith.constant dense<0.000000e+00> : vector<40x128xf32>
    %138 = tpu.matmul %135, %137, %cst_113 {dimension_numbers = #tpu.dot_dimension_numbers<[1], [0], [0], [1], [0, 0, 1, 1], [], []>} : vector<40x4xf32>, vector<4x128xf32>, vector<40x128xf32> -> vector<40x128xf32>
    %139 = arith.addf %130, %138 : vector<40x128xf32>
    %c0_114 = arith.constant 0 : index
    %140 = arith.index_cast %132 : i32 to index
    %c1_115 = arith.constant 1 : index
    %c0_116 = arith.constant 0 : index
    %141 = tpu.strided_load %arg2[%c0_114, %140, %c1_115, %c0_116] {strides = array<i32: 1, 1, 2, 1>} : memref<1x10x104x4xf32, #tpu.memory_space<vmem>>, vector<1x1x40x4xf32>
    %142 = vector.shape_cast %141 : vector<1x1x40x4xf32> to vector<40x4xf32>
    %c19 = arith.constant 19 : index
    %c0_117 = arith.constant 0 : index
    %c0_118 = arith.constant 0 : index
    %143 = vector.load %arg3[%c19, %c0_117, %c0_118] : memref<27x4x128xf32, #tpu.memory_space<vmem>>, vector<1x4x128xf32>
    %144 = vector.shape_cast %143 : vector<1x4x128xf32> to vector<4x128xf32>
    %cst_119 = arith.constant dense<0.000000e+00> : vector<40x128xf32>
    %145 = tpu.matmul %142, %144, %cst_119 {dimension_numbers = #tpu.dot_dimension_numbers<[1], [0], [0], [1], [0, 0, 1, 1], [], []>} : vector<40x4xf32>, vector<4x128xf32>, vector<40x128xf32> -> vector<40x128xf32>
    %146 = arith.addf %139, %145 : vector<40x128xf32>
    %c0_120 = arith.constant 0 : index
    %147 = arith.index_cast %132 : i32 to index
    %c2_121 = arith.constant 2 : index
    %c0_122 = arith.constant 0 : index
    %148 = tpu.strided_load %arg2[%c0_120, %147, %c2_121, %c0_122] {strides = array<i32: 1, 1, 2, 1>} : memref<1x10x104x4xf32, #tpu.memory_space<vmem>>, vector<1x1x40x4xf32>
    %149 = vector.shape_cast %148 : vector<1x1x40x4xf32> to vector<40x4xf32>
    %c20_123 = arith.constant 20 : index
    %c0_124 = arith.constant 0 : index
    %c0_125 = arith.constant 0 : index
    %150 = vector.load %arg3[%c20_123, %c0_124, %c0_125] : memref<27x4x128xf32, #tpu.memory_space<vmem>>, vector<1x4x128xf32>
    %151 = vector.shape_cast %150 : vector<1x4x128xf32> to vector<4x128xf32>
    %cst_126 = arith.constant dense<0.000000e+00> : vector<40x128xf32>
    %152 = tpu.matmul %149, %151, %cst_126 {dimension_numbers = #tpu.dot_dimension_numbers<[1], [0], [0], [1], [0, 0, 1, 1], [], []>} : vector<40x4xf32>, vector<4x128xf32>, vector<40x128xf32> -> vector<40x128xf32>
    %153 = arith.addf %146, %152 : vector<40x128xf32>
    %c0_127 = arith.constant 0 : index
    %154 = arith.index_cast %132 : i32 to index
    %c10_128 = arith.constant 10 : index
    %c0_129 = arith.constant 0 : index
    %155 = tpu.strided_load %arg2[%c0_127, %154, %c10_128, %c0_129] {strides = array<i32: 1, 1, 2, 1>} : memref<1x10x104x4xf32, #tpu.memory_space<vmem>>, vector<1x1x40x4xf32>
    %156 = vector.shape_cast %155 : vector<1x1x40x4xf32> to vector<40x4xf32>
    %c21_130 = arith.constant 21 : index
    %c0_131 = arith.constant 0 : index
    %c0_132 = arith.constant 0 : index
    %157 = vector.load %arg3[%c21_130, %c0_131, %c0_132] : memref<27x4x128xf32, #tpu.memory_space<vmem>>, vector<1x4x128xf32>
    %158 = vector.shape_cast %157 : vector<1x4x128xf32> to vector<4x128xf32>
    %cst_133 = arith.constant dense<0.000000e+00> : vector<40x128xf32>
    %159 = tpu.matmul %156, %158, %cst_133 {dimension_numbers = #tpu.dot_dimension_numbers<[1], [0], [0], [1], [0, 0, 1, 1], [], []>} : vector<40x4xf32>, vector<4x128xf32>, vector<40x128xf32> -> vector<40x128xf32>
    %160 = arith.addf %153, %159 : vector<40x128xf32>
    %c0_134 = arith.constant 0 : index
    %161 = arith.index_cast %132 : i32 to index
    %c11_135 = arith.constant 11 : index
    %c0_136 = arith.constant 0 : index
    %162 = tpu.strided_load %arg2[%c0_134, %161, %c11_135, %c0_136] {strides = array<i32: 1, 1, 2, 1>} : memref<1x10x104x4xf32, #tpu.memory_space<vmem>>, vector<1x1x40x4xf32>
    %163 = vector.shape_cast %162 : vector<1x1x40x4xf32> to vector<40x4xf32>
    %c22_137 = arith.constant 22 : index
    %c0_138 = arith.constant 0 : index
    %c0_139 = arith.constant 0 : index
    %164 = vector.load %arg3[%c22_137, %c0_138, %c0_139] : memref<27x4x128xf32, #tpu.memory_space<vmem>>, vector<1x4x128xf32>
    %165 = vector.shape_cast %164 : vector<1x4x128xf32> to vector<4x128xf32>
    %cst_140 = arith.constant dense<0.000000e+00> : vector<40x128xf32>
    %166 = tpu.matmul %163, %165, %cst_140 {dimension_numbers = #tpu.dot_dimension_numbers<[1], [0], [0], [1], [0, 0, 1, 1], [], []>} : vector<40x4xf32>, vector<4x128xf32>, vector<40x128xf32> -> vector<40x128xf32>
    %167 = arith.addf %160, %166 : vector<40x128xf32>
    %c0_141 = arith.constant 0 : index
    %168 = arith.index_cast %132 : i32 to index
    %c12_142 = arith.constant 12 : index
    %c0_143 = arith.constant 0 : index
    %169 = tpu.strided_load %arg2[%c0_141, %168, %c12_142, %c0_143] {strides = array<i32: 1, 1, 2, 1>} : memref<1x10x104x4xf32, #tpu.memory_space<vmem>>, vector<1x1x40x4xf32>
    %170 = vector.shape_cast %169 : vector<1x1x40x4xf32> to vector<40x4xf32>
    %c23 = arith.constant 23 : index
    %c0_144 = arith.constant 0 : index
    %c0_145 = arith.constant 0 : index
    %171 = vector.load %arg3[%c23, %c0_144, %c0_145] : memref<27x4x128xf32, #tpu.memory_space<vmem>>, vector<1x4x128xf32>
    %172 = vector.shape_cast %171 : vector<1x4x128xf32> to vector<4x128xf32>
    %cst_146 = arith.constant dense<0.000000e+00> : vector<40x128xf32>
    %173 = tpu.matmul %170, %172, %cst_146 {dimension_numbers = #tpu.dot_dimension_numbers<[1], [0], [0], [1], [0, 0, 1, 1], [], []>} : vector<40x4xf32>, vector<4x128xf32>, vector<40x128xf32> -> vector<40x128xf32>
    %174 = arith.addf %167, %173 : vector<40x128xf32>
    %c0_147 = arith.constant 0 : index
    %175 = arith.index_cast %132 : i32 to index
    %c20_148 = arith.constant 20 : index
    %c0_149 = arith.constant 0 : index
    %176 = tpu.strided_load %arg2[%c0_147, %175, %c20_148, %c0_149] {strides = array<i32: 1, 1, 2, 1>} : memref<1x10x104x4xf32, #tpu.memory_space<vmem>>, vector<1x1x40x4xf32>
    %177 = vector.shape_cast %176 : vector<1x1x40x4xf32> to vector<40x4xf32>
    %c24 = arith.constant 24 : index
    %c0_150 = arith.constant 0 : index
    %c0_151 = arith.constant 0 : index
    %178 = vector.load %arg3[%c24, %c0_150, %c0_151] : memref<27x4x128xf32, #tpu.memory_space<vmem>>, vector<1x4x128xf32>
    %179 = vector.shape_cast %178 : vector<1x4x128xf32> to vector<4x128xf32>
    %cst_152 = arith.constant dense<0.000000e+00> : vector<40x128xf32>
    %180 = tpu.matmul %177, %179, %cst_152 {dimension_numbers = #tpu.dot_dimension_numbers<[1], [0], [0], [1], [0, 0, 1, 1], [], []>} : vector<40x4xf32>, vector<4x128xf32>, vector<40x128xf32> -> vector<40x128xf32>
    %181 = arith.addf %174, %180 : vector<40x128xf32>
    %c0_153 = arith.constant 0 : index
    %182 = arith.index_cast %132 : i32 to index
    %c21_154 = arith.constant 21 : index
    %c0_155 = arith.constant 0 : index
    %183 = tpu.strided_load %arg2[%c0_153, %182, %c21_154, %c0_155] {strides = array<i32: 1, 1, 2, 1>} : memref<1x10x104x4xf32, #tpu.memory_space<vmem>>, vector<1x1x40x4xf32>
    %184 = vector.shape_cast %183 : vector<1x1x40x4xf32> to vector<40x4xf32>
    %c25 = arith.constant 25 : index
    %c0_156 = arith.constant 0 : index
    %c0_157 = arith.constant 0 : index
    %185 = vector.load %arg3[%c25, %c0_156, %c0_157] : memref<27x4x128xf32, #tpu.memory_space<vmem>>, vector<1x4x128xf32>
    %186 = vector.shape_cast %185 : vector<1x4x128xf32> to vector<4x128xf32>
    %cst_158 = arith.constant dense<0.000000e+00> : vector<40x128xf32>
    %187 = tpu.matmul %184, %186, %cst_158 {dimension_numbers = #tpu.dot_dimension_numbers<[1], [0], [0], [1], [0, 0, 1, 1], [], []>} : vector<40x4xf32>, vector<4x128xf32>, vector<40x128xf32> -> vector<40x128xf32>
    %188 = arith.addf %181, %187 : vector<40x128xf32>
    %c0_159 = arith.constant 0 : index
    %189 = arith.index_cast %132 : i32 to index
    %c22_160 = arith.constant 22 : index
    %c0_161 = arith.constant 0 : index
    %190 = tpu.strided_load %arg2[%c0_159, %189, %c22_160, %c0_161] {strides = array<i32: 1, 1, 2, 1>} : memref<1x10x104x4xf32, #tpu.memory_space<vmem>>, vector<1x1x40x4xf32>
    %191 = vector.shape_cast %190 : vector<1x1x40x4xf32> to vector<40x4xf32>
    %c26 = arith.constant 26 : index
    %c0_162 = arith.constant 0 : index
    %c0_163 = arith.constant 0 : index
    %192 = vector.load %arg3[%c26, %c0_162, %c0_163] : memref<27x4x128xf32, #tpu.memory_space<vmem>>, vector<1x4x128xf32>
    %193 = vector.shape_cast %192 : vector<1x4x128xf32> to vector<4x128xf32>
    %cst_164 = arith.constant dense<0.000000e+00> : vector<40x128xf32>
    %194 = tpu.matmul %191, %193, %cst_164 {dimension_numbers = #tpu.dot_dimension_numbers<[1], [0], [0], [1], [0, 0, 1, 1], [], []>} : vector<40x4xf32>, vector<4x128xf32>, vector<40x128xf32> -> vector<40x128xf32>
    %195 = arith.addf %188, %194 : vector<40x128xf32>
    %c0_165 = arith.constant 0 : index
    %c0_166 = arith.constant 0 : index
    %196 = vector.load %arg4[%c0_165, %c0_166] : memref<1x128xf32, #tpu.memory_space<vmem>>, vector<1x128xf32>
    %197 = vector.broadcast %196 : vector<1x128xf32> to vector<40x128xf32>
    %198 = arith.addf %195, %197 : vector<40x128xf32>
    %cst_167 = arith.constant 0.000000e+00 : f32
    %199 = vector.broadcast %cst_167 : f32 to vector<40x128xf32>
    %200 = arith.maximumf %198, %199 : vector<40x128xf32>
    %c0_168 = arith.constant 0 : index
    %c0_169 = arith.constant 0 : index
    %c0_170 = arith.constant 0 : index
    %c0_171 = arith.constant 0 : index
    %201 = vector.load %arg5[%c0_168, %c0_169, %c0_170, %c0_171] : memref<1x1x40x128xf32, #tpu.memory_space<vmem>>, vector<1x1x40x128xf32>
    %202 = vector.shape_cast %201 : vector<1x1x40x128xf32> to vector<40x128xf32>
    %203 = vector.shape_cast %200 : vector<40x128xf32> to vector<1x1x40x128xf32>
    tpu.vector_store %arg5[%c0_168, %c0_169, %c0_170, %c0_171], %203 {strides = array<i32>} : memref<1x1x40x128xf32, #tpu.memory_space<vmem>>, vector<1x1x40x128xf32>,
    return
  }
  func.func @transform_0(%arg0: i32, %arg1: i32) -> (i32, i32, i32, i32) {
    %c0_i32 = arith.constant 0 : i32
    %c0_i32_0 = arith.constant 0 : i32
    %c0_i32_1 = arith.constant 0 : i32
    %c0_i32_2 = arith.constant 0 : i32
    return %arg0, %c0_i32, %c0_i32_0, %c0_i32_1 : i32, i32, i32, i32
  }
  func.func @transform_1(%arg0: i32, %arg1: i32) -> (i32, i32, i32) {
    %c0_i32 = arith.constant 0 : i32
    %c0_i32_0 = arith.constant 0 : i32
    %c0_i32_1 = arith.constant 0 : i32
    %c0_i32_2 = arith.constant 0 : i32
    return %c0_i32, %c0_i32_0, %c0_i32_1 : i32, i32, i32
  }
  func.func @transform_2(%arg0: i32, %arg1: i32) -> (i32, i32) {
    %c0_i32 = arith.constant 0 : i32
    %c0_i32_0 = arith.constant 0 : i32
    %c0_i32_1 = arith.constant 0 : i32
    return %c0_i32, %c0_i32_0 : i32, i32
  }
  func.func @transform_3(%arg0: i32, %arg1: i32) -> (i32, i32, i32, i32) {
    %c0_i32 = arith.constant 0 : i32
    %c0_i32_0 = arith.constant 0 : i32
    %c0_i32_1 = arith.constant 0 : i32
    return %arg0, %arg1, %c0_i32, %c0_i32_0 : i32, i32, i32, i32
  }
}

module attributes {stable_mosaic.version = 11 : i64} {
  func.func @_conv_tap_kernel(%arg0: i32, %arg1: i32, %arg2: memref<1x4x16x4xf32, #tpu.memory_space<vmem>>, %arg3: memref<1x4x128xf32, #tpu.memory_space<vmem>>, %arg4: memref<1x128xf32, #tpu.memory_space<vmem>>, %arg5: memref<1x1x16x128xf32, #tpu.memory_space<vmem>>) attributes {dimension_semantics = [#tpu.dimension_semantics<parallel>, #tpu.dimension_semantics<parallel>], iteration_bounds = array<i64: 2, 4>, scalar_prefetch = 0 : i64, scratch_operands = 0 : i64, tpu.core_type = #tpu.core_type<tc>, window_params = [{transform_indices = @transform_0, window_bounds = array<i64: 1, 4, 16, 4>}, {pipeline_mode = #tpu.pipeline_mode<synchronous>, transform_indices = @transform_1, window_bounds = array<i64: 1, 4, 128>}, {pipeline_mode = #tpu.pipeline_mode<synchronous>, transform_indices = @transform_2, window_bounds = array<i64: 1, 128>}, {transform_indices = @transform_3, window_bounds = array<i64: 1, 1, 16, 128>}]} {
    %cst = arith.constant 0.000000e+00 : f32
    %0 = vector.broadcast %cst : f32 to vector<16x128xf32>
    %c1_i32 = arith.constant 1 : i32
    %1 = arith.muli %arg1, %c1_i32 : i32
    %c0_i32 = arith.constant 0 : i32
    %2 = arith.addi %1, %c0_i32 : i32
    %c0 = arith.constant 0 : index
    %3 = arith.index_cast %2 : i32 to index
    %c0_0 = arith.constant 0 : index
    %c0_1 = arith.constant 0 : index
    %4 = vector.load %arg2[%c0, %3, %c0_0, %c0_1] : memref<1x4x16x4xf32, #tpu.memory_space<vmem>>, vector<1x1x16x4xf32>
    %5 = vector.shape_cast %4 : vector<1x1x16x4xf32> to vector<16x4xf32>
    %c0_2 = arith.constant 0 : index
    %c0_3 = arith.constant 0 : index
    %c0_4 = arith.constant 0 : index
    %6 = vector.load %arg3[%c0_2, %c0_3, %c0_4] : memref<1x4x128xf32, #tpu.memory_space<vmem>>, vector<1x4x128xf32>
    %7 = vector.shape_cast %6 : vector<1x4x128xf32> to vector<4x128xf32>
    %cst_5 = arith.constant dense<0.000000e+00> : vector<16x128xf32>
    %8 = tpu.matmul %5, %7, %cst_5 {dimension_numbers = #tpu.dot_dimension_numbers<[1], [0], [0], [1], [0, 0, 1, 1], [], []>} : vector<16x4xf32>, vector<4x128xf32>, vector<16x128xf32> -> vector<16x128xf32>
    %9 = arith.addf %0, %8 : vector<16x128xf32>
    %c0_6 = arith.constant 0 : index
    %c0_7 = arith.constant 0 : index
    %10 = vector.load %arg4[%c0_6, %c0_7] : memref<1x128xf32, #tpu.memory_space<vmem>>, vector<1x128xf32>
    %11 = vector.broadcast %10 : vector<1x128xf32> to vector<16x128xf32>
    %12 = arith.addf %9, %11 : vector<16x128xf32>
    %c0_8 = arith.constant 0 : index
    %c0_9 = arith.constant 0 : index
    %c0_10 = arith.constant 0 : index
    %c0_11 = arith.constant 0 : index
    %13 = vector.load %arg5[%c0_8, %c0_9, %c0_10, %c0_11] : memref<1x1x16x128xf32, #tpu.memory_space<vmem>>, vector<1x1x16x128xf32>
    %14 = vector.shape_cast %13 : vector<1x1x16x128xf32> to vector<16x128xf32>
    %15 = vector.shape_cast %12 : vector<16x128xf32> to vector<1x1x16x128xf32>
    tpu.vector_store %arg5[%c0_8, %c0_9, %c0_10, %c0_11], %15 {strides = array<i32>} : memref<1x1x16x128xf32, #tpu.memory_space<vmem>>, vector<1x1x16x128xf32>,
    return
  }
  func.func @transform_0(%arg0: i32, %arg1: i32) -> (i32, i32, i32, i32) {
    %c0_i32 = arith.constant 0 : i32
    %c0_i32_0 = arith.constant 0 : i32
    %c0_i32_1 = arith.constant 0 : i32
    %c0_i32_2 = arith.constant 0 : i32
    return %arg0, %c0_i32, %c0_i32_0, %c0_i32_1 : i32, i32, i32, i32
  }
  func.func @transform_1(%arg0: i32, %arg1: i32) -> (i32, i32, i32) {
    %c0_i32 = arith.constant 0 : i32
    %c0_i32_0 = arith.constant 0 : i32
    %c0_i32_1 = arith.constant 0 : i32
    %c0_i32_2 = arith.constant 0 : i32
    return %c0_i32, %c0_i32_0, %c0_i32_1 : i32, i32, i32
  }
  func.func @transform_2(%arg0: i32, %arg1: i32) -> (i32, i32) {
    %c0_i32 = arith.constant 0 : i32
    %c0_i32_0 = arith.constant 0 : i32
    %c0_i32_1 = arith.constant 0 : i32
    return %c0_i32, %c0_i32_0 : i32, i32
  }
  func.func @transform_3(%arg0: i32, %arg1: i32) -> (i32, i32, i32, i32) {
    %c0_i32 = arith.constant 0 : i32
    %c0_i32_0 = arith.constant 0 : i32
    %c0_i32_1 = arith.constant 0 : i32
    return %arg0, %arg1, %c0_i32, %c0_i32_0 : i32, i32, i32, i32
  }
}

module attributes {stable_mosaic.version = 11 : i64} {
  func.func @_conv_tap_kernel(%arg0: i32, %arg1: i32, %arg2: memref<1x6x40x128xf32, #tpu.memory_space<vmem>>, %arg3: memref<27x128x128xf32, #tpu.memory_space<vmem>>, %arg4: memref<1x128xf32, #tpu.memory_space<vmem>>, %arg5: memref<1x1x24x128xf32, #tpu.memory_space<vmem>>, %arg6: memref<1x1x24x128xf32, #tpu.memory_space<vmem>>) attributes {dimension_semantics = [#tpu.dimension_semantics<parallel>, #tpu.dimension_semantics<parallel>], iteration_bounds = array<i64: 2, 4>, scalar_prefetch = 0 : i64, scratch_operands = 0 : i64, tpu.core_type = #tpu.core_type<tc>, window_params = [{transform_indices = @transform_0, window_bounds = array<i64: 1, 6, 40, 128>}, {pipeline_mode = #tpu.pipeline_mode<synchronous>, transform_indices = @transform_1, window_bounds = array<i64: 27, 128, 128>}, {pipeline_mode = #tpu.pipeline_mode<synchronous>, transform_indices = @transform_2, window_bounds = array<i64: 1, 128>}, {transform_indices = @transform_3, window_bounds = array<i64: 1, 1, 24, 128>}, {transform_indices = @transform_4, window_bounds = array<i64: 1, 1, 24, 128>}]} {
    %cst = arith.constant 0.000000e+00 : f32
    %0 = vector.broadcast %cst : f32 to vector<24x128xf32>
    %c1_i32 = arith.constant 1 : i32
    %1 = arith.muli %arg1, %c1_i32 : i32
    %c0_i32 = arith.constant 0 : i32
    %2 = arith.addi %1, %c0_i32 : i32
    %c0 = arith.constant 0 : index
    %3 = arith.index_cast %2 : i32 to index
    %c0_0 = arith.constant 0 : index
    %c0_1 = arith.constant 0 : index
    %4 = vector.load %arg2[%c0, %3, %c0_0, %c0_1] : memref<1x6x40x128xf32, #tpu.memory_space<vmem>>, vector<1x1x24x128xf32>
    %5 = vector.shape_cast %4 : vector<1x1x24x128xf32> to vector<24x128xf32>
    %c0_2 = arith.constant 0 : index
    %c0_3 = arith.constant 0 : index
    %c0_4 = arith.constant 0 : index
    %6 = vector.load %arg3[%c0_2, %c0_3, %c0_4] : memref<27x128x128xf32, #tpu.memory_space<vmem>>, vector<1x128x128xf32>
    %7 = vector.shape_cast %6 : vector<1x128x128xf32> to vector<128x128xf32>
    %cst_5 = arith.constant dense<0.000000e+00> : vector<24x128xf32>
    %8 = tpu.matmul %5, %7, %cst_5 {dimension_numbers = #tpu.dot_dimension_numbers<[1], [0], [0], [1], [0, 0, 1, 1], [], []>} : vector<24x128xf32>, vector<128x128xf32>, vector<24x128xf32> -> vector<24x128xf32>
    %9 = arith.addf %0, %8 : vector<24x128xf32>
    %c0_6 = arith.constant 0 : index
    %10 = arith.index_cast %2 : i32 to index
    %c1 = arith.constant 1 : index
    %c0_7 = arith.constant 0 : index
    %11 = vector.load %arg2[%c0_6, %10, %c1, %c0_7] : memref<1x6x40x128xf32, #tpu.memory_space<vmem>>, vector<1x1x24x128xf32>
    %12 = vector.shape_cast %11 : vector<1x1x24x128xf32> to vector<24x128xf32>
    %c1_8 = arith.constant 1 : index
    %c0_9 = arith.constant 0 : index
    %c0_10 = arith.constant 0 : index
    %13 = vector.load %arg3[%c1_8, %c0_9, %c0_10] : memref<27x128x128xf32, #tpu.memory_space<vmem>>, vector<1x128x128xf32>
    %14 = vector.shape_cast %13 : vector<1x128x128xf32> to vector<128x128xf32>
    %cst_11 = arith.constant dense<0.000000e+00> : vector<24x128xf32>
    %15 = tpu.matmul %12, %14, %cst_11 {dimension_numbers = #tpu.dot_dimension_numbers<[1], [0], [0], [1], [0, 0, 1, 1], [], []>} : vector<24x128xf32>, vector<128x128xf32>, vector<24x128xf32> -> vector<24x128xf32>
    %16 = arith.addf %9, %15 : vector<24x128xf32>
    %c0_12 = arith.constant 0 : index
    %17 = arith.index_cast %2 : i32 to index
    %c2 = arith.constant 2 : index
    %c0_13 = arith.constant 0 : index
    %18 = vector.load %arg2[%c0_12, %17, %c2, %c0_13] : memref<1x6x40x128xf32, #tpu.memory_space<vmem>>, vector<1x1x24x128xf32>
    %19 = vector.shape_cast %18 : vector<1x1x24x128xf32> to vector<24x128xf32>
    %c2_14 = arith.constant 2 : index
    %c0_15 = arith.constant 0 : index
    %c0_16 = arith.constant 0 : index
    %20 = vector.load %arg3[%c2_14, %c0_15, %c0_16] : memref<27x128x128xf32, #tpu.memory_space<vmem>>, vector<1x128x128xf32>
    %21 = vector.shape_cast %20 : vector<1x128x128xf32> to vector<128x128xf32>
    %cst_17 = arith.constant dense<0.000000e+00> : vector<24x128xf32>
    %22 = tpu.matmul %19, %21, %cst_17 {dimension_numbers = #tpu.dot_dimension_numbers<[1], [0], [0], [1], [0, 0, 1, 1], [], []>} : vector<24x128xf32>, vector<128x128xf32>, vector<24x128xf32> -> vector<24x128xf32>
    %23 = arith.addf %16, %22 : vector<24x128xf32>
    %c0_18 = arith.constant 0 : index
    %24 = arith.index_cast %2 : i32 to index
    %c6 = arith.constant 6 : index
    %c0_19 = arith.constant 0 : index
    %25 = vector.load %arg2[%c0_18, %24, %c6, %c0_19] : memref<1x6x40x128xf32, #tpu.memory_space<vmem>>, vector<1x1x24x128xf32>
    %26 = vector.shape_cast %25 : vector<1x1x24x128xf32> to vector<24x128xf32>
    %c3 = arith.constant 3 : index
    %c0_20 = arith.constant 0 : index
    %c0_21 = arith.constant 0 : index
    %27 = vector.load %arg3[%c3, %c0_20, %c0_21] : memref<27x128x128xf32, #tpu.memory_space<vmem>>, vector<1x128x128xf32>
    %28 = vector.shape_cast %27 : vector<1x128x128xf32> to vector<128x128xf32>
    %cst_22 = arith.constant dense<0.000000e+00> : vector<24x128xf32>
    %29 = tpu.matmul %26, %28, %cst_22 {dimension_numbers = #tpu.dot_dimension_numbers<[1], [0], [0], [1], [0, 0, 1, 1], [], []>} : vector<24x128xf32>, vector<128x128xf32>, vector<24x128xf32> -> vector<24x128xf32>
    %30 = arith.addf %23, %29 : vector<24x128xf32>
    %c0_23 = arith.constant 0 : index
    %31 = arith.index_cast %2 : i32 to index
    %c7 = arith.constant 7 : index
    %c0_24 = arith.constant 0 : index
    %32 = vector.load %arg2[%c0_23, %31, %c7, %c0_24] : memref<1x6x40x128xf32, #tpu.memory_space<vmem>>, vector<1x1x24x128xf32>
    %33 = vector.shape_cast %32 : vector<1x1x24x128xf32> to vector<24x128xf32>
    %c4 = arith.constant 4 : index
    %c0_25 = arith.constant 0 : index
    %c0_26 = arith.constant 0 : index
    %34 = vector.load %arg3[%c4, %c0_25, %c0_26] : memref<27x128x128xf32, #tpu.memory_space<vmem>>, vector<1x128x128xf32>
    %35 = vector.shape_cast %34 : vector<1x128x128xf32> to vector<128x128xf32>
    %cst_27 = arith.constant dense<0.000000e+00> : vector<24x128xf32>
    %36 = tpu.matmul %33, %35, %cst_27 {dimension_numbers = #tpu.dot_dimension_numbers<[1], [0], [0], [1], [0, 0, 1, 1], [], []>} : vector<24x128xf32>, vector<128x128xf32>, vector<24x128xf32> -> vector<24x128xf32>
    %37 = arith.addf %30, %36 : vector<24x128xf32>
    %c0_28 = arith.constant 0 : index
    %38 = arith.index_cast %2 : i32 to index
    %c8 = arith.constant 8 : index
    %c0_29 = arith.constant 0 : index
    %39 = vector.load %arg2[%c0_28, %38, %c8, %c0_29] : memref<1x6x40x128xf32, #tpu.memory_space<vmem>>, vector<1x1x24x128xf32>
    %40 = vector.shape_cast %39 : vector<1x1x24x128xf32> to vector<24x128xf32>
    %c5 = arith.constant 5 : index
    %c0_30 = arith.constant 0 : index
    %c0_31 = arith.constant 0 : index
    %41 = vector.load %arg3[%c5, %c0_30, %c0_31] : memref<27x128x128xf32, #tpu.memory_space<vmem>>, vector<1x128x128xf32>
    %42 = vector.shape_cast %41 : vector<1x128x128xf32> to vector<128x128xf32>
    %cst_32 = arith.constant dense<0.000000e+00> : vector<24x128xf32>
    %43 = tpu.matmul %40, %42, %cst_32 {dimension_numbers = #tpu.dot_dimension_numbers<[1], [0], [0], [1], [0, 0, 1, 1], [], []>} : vector<24x128xf32>, vector<128x128xf32>, vector<24x128xf32> -> vector<24x128xf32>
    %44 = arith.addf %37, %43 : vector<24x128xf32>
    %c0_33 = arith.constant 0 : index
    %45 = arith.index_cast %2 : i32 to index
    %c12 = arith.constant 12 : index
    %c0_34 = arith.constant 0 : index
    %46 = vector.load %arg2[%c0_33, %45, %c12, %c0_34] : memref<1x6x40x128xf32, #tpu.memory_space<vmem>>, vector<1x1x24x128xf32>
    %47 = vector.shape_cast %46 : vector<1x1x24x128xf32> to vector<24x128xf32>
    %c6_35 = arith.constant 6 : index
    %c0_36 = arith.constant 0 : index
    %c0_37 = arith.constant 0 : index
    %48 = vector.load %arg3[%c6_35, %c0_36, %c0_37] : memref<27x128x128xf32, #tpu.memory_space<vmem>>, vector<1x128x128xf32>
    %49 = vector.shape_cast %48 : vector<1x128x128xf32> to vector<128x128xf32>
    %cst_38 = arith.constant dense<0.000000e+00> : vector<24x128xf32>
    %50 = tpu.matmul %47, %49, %cst_38 {dimension_numbers = #tpu.dot_dimension_numbers<[1], [0], [0], [1], [0, 0, 1, 1], [], []>} : vector<24x128xf32>, vector<128x128xf32>, vector<24x128xf32> -> vector<24x128xf32>
    %51 = arith.addf %44, %50 : vector<24x128xf32>
    %c0_39 = arith.constant 0 : index
    %52 = arith.index_cast %2 : i32 to index
    %c13 = arith.constant 13 : index
    %c0_40 = arith.constant 0 : index
    %53 = vector.load %arg2[%c0_39, %52, %c13, %c0_40] : memref<1x6x40x128xf32, #tpu.memory_space<vmem>>, vector<1x1x24x128xf32>
    %54 = vector.shape_cast %53 : vector<1x1x24x128xf32> to vector<24x128xf32>
    %c7_41 = arith.constant 7 : index
    %c0_42 = arith.constant 0 : index
    %c0_43 = arith.constant 0 : index
    %55 = vector.load %arg3[%c7_41, %c0_42, %c0_43] : memref<27x128x128xf32, #tpu.memory_space<vmem>>, vector<1x128x128xf32>
    %56 = vector.shape_cast %55 : vector<1x128x128xf32> to vector<128x128xf32>
    %cst_44 = arith.constant dense<0.000000e+00> : vector<24x128xf32>
    %57 = tpu.matmul %54, %56, %cst_44 {dimension_numbers = #tpu.dot_dimension_numbers<[1], [0], [0], [1], [0, 0, 1, 1], [], []>} : vector<24x128xf32>, vector<128x128xf32>, vector<24x128xf32> -> vector<24x128xf32>
    %58 = arith.addf %51, %57 : vector<24x128xf32>
    %c0_45 = arith.constant 0 : index
    %59 = arith.index_cast %2 : i32 to index
    %c14 = arith.constant 14 : index
    %c0_46 = arith.constant 0 : index
    %60 = vector.load %arg2[%c0_45, %59, %c14, %c0_46] : memref<1x6x40x128xf32, #tpu.memory_space<vmem>>, vector<1x1x24x128xf32>
    %61 = vector.shape_cast %60 : vector<1x1x24x128xf32> to vector<24x128xf32>
    %c8_47 = arith.constant 8 : index
    %c0_48 = arith.constant 0 : index
    %c0_49 = arith.constant 0 : index
    %62 = vector.load %arg3[%c8_47, %c0_48, %c0_49] : memref<27x128x128xf32, #tpu.memory_space<vmem>>, vector<1x128x128xf32>
    %63 = vector.shape_cast %62 : vector<1x128x128xf32> to vector<128x128xf32>
    %cst_50 = arith.constant dense<0.000000e+00> : vector<24x128xf32>
    %64 = tpu.matmul %61, %63, %cst_50 {dimension_numbers = #tpu.dot_dimension_numbers<[1], [0], [0], [1], [0, 0, 1, 1], [], []>} : vector<24x128xf32>, vector<128x128xf32>, vector<24x128xf32> -> vector<24x128xf32>
    %65 = arith.addf %58, %64 : vector<24x128xf32>
    %c1_i32_51 = arith.constant 1 : i32
    %66 = arith.muli %arg1, %c1_i32_51 : i32
    %c1_i32_52 = arith.constant 1 : i32
    %67 = arith.addi %66, %c1_i32_52 : i32
    %c0_53 = arith.constant 0 : index
    %68 = arith.index_cast %67 : i32 to index
    %c0_54 = arith.constant 0 : index
    %c0_55 = arith.constant 0 : index
    %69 = vector.load %arg2[%c0_53, %68, %c0_54, %c0_55] : memref<1x6x40x128xf32, #tpu.memory_space<vmem>>, vector<1x1x24x128xf32>
    %70 = vector.shape_cast %69 : vector<1x1x24x128xf32> to vector<24x128xf32>
    %c9 = arith.constant 9 : index
    %c0_56 = arith.constant 0 : index
    %c0_57 = arith.constant 0 : index
    %71 = vector.load %arg3[%c9, %c0_56, %c0_57] : memref<27x128x128xf32, #tpu.memory_space<vmem>>, vector<1x128x128xf32>
    %72 = vector.shape_cast %71 : vector<1x128x128xf32> to vector<128x128xf32>
    %cst_58 = arith.constant dense<0.000000e+00> : vector<24x128xf32>
    %73 = tpu.matmul %70, %72, %cst_58 {dimension_numbers = #tpu.dot_dimension_numbers<[1], [0], [0], [1], [0, 0, 1, 1], [], []>} : vector<24x128xf32>, vector<128x128xf32>, vector<24x128xf32> -> vector<24x128xf32>
    %74 = arith.addf %65, %73 : vector<24x128xf32>
    %c0_59 = arith.constant 0 : index
    %75 = arith.index_cast %67 : i32 to index
    %c1_60 = arith.constant 1 : index
    %c0_61 = arith.constant 0 : index
    %76 = vector.load %arg2[%c0_59, %75, %c1_60, %c0_61] : memref<1x6x40x128xf32, #tpu.memory_space<vmem>>, vector<1x1x24x128xf32>
    %77 = vector.shape_cast %76 : vector<1x1x24x128xf32> to vector<24x128xf32>
    %c10 = arith.constant 10 : index
    %c0_62 = arith.constant 0 : index
    %c0_63 = arith.constant 0 : index
    %78 = vector.load %arg3[%c10, %c0_62, %c0_63] : memref<27x128x128xf32, #tpu.memory_space<vmem>>, vector<1x128x128xf32>
    %79 = vector.shape_cast %78 : vector<1x128x128xf32> to vector<128x128xf32>
    %cst_64 = arith.constant dense<0.000000e+00> : vector<24x128xf32>
    %80 = tpu.matmul %77, %79, %cst_64 {dimension_numbers = #tpu.dot_dimension_numbers<[1], [0], [0], [1], [0, 0, 1, 1], [], []>} : vector<24x128xf32>, vector<128x128xf32>, vector<24x128xf32> -> vector<24x128xf32>
    %81 = arith.addf %74, %80 : vector<24x128xf32>
    %c0_65 = arith.constant 0 : index
    %82 = arith.index_cast %67 : i32 to index
    %c2_66 = arith.constant 2 : index
    %c0_67 = arith.constant 0 : index
    %83 = vector.load %arg2[%c0_65, %82, %c2_66, %c0_67] : memref<1x6x40x128xf32, #tpu.memory_space<vmem>>, vector<1x1x24x128xf32>
    %84 = vector.shape_cast %83 : vector<1x1x24x128xf32> to vector<24x128xf32>
    %c11 = arith.constant 11 : index
    %c0_68 = arith.constant 0 : index
    %c0_69 = arith.constant 0 : index
    %85 = vector.load %arg3[%c11, %c0_68, %c0_69] : memref<27x128x128xf32, #tpu.memory_space<vmem>>, vector<1x128x128xf32>
    %86 = vector.shape_cast %85 : vector<1x128x128xf32> to vector<128x128xf32>
    %cst_70 = arith.constant dense<0.000000e+00> : vector<24x128xf32>
    %87 = tpu.matmul %84, %86, %cst_70 {dimension_numbers = #tpu.dot_dimension_numbers<[1], [0], [0], [1], [0, 0, 1, 1], [], []>} : vector<24x128xf32>, vector<128x128xf32>, vector<24x128xf32> -> vector<24x128xf32>
    %88 = arith.addf %81, %87 : vector<24x128xf32>
    %c0_71 = arith.constant 0 : index
    %89 = arith.index_cast %67 : i32 to index
    %c6_72 = arith.constant 6 : index
    %c0_73 = arith.constant 0 : index
    %90 = vector.load %arg2[%c0_71, %89, %c6_72, %c0_73] : memref<1x6x40x128xf32, #tpu.memory_space<vmem>>, vector<1x1x24x128xf32>
    %91 = vector.shape_cast %90 : vector<1x1x24x128xf32> to vector<24x128xf32>
    %c12_74 = arith.constant 12 : index
    %c0_75 = arith.constant 0 : index
    %c0_76 = arith.constant 0 : index
    %92 = vector.load %arg3[%c12_74, %c0_75, %c0_76] : memref<27x128x128xf32, #tpu.memory_space<vmem>>, vector<1x128x128xf32>
    %93 = vector.shape_cast %92 : vector<1x128x128xf32> to vector<128x128xf32>
    %cst_77 = arith.constant dense<0.000000e+00> : vector<24x128xf32>
    %94 = tpu.matmul %91, %93, %cst_77 {dimension_numbers = #tpu.dot_dimension_numbers<[1], [0], [0], [1], [0, 0, 1, 1], [], []>} : vector<24x128xf32>, vector<128x128xf32>, vector<24x128xf32> -> vector<24x128xf32>
    %95 = arith.addf %88, %94 : vector<24x128xf32>
    %c0_78 = arith.constant 0 : index
    %96 = arith.index_cast %67 : i32 to index
    %c7_79 = arith.constant 7 : index
    %c0_80 = arith.constant 0 : index
    %97 = vector.load %arg2[%c0_78, %96, %c7_79, %c0_80] : memref<1x6x40x128xf32, #tpu.memory_space<vmem>>, vector<1x1x24x128xf32>
    %98 = vector.shape_cast %97 : vector<1x1x24x128xf32> to vector<24x128xf32>
    %c13_81 = arith.constant 13 : index
    %c0_82 = arith.constant 0 : index
    %c0_83 = arith.constant 0 : index
    %99 = vector.load %arg3[%c13_81, %c0_82, %c0_83] : memref<27x128x128xf32, #tpu.memory_space<vmem>>, vector<1x128x128xf32>
    %100 = vector.shape_cast %99 : vector<1x128x128xf32> to vector<128x128xf32>
    %cst_84 = arith.constant dense<0.000000e+00> : vector<24x128xf32>
    %101 = tpu.matmul %98, %100, %cst_84 {dimension_numbers = #tpu.dot_dimension_numbers<[1], [0], [0], [1], [0, 0, 1, 1], [], []>} : vector<24x128xf32>, vector<128x128xf32>, vector<24x128xf32> -> vector<24x128xf32>
    %102 = arith.addf %95, %101 : vector<24x128xf32>
    %c0_85 = arith.constant 0 : index
    %103 = arith.index_cast %67 : i32 to index
    %c8_86 = arith.constant 8 : index
    %c0_87 = arith.constant 0 : index
    %104 = vector.load %arg2[%c0_85, %103, %c8_86, %c0_87] : memref<1x6x40x128xf32, #tpu.memory_space<vmem>>, vector<1x1x24x128xf32>
    %105 = vector.shape_cast %104 : vector<1x1x24x128xf32> to vector<24x128xf32>
    %c14_88 = arith.constant 14 : index
    %c0_89 = arith.constant 0 : index
    %c0_90 = arith.constant 0 : index
    %106 = vector.load %arg3[%c14_88, %c0_89, %c0_90] : memref<27x128x128xf32, #tpu.memory_space<vmem>>, vector<1x128x128xf32>
    %107 = vector.shape_cast %106 : vector<1x128x128xf32> to vector<128x128xf32>
    %cst_91 = arith.constant dense<0.000000e+00> : vector<24x128xf32>
    %108 = tpu.matmul %105, %107, %cst_91 {dimension_numbers = #tpu.dot_dimension_numbers<[1], [0], [0], [1], [0, 0, 1, 1], [], []>} : vector<24x128xf32>, vector<128x128xf32>, vector<24x128xf32> -> vector<24x128xf32>
    %109 = arith.addf %102, %108 : vector<24x128xf32>
    %c0_92 = arith.constant 0 : index
    %110 = arith.index_cast %67 : i32 to index
    %c12_93 = arith.constant 12 : index
    %c0_94 = arith.constant 0 : index
    %111 = vector.load %arg2[%c0_92, %110, %c12_93, %c0_94] : memref<1x6x40x128xf32, #tpu.memory_space<vmem>>, vector<1x1x24x128xf32>
    %112 = vector.shape_cast %111 : vector<1x1x24x128xf32> to vector<24x128xf32>
    %c15 = arith.constant 15 : index
    %c0_95 = arith.constant 0 : index
    %c0_96 = arith.constant 0 : index
    %113 = vector.load %arg3[%c15, %c0_95, %c0_96] : memref<27x128x128xf32, #tpu.memory_space<vmem>>, vector<1x128x128xf32>
    %114 = vector.shape_cast %113 : vector<1x128x128xf32> to vector<128x128xf32>
    %cst_97 = arith.constant dense<0.000000e+00> : vector<24x128xf32>
    %115 = tpu.matmul %112, %114, %cst_97 {dimension_numbers = #tpu.dot_dimension_numbers<[1], [0], [0], [1], [0, 0, 1, 1], [], []>} : vector<24x128xf32>, vector<128x128xf32>, vector<24x128xf32> -> vector<24x128xf32>
    %116 = arith.addf %109, %115 : vector<24x128xf32>
    %c0_98 = arith.constant 0 : index
    %117 = arith.index_cast %67 : i32 to index
    %c13_99 = arith.constant 13 : index
    %c0_100 = arith.constant 0 : index
    %118 = vector.load %arg2[%c0_98, %117, %c13_99, %c0_100] : memref<1x6x40x128xf32, #tpu.memory_space<vmem>>, vector<1x1x24x128xf32>
    %119 = vector.shape_cast %118 : vector<1x1x24x128xf32> to vector<24x128xf32>
    %c16 = arith.constant 16 : index
    %c0_101 = arith.constant 0 : index
    %c0_102 = arith.constant 0 : index
    %120 = vector.load %arg3[%c16, %c0_101, %c0_102] : memref<27x128x128xf32, #tpu.memory_space<vmem>>, vector<1x128x128xf32>
    %121 = vector.shape_cast %120 : vector<1x128x128xf32> to vector<128x128xf32>
    %cst_103 = arith.constant dense<0.000000e+00> : vector<24x128xf32>
    %122 = tpu.matmul %119, %121, %cst_103 {dimension_numbers = #tpu.dot_dimension_numbers<[1], [0], [0], [1], [0, 0, 1, 1], [], []>} : vector<24x128xf32>, vector<128x128xf32>, vector<24x128xf32> -> vector<24x128xf32>
    %123 = arith.addf %116, %122 : vector<24x128xf32>
    %c0_104 = arith.constant 0 : index
    %124 = arith.index_cast %67 : i32 to index
    %c14_105 = arith.constant 14 : index
    %c0_106 = arith.constant 0 : index
    %125 = vector.load %arg2[%c0_104, %124, %c14_105, %c0_106] : memref<1x6x40x128xf32, #tpu.memory_space<vmem>>, vector<1x1x24x128xf32>
    %126 = vector.shape_cast %125 : vector<1x1x24x128xf32> to vector<24x128xf32>
    %c17 = arith.constant 17 : index
    %c0_107 = arith.constant 0 : index
    %c0_108 = arith.constant 0 : index
    %127 = vector.load %arg3[%c17, %c0_107, %c0_108] : memref<27x128x128xf32, #tpu.memory_space<vmem>>, vector<1x128x128xf32>
    %128 = vector.shape_cast %127 : vector<1x128x128xf32> to vector<128x128xf32>
    %cst_109 = arith.constant dense<0.000000e+00> : vector<24x128xf32>
    %129 = tpu.matmul %126, %128, %cst_109 {dimension_numbers = #tpu.dot_dimension_numbers<[1], [0], [0], [1], [0, 0, 1, 1], [], []>} : vector<24x128xf32>, vector<128x128xf32>, vector<24x128xf32> -> vector<24x128xf32>
    %130 = arith.addf %123, %129 : vector<24x128xf32>
    %c1_i32_110 = arith.constant 1 : i32
    %131 = arith.muli %arg1, %c1_i32_110 : i32
    %c2_i32 = arith.constant 2 : i32
    %132 = arith.addi %131, %c2_i32 : i32
    %c0_111 = arith.constant 0 : index
    %133 = arith.index_cast %132 : i32 to index
    %c0_112 = arith.constant 0 : index
    %c0_113 = arith.constant 0 : index
    %134 = vector.load %arg2[%c0_111, %133, %c0_112, %c0_113] : memref<1x6x40x128xf32, #tpu.memory_space<vmem>>, vector<1x1x24x128xf32>
    %135 = vector.shape_cast %134 : vector<1x1x24x128xf32> to vector<24x128xf32>
    %c18 = arith.constant 18 : index
    %c0_114 = arith.constant 0 : index
    %c0_115 = arith.constant 0 : index
    %136 = vector.load %arg3[%c18, %c0_114, %c0_115] : memref<27x128x128xf32, #tpu.memory_space<vmem>>, vector<1x128x128xf32>
    %137 = vector.shape_cast %136 : vector<1x128x128xf32> to vector<128x128xf32>
    %cst_116 = arith.constant dense<0.000000e+00> : vector<24x128xf32>
    %138 = tpu.matmul %135, %137, %cst_116 {dimension_numbers = #tpu.dot_dimension_numbers<[1], [0], [0], [1], [0, 0, 1, 1], [], []>} : vector<24x128xf32>, vector<128x128xf32>, vector<24x128xf32> -> vector<24x128xf32>
    %139 = arith.addf %130, %138 : vector<24x128xf32>
    %c0_117 = arith.constant 0 : index
    %140 = arith.index_cast %132 : i32 to index
    %c1_118 = arith.constant 1 : index
    %c0_119 = arith.constant 0 : index
    %141 = vector.load %arg2[%c0_117, %140, %c1_118, %c0_119] : memref<1x6x40x128xf32, #tpu.memory_space<vmem>>, vector<1x1x24x128xf32>
    %142 = vector.shape_cast %141 : vector<1x1x24x128xf32> to vector<24x128xf32>
    %c19 = arith.constant 19 : index
    %c0_120 = arith.constant 0 : index
    %c0_121 = arith.constant 0 : index
    %143 = vector.load %arg3[%c19, %c0_120, %c0_121] : memref<27x128x128xf32, #tpu.memory_space<vmem>>, vector<1x128x128xf32>
    %144 = vector.shape_cast %143 : vector<1x128x128xf32> to vector<128x128xf32>
    %cst_122 = arith.constant dense<0.000000e+00> : vector<24x128xf32>
    %145 = tpu.matmul %142, %144, %cst_122 {dimension_numbers = #tpu.dot_dimension_numbers<[1], [0], [0], [1], [0, 0, 1, 1], [], []>} : vector<24x128xf32>, vector<128x128xf32>, vector<24x128xf32> -> vector<24x128xf32>
    %146 = arith.addf %139, %145 : vector<24x128xf32>
    %c0_123 = arith.constant 0 : index
    %147 = arith.index_cast %132 : i32 to index
    %c2_124 = arith.constant 2 : index
    %c0_125 = arith.constant 0 : index
    %148 = vector.load %arg2[%c0_123, %147, %c2_124, %c0_125] : memref<1x6x40x128xf32, #tpu.memory_space<vmem>>, vector<1x1x24x128xf32>
    %149 = vector.shape_cast %148 : vector<1x1x24x128xf32> to vector<24x128xf32>
    %c20 = arith.constant 20 : index
    %c0_126 = arith.constant 0 : index
    %c0_127 = arith.constant 0 : index
    %150 = vector.load %arg3[%c20, %c0_126, %c0_127] : memref<27x128x128xf32, #tpu.memory_space<vmem>>, vector<1x128x128xf32>
    %151 = vector.shape_cast %150 : vector<1x128x128xf32> to vector<128x128xf32>
    %cst_128 = arith.constant dense<0.000000e+00> : vector<24x128xf32>
    %152 = tpu.matmul %149, %151, %cst_128 {dimension_numbers = #tpu.dot_dimension_numbers<[1], [0], [0], [1], [0, 0, 1, 1], [], []>} : vector<24x128xf32>, vector<128x128xf32>, vector<24x128xf32> -> vector<24x128xf32>
    %153 = arith.addf %146, %152 : vector<24x128xf32>
    %c0_129 = arith.constant 0 : index
    %154 = arith.index_cast %132 : i32 to index
    %c6_130 = arith.constant 6 : index
    %c0_131 = arith.constant 0 : index
    %155 = vector.load %arg2[%c0_129, %154, %c6_130, %c0_131] : memref<1x6x40x128xf32, #tpu.memory_space<vmem>>, vector<1x1x24x128xf32>
    %156 = vector.shape_cast %155 : vector<1x1x24x128xf32> to vector<24x128xf32>
    %c21 = arith.constant 21 : index
    %c0_132 = arith.constant 0 : index
    %c0_133 = arith.constant 0 : index
    %157 = vector.load %arg3[%c21, %c0_132, %c0_133] : memref<27x128x128xf32, #tpu.memory_space<vmem>>, vector<1x128x128xf32>
    %158 = vector.shape_cast %157 : vector<1x128x128xf32> to vector<128x128xf32>
    %cst_134 = arith.constant dense<0.000000e+00> : vector<24x128xf32>
    %159 = tpu.matmul %156, %158, %cst_134 {dimension_numbers = #tpu.dot_dimension_numbers<[1], [0], [0], [1], [0, 0, 1, 1], [], []>} : vector<24x128xf32>, vector<128x128xf32>, vector<24x128xf32> -> vector<24x128xf32>
    %160 = arith.addf %153, %159 : vector<24x128xf32>
    %c0_135 = arith.constant 0 : index
    %161 = arith.index_cast %132 : i32 to index
    %c7_136 = arith.constant 7 : index
    %c0_137 = arith.constant 0 : index
    %162 = vector.load %arg2[%c0_135, %161, %c7_136, %c0_137] : memref<1x6x40x128xf32, #tpu.memory_space<vmem>>, vector<1x1x24x128xf32>
    %163 = vector.shape_cast %162 : vector<1x1x24x128xf32> to vector<24x128xf32>
    %c22 = arith.constant 22 : index
    %c0_138 = arith.constant 0 : index
    %c0_139 = arith.constant 0 : index
    %164 = vector.load %arg3[%c22, %c0_138, %c0_139] : memref<27x128x128xf32, #tpu.memory_space<vmem>>, vector<1x128x128xf32>
    %165 = vector.shape_cast %164 : vector<1x128x128xf32> to vector<128x128xf32>
    %cst_140 = arith.constant dense<0.000000e+00> : vector<24x128xf32>
    %166 = tpu.matmul %163, %165, %cst_140 {dimension_numbers = #tpu.dot_dimension_numbers<[1], [0], [0], [1], [0, 0, 1, 1], [], []>} : vector<24x128xf32>, vector<128x128xf32>, vector<24x128xf32> -> vector<24x128xf32>
    %167 = arith.addf %160, %166 : vector<24x128xf32>
    %c0_141 = arith.constant 0 : index
    %168 = arith.index_cast %132 : i32 to index
    %c8_142 = arith.constant 8 : index
    %c0_143 = arith.constant 0 : index
    %169 = vector.load %arg2[%c0_141, %168, %c8_142, %c0_143] : memref<1x6x40x128xf32, #tpu.memory_space<vmem>>, vector<1x1x24x128xf32>
    %170 = vector.shape_cast %169 : vector<1x1x24x128xf32> to vector<24x128xf32>
    %c23 = arith.constant 23 : index
    %c0_144 = arith.constant 0 : index
    %c0_145 = arith.constant 0 : index
    %171 = vector.load %arg3[%c23, %c0_144, %c0_145] : memref<27x128x128xf32, #tpu.memory_space<vmem>>, vector<1x128x128xf32>
    %172 = vector.shape_cast %171 : vector<1x128x128xf32> to vector<128x128xf32>
    %cst_146 = arith.constant dense<0.000000e+00> : vector<24x128xf32>
    %173 = tpu.matmul %170, %172, %cst_146 {dimension_numbers = #tpu.dot_dimension_numbers<[1], [0], [0], [1], [0, 0, 1, 1], [], []>} : vector<24x128xf32>, vector<128x128xf32>, vector<24x128xf32> -> vector<24x128xf32>
    %174 = arith.addf %167, %173 : vector<24x128xf32>
    %c0_147 = arith.constant 0 : index
    %175 = arith.index_cast %132 : i32 to index
    %c12_148 = arith.constant 12 : index
    %c0_149 = arith.constant 0 : index
    %176 = vector.load %arg2[%c0_147, %175, %c12_148, %c0_149] : memref<1x6x40x128xf32, #tpu.memory_space<vmem>>, vector<1x1x24x128xf32>
    %177 = vector.shape_cast %176 : vector<1x1x24x128xf32> to vector<24x128xf32>
    %c24 = arith.constant 24 : index
    %c0_150 = arith.constant 0 : index
    %c0_151 = arith.constant 0 : index
    %178 = vector.load %arg3[%c24, %c0_150, %c0_151] : memref<27x128x128xf32, #tpu.memory_space<vmem>>, vector<1x128x128xf32>
    %179 = vector.shape_cast %178 : vector<1x128x128xf32> to vector<128x128xf32>
    %cst_152 = arith.constant dense<0.000000e+00> : vector<24x128xf32>
    %180 = tpu.matmul %177, %179, %cst_152 {dimension_numbers = #tpu.dot_dimension_numbers<[1], [0], [0], [1], [0, 0, 1, 1], [], []>} : vector<24x128xf32>, vector<128x128xf32>, vector<24x128xf32> -> vector<24x128xf32>
    %181 = arith.addf %174, %180 : vector<24x128xf32>
    %c0_153 = arith.constant 0 : index
    %182 = arith.index_cast %132 : i32 to index
    %c13_154 = arith.constant 13 : index
    %c0_155 = arith.constant 0 : index
    %183 = vector.load %arg2[%c0_153, %182, %c13_154, %c0_155] : memref<1x6x40x128xf32, #tpu.memory_space<vmem>>, vector<1x1x24x128xf32>
    %184 = vector.shape_cast %183 : vector<1x1x24x128xf32> to vector<24x128xf32>
    %c25 = arith.constant 25 : index
    %c0_156 = arith.constant 0 : index
    %c0_157 = arith.constant 0 : index
    %185 = vector.load %arg3[%c25, %c0_156, %c0_157] : memref<27x128x128xf32, #tpu.memory_space<vmem>>, vector<1x128x128xf32>
    %186 = vector.shape_cast %185 : vector<1x128x128xf32> to vector<128x128xf32>
    %cst_158 = arith.constant dense<0.000000e+00> : vector<24x128xf32>
    %187 = tpu.matmul %184, %186, %cst_158 {dimension_numbers = #tpu.dot_dimension_numbers<[1], [0], [0], [1], [0, 0, 1, 1], [], []>} : vector<24x128xf32>, vector<128x128xf32>, vector<24x128xf32> -> vector<24x128xf32>
    %188 = arith.addf %181, %187 : vector<24x128xf32>
    %c0_159 = arith.constant 0 : index
    %189 = arith.index_cast %132 : i32 to index
    %c14_160 = arith.constant 14 : index
    %c0_161 = arith.constant 0 : index
    %190 = vector.load %arg2[%c0_159, %189, %c14_160, %c0_161] : memref<1x6x40x128xf32, #tpu.memory_space<vmem>>, vector<1x1x24x128xf32>
    %191 = vector.shape_cast %190 : vector<1x1x24x128xf32> to vector<24x128xf32>
    %c26 = arith.constant 26 : index
    %c0_162 = arith.constant 0 : index
    %c0_163 = arith.constant 0 : index
    %192 = vector.load %arg3[%c26, %c0_162, %c0_163] : memref<27x128x128xf32, #tpu.memory_space<vmem>>, vector<1x128x128xf32>
    %193 = vector.shape_cast %192 : vector<1x128x128xf32> to vector<128x128xf32>
    %cst_164 = arith.constant dense<0.000000e+00> : vector<24x128xf32>
    %194 = tpu.matmul %191, %193, %cst_164 {dimension_numbers = #tpu.dot_dimension_numbers<[1], [0], [0], [1], [0, 0, 1, 1], [], []>} : vector<24x128xf32>, vector<128x128xf32>, vector<24x128xf32> -> vector<24x128xf32>
    %195 = arith.addf %188, %194 : vector<24x128xf32>
    %c0_165 = arith.constant 0 : index
    %c0_166 = arith.constant 0 : index
    %196 = vector.load %arg4[%c0_165, %c0_166] : memref<1x128xf32, #tpu.memory_space<vmem>>, vector<1x128xf32>
    %197 = vector.broadcast %196 : vector<1x128xf32> to vector<24x128xf32>
    %198 = arith.addf %195, %197 : vector<24x128xf32>
    %c0_167 = arith.constant 0 : index
    %c0_168 = arith.constant 0 : index
    %c0_169 = arith.constant 0 : index
    %c0_170 = arith.constant 0 : index
    %199 = vector.load %arg5[%c0_167, %c0_168, %c0_169, %c0_170] : memref<1x1x24x128xf32, #tpu.memory_space<vmem>>, vector<1x1x24x128xf32>
    %200 = vector.shape_cast %199 : vector<1x1x24x128xf32> to vector<24x128xf32>
    %201 = arith.addf %198, %200 : vector<24x128xf32>
    %cst_171 = arith.constant 0.000000e+00 : f32
    %202 = vector.broadcast %cst_171 : f32 to vector<24x128xf32>
    %203 = arith.maximumf %201, %202 : vector<24x128xf32>
    %c0_172 = arith.constant 0 : index
    %c0_173 = arith.constant 0 : index
    %c0_174 = arith.constant 0 : index
    %c0_175 = arith.constant 0 : index
    %204 = vector.load %arg6[%c0_172, %c0_173, %c0_174, %c0_175] : memref<1x1x24x128xf32, #tpu.memory_space<vmem>>, vector<1x1x24x128xf32>
    %205 = vector.shape_cast %204 : vector<1x1x24x128xf32> to vector<24x128xf32>
    %206 = vector.shape_cast %203 : vector<24x128xf32> to vector<1x1x24x128xf32>
    tpu.vector_store %arg6[%c0_172, %c0_173, %c0_174, %c0_175], %206 {strides = array<i32>} : memref<1x1x24x128xf32, #tpu.memory_space<vmem>>, vector<1x1x24x128xf32>,
    return
  }
  func.func @transform_0(%arg0: i32, %arg1: i32) -> (i32, i32, i32, i32) {
    %c0_i32 = arith.constant 0 : i32
    %c0_i32_0 = arith.constant 0 : i32
    %c0_i32_1 = arith.constant 0 : i32
    %c0_i32_2 = arith.constant 0 : i32
    return %arg0, %c0_i32, %c0_i32_0, %c0_i32_1 : i32, i32, i32, i32
  }
  func.func @transform_1(%arg0: i32, %arg1: i32) -> (i32, i32, i32) {
    %c0_i32 = arith.constant 0 : i32
    %c0_i32_0 = arith.constant 0 : i32
    %c0_i32_1 = arith.constant 0 : i32
    %c0_i32_2 = arith.constant 0 : i32
    return %c0_i32, %c0_i32_0, %c0_i32_1 : i32, i32, i32
  }
  func.func @transform_2(%arg0: i32, %arg1: i32) -> (i32, i32) {
    %c0_i32 = arith.constant 0 : i32
    %c0_i32_0 = arith.constant 0 : i32
    %c0_i32_1 = arith.constant 0 : i32
    return %c0_i32, %c0_i32_0 : i32, i32
  }
  func.func @transform_3(%arg0: i32, %arg1: i32) -> (i32, i32, i32, i32) {
    %c0_i32 = arith.constant 0 : i32
    %c0_i32_0 = arith.constant 0 : i32
    %c0_i32_1 = arith.constant 0 : i32
    return %arg0, %arg1, %c0_i32, %c0_i32_0 : i32, i32, i32, i32
  }
  func.func @transform_4(%arg0: i32, %arg1: i32) -> (i32, i32, i32, i32) {
    %c0_i32 = arith.constant 0 : i32
    %c0_i32_0 = arith.constant 0 : i32
    %c0_i32_1 = arith.constant 0 : i32
    return %arg0, %arg1, %c0_i32, %c0_i32_0 : i32, i32, i32, i32
  }
}

</mosaic_0001>

<bundles_post_ra>
// kernel: a_call__.4
= control target key start
LH: loop header
LB: loop body
LE: loop exit
PB: predicated region body
PF: predicated region fallthrough
CT: control target
= control target key end

     0   :  { %s507_s12 = smov 0   ;;  %s509_s13 = smov 0   ;;  %s569_s0 = inlined_call_operand.vmem [shape: f32[2,4,16,4], index: 0, kind: input, shape index: {}]   ;;  %s570_s1 = inlined_call_operand.vmem [shape: f32[1,4,128], index: 1, kind: input, shape index: {}]   ;;  %s571_s2 = inlined_call_operand.vmem [shape: f32[1,128], index: 2, kind: input, shape index: {}]   ;;  %s572_s3 = inlined_call_operand.vmem [shape: f32[2,4,16,128], index: 3, kind: output, shape index: {}]  }
   0x1   :  { %s511_s14 = smov 0   ;;  %s513_s15 = smov 0  }
   0x2   :  { %s515_s16 = smov 0  }
   0x3 LB: > { %s22_s17 = sadd.s32 1, %s477_s14  ;;  %s25_s18 = sadd.s32 1, %s481_s15  ;;  %s485_s16 = sphi %s515_s16, %s13_s16   ;;  %s481_s15 = sphi %s513_s15, %s576_s15   ;;  %s477_s14 = sphi %s511_s14, %s575_s14   ;;  %s473_s13 = sphi %s509_s13, %s574_s13   ;;  %s469_s12 = sphi %s507_s12, %s573_s12  }
   0x4   : > { %p23_p0 = scmp.ge.s32.totalorder %s22_s17, 4  ;;  %p385_p1 = scmp.ge.s32.totalorder %s485_s16, 1 }
   0x5   : > { %p151_p2 = scmp.lt.s32.totalorder %s485_s16, 9 }
   0x6   : > { %s578_s17 = smov (%p23_p0, %s22_s17), 0  ;;  %s580_s18 = smov (!%p23_p0, %s25_s18), %s481_s15 }
   0x7   : > { %p152_p3 = pnand %p385_p1, %p151_p2  ;;  %p27_p4 = scmp.ge.s32.totalorder %s580_s18, 2 }
   0x8   : > { %p179_p5 = scmp.lt.s32.totalorder (!%p152_p3), %s473_s13, 1  ;;  %s391_s21 = sshll.u32 (!%p152_p3), %s469_s12, 4 }
   0x9   : > { %s582_s18 = smov (%p27_p4, %s580_s18), 0  ;;  %155 = sbr.rel (%p152_p3) target bundleno = 218 (0xda), region = 32 }
   0xa   : > { %p186_p6 = scmp.lt.s32.totalorder (!%p152_p3), %s469_s12, 3 }
   0xe   : > { %v197_v0 = vld [vmem:[%s570_s1] sm:$0xf]  ;;  %vm212_vm0 = vcmask 1043456   ;;  %s584_s13 = smov (!%p179_p5, %s473_s13), 1  ;;  %vm205_vm1 = vcmask 31744   ;;  %s586_s12 = smov (!%p186_p6, %s469_s12), 3 }
   0xf   : > { %402 = vmatprep.subr.msk.mxu0 %vm212_vm0, %v197_v0  ;;  %s398_s22 = sshll.u32 %s584_s13, 6  ;;  %s388_s27 = sshll.u32 %s586_s12, 1  ;;  %v392_v3 = vld [vmem:[%s571_s2] ss:$0 sm:$0xff] }
  0x10   : > { %403 = vmatpush3.msk.msra.mxu0 %vm212_vm0, %v197_v0  ;;  %s183_s25 = scalar_lea.vmem %s569_s0, %s398_s22  ;;  %s389_s28 = sshll.u32 %s584_s13, 3 }
  0x11   : > { %s194_s26 = scalar_lea.vmem %s183_s25, %s391_s21  ;;  %s190_s29 = sadd.s32 %s389_s28, %s388_s27 }
  0x12   : > { %v195_v1 = vld [vmem:[%s194_s26] sm:$0xff]  ;;  %v196_v2 = vld [vmem:[%s194_s26 + $0x8] sm:$0xff]  ;;  %s390_s30 = sshll.u32 %s190_s29, 3 }
  0x13   : > { %404 = vmatprep.mubr.msk.f32.mxu0 %vm205_vm1, %v195_v1  ;;  %s192_s8 = scalar_lea.vmem %s572_s3, %s390_s30 }
  0x14   : > { %405 = vmatmul.mubr.msk.f32.vlgmr.msra.gmra.mxu0 %vm205_vm1, %v196_v2 }
  0xd4   : > { %v406_v4 = vpop.f32.mrf.mxu0 }
  0xd5   : > { %v288_v5 = vadd.f32 %v406_v4, %v392_v3 }
  0xd6   : > { %v282_v6 = vpop.f32.mrf.mxu0 }
  0xd7   : > { %292 = vst [vmem:[%s192_s8 + $0x8] sm:$0xff] %v288_v5  ;;  %v283_v7 = vadd.f32 %v392_v3, %v282_v6 }
  0xd9   : > { %291 = vst [vmem:[%s192_s8] sm:$0xff] %v283_v7 }
  0xda PF: > { %s13_s16 = sadd.s32 1, %s485_s16   ;;  %s573_s12 = smov %s477_s14 }
  0xdb   : > { %p10_p7 = scmp.ge.s32.totalorder %s13_s16, 10   ;;  %s574_s13 = smov %s481_s15 }
  0xdc   : > { %s575_s14 = smov %s578_s17  ;;  %s576_s15 = smov %s582_s18 }
  0xdd   :  { %12 = sbr.rel (!%p10_p7) target bundleno = 3 (0x3), region = 63 }

// kernel: a_call__.3
= control target key start
LH: loop header
LB: loop body
LE: loop exit
PB: predicated region body
PF: predicated region fallthrough
CT: control target
= control target key end

     0   :  { %s4839_s12 = smov 0   ;;  %s4841_s13 = smov 0   ;;  %s5633_s0 = inlined_call_operand.vmem [shape: f32[2,10,104,4], index: 0, kind: input, shape index: {}]   ;;  %s5634_s1 = inlined_call_operand.vmem [shape: f32[27,4,128], index: 1, kind: input, shape index: {}]   ;;  %s5635_s2 = inlined_call_operand.vmem [shape: f32[1,128], index: 2, kind: input, shape index: {}]   ;;  %s5636_s3 = inlined_call_operand.vmem [shape: f32[2,4,40,128], index: 3, kind: output, shape index: {}]  }
   0x1   :  { %s4843_s14 = smov 0   ;;  %s4845_s15 = smov 0  }
   0x2   :  { %s4847_s16 = smov 0  }
   0x3 LB: > { %s22_s17 = sadd.s32 1, %s4807_s14  ;;  %s25_s18 = sadd.s32 1, %s4811_s15  ;;  %s4815_s16 = sphi %s4847_s16, %s13_s16   ;;  %s4811_s15 = sphi %s4845_s15, %s5640_s15   ;;  %s4807_s14 = sphi %s4843_s14, %s5639_s14   ;;  %s4803_s13 = sphi %s4841_s13, %s5638_s13   ;;  %s4799_s12 = sphi %s4839_s12, %s5637_s12  }
   0x4   : > { %p23_p0 = scmp.ge.s32.totalorder %s22_s17, 4  ;;  %p3775_p1 = scmp.ge.s32.totalorder %s4815_s16, 1 }
   0x5   : > { %p151_p2 = scmp.lt.s32.totalorder %s4815_s16, 9 }
   0x6   : > { %s5642_s17 = smov (%p23_p0, %s22_s17), 0  ;;  %s5644_s18 = smov (!%p23_p0, %s25_s18), %s4811_s15 }
   0x7   : > { %p152_p3 = pnand %p3775_p1, %p151_p2  ;;  %p27_p4 = scmp.ge.s32.totalorder %s5644_s18, 2 }
   0x8   : > { %p179_p5 = scmp.lt.s32.totalorder (!%p152_p3), %s4803_s13, 1  ;;  %s3779_s21 = smul.u32 (!%p152_p3), 208, %s4799_s12 }
   0x9   : > { %s5646_s18 = smov (%p27_p4, %s5644_s18), 0  ;;  %155 = sbr.rel (%p152_p3) target bundleno = 488 (0x1e8), region = 32 }
   0xa   : > { %p186_p6 = scmp.lt.s32.totalorder (!%p152_p3), %s4799_s12, 3 }
   0xe   : > { %v3789_v0 = vld [vmem:[%s5634_s1 + $0x4] sm:$0xf]  ;;  %vm234_vm0 = vcmask 1043456   ;;  %v4817_v1 = vmov 0.0   ;;  %s5648_s13 = smov (!%p179_p5, %s4803_s13), 1  ;;  %vm4818_vm1 = vmmov 0  }
   0xf   : > { %4271 = vmatprep.subr.mxu0 %v4817_v1  ;;  %4730 = vmatprep.subr.mxu1 %v4817_v1  ;;  %s4732_s22 = smul.u32 1040, %s5648_s13  ;;  %vm218_vm2 = vcmask 31744   ;;  %v3807_v2 = vld [vmem:[%s5634_s1 + $0x8] sm:$0xf]  ;;  %v205_v3 = vld [vmem:[%s5634_s1] sm:$0xf] }
  0x10   : > { %4272 = vmatpush3.msk.msra.mxu0 %vm234_vm0, %v3789_v0  ;;  %4731 = vmatpush3.msk.msra.mxu1 %vm234_vm0, %v3789_v0  ;;  %v3819_v10 = vld [vmem:[%s5634_s1 + $0xc] sm:$0xf]  ;;  %v3831_v13 = vld [vmem:[%s5634_s1 + $0x10] sm:$0xf]  ;;  %v3843_v22 = vld [vmem:[%s5634_s1 + $0x14] sm:$0xf] }
  0x11   : > { %4273 = vmatprep.mubr.msk.f32.mxu0 %vm4818_vm1, %v4817_v1  ;;  %4282 = vmatprep.mubr.msk.f32.mxu1 %vm4818_vm1, %v4817_v1  ;;  %s183_s25 = scalar_lea.vmem %s5633_s0, %s4732_s22  ;;  %v3855_v25 = vld [vmem:[%s5634_s1 + $0x18] sm:$0xf]  ;;  %v3867_v34 = vld [vmem:[%s5634_s1 + $0x1c] sm:$0xf]  ;;  %v3879_v37 = vld [vmem:[%s5634_s1 + $0x20] sm:$0xf] }
  0x12   : > { %4305 = vmatprep.subr.mxu0 %v4817_v1  ;;  %4288 = vmatprep.subr.mxu1 %v4817_v1  ;;  %s4891_s26 = scalar_lea.vmem %s183_s25, %s3779_s21  ;;  %v3893_v46 = vld [vmem:[%s5634_s1 + $0x24] sm:$0xf]  ;;  %v3905_v49 = vld [vmem:[%s5634_s1 + $0x28] sm:$0xf]  ;;  %v3917_v58 = vld [vmem:[%s5634_s1 + $0x2c] sm:$0xf] }
  0x13   : > { %v3784_v4 = vld [vmem:[%s4891_s26 + $0x1] ss:$2 sm:$0xff]  ;;  %v3787_v5 = vld [vmem:[%s4891_s26 + $0x31] ss:$2 sm:$0xff]  ;;  %v196_v9 = vld [vmem:[%s4891_s26] ss:$2 sm:$0xff] }
  0x14   : > { %4274 = vmatmul.mubr.msk.f32.vlgmr.msra.gmra.mxu0 %vm218_vm2, %v3784_v4  ;;  %4283 = vmatmul.mubr.msk.f32.vlgmr.msra.gmra.mxu1 %vm218_vm2, %v3787_v5  ;;  %v3785_v6 = vld [vmem:[%s4891_s26 + $0x11] ss:$2 sm:$0xff]  ;;  %v3788_v7 = vld [vmem:[%s4891_s26 + $0x41] ss:$2 sm:$0xff]  ;;  %v3780_v11 = vld [vmem:[%s4891_s26 + $0x10] ss:$2 sm:$0xff] }
  0x15   : > { %4306 = vmatpush3.msk.msra.mxu0 %vm234_vm0, %v3807_v2  ;;  %4289 = vmatpush3.msk.msra.mxu1 %vm234_vm0, %v205_v3  ;;  %v3786_v8 = vld [vmem:[%s4891_s26 + $0x21] ss:$2 sm:$0xff]  ;;  %v3802_v12 = vld [vmem:[%s4891_s26 + $0x2] ss:$2 sm:$0xff]  ;;  %v3803_v15 = vld [vmem:[%s4891_s26 + $0x12] ss:$2 sm:$0xff] }
  0x16   : > { %4276 = vmatprep.mubr.msk.f32.mxu0 %vm4818_vm1, %v4817_v1  ;;  %4285 = vmatprep.mubr.msk.f32.mxu1 %vm4818_vm1, %v4817_v1  ;;  %v3781_v14 = vld [vmem:[%s4891_s26 + $0x20] ss:$2 sm:$0xff]  ;;  %v3782_v16 = vld [vmem:[%s4891_s26 + $0x30] ss:$2 sm:$0xff]  ;;  %v3826_v24 = vld [vmem:[%s4891_s26 + $0xb] ss:$2 sm:$0xff] }
  0x17   : > { %4322 = vmatprep.subr.mxu1 %v4817_v1  ;;  %4339 = vmatprep.subr.mxu0 %v4817_v1  ;;  %v3804_v17 = vld [vmem:[%s4891_s26 + $0x22] ss:$2 sm:$0xff]  ;;  %v3805_v19 = vld [vmem:[%s4891_s26 + $0x32] ss:$2 sm:$0xff]  ;;  %v3827_v27 = vld [vmem:[%s4891_s26 + $0x1b] ss:$2 sm:$0xff] }
  0x18   : > { %4277 = vmatmul.mubr.msk.f32.gmra.mxu0 %vm218_vm2, %v3785_v6  ;;  %4286 = vmatmul.mubr.msk.f32.gmra.mxu1 %vm218_vm2, %v3788_v7  ;;  %v3783_v18 = vld [vmem:[%s4891_s26 + $0x40] ss:$2 sm:$0xff]  ;;  %v3828_v29 = vld [vmem:[%s4891_s26 + $0x2b] ss:$2 sm:$0xff]  ;;  %v3829_v31 = vld [vmem:[%s4891_s26 + $0x3b] ss:$2 sm:$0xff] }
  0x19   : > { %4279 = vmatprep.mubr.msk.f32.mxu0 %vm4818_vm1, %v4817_v1  ;;  %4290 = vmatprep.mubr.msk.f32.mxu1 %vm4818_vm1, %v4817_v1  ;;  %v3806_v20 = vld [vmem:[%s4891_s26 + $0x42] ss:$2 sm:$0xff]  ;;  %v3830_v32 = vld [vmem:[%s4891_s26 + $0x4b] ss:$2 sm:$0xff]  ;;  %s5650_s12 = smov (!%p186_p6, %s4799_s12), 3 }
  0x1a   : > { %v3814_v21 = vld [vmem:[%s4891_s26 + $0xa] ss:$2 sm:$0xff]  ;;  %v3815_v23 = vld [vmem:[%s4891_s26 + $0x1a] ss:$2 sm:$0xff]  ;;  %v3862_v45 = vld [vmem:[%s4891_s26 + $0x15] ss:$2 sm:$0xff] }
  0x1b   : > { %v3816_v26 = vld [vmem:[%s4891_s26 + $0x2a] ss:$2 sm:$0xff]  ;;  %v3817_v28 = vld [vmem:[%s4891_s26 + $0x3a] ss:$2 sm:$0xff]  ;;  %v3863_v47 = vld [vmem:[%s4891_s26 + $0x25] ss:$2 sm:$0xff] }
  0x1c   : > { %4280 = vmatmul.mubr.msk.f32.gmra.mxu0 %vm218_vm2, %v3786_v8  ;;  %4291 = vmatmul.mubr.msk.f32.vlgmr.msra.gmra.mxu1 %vm218_vm2, %v196_v9  ;;  %v3818_v30 = vld [vmem:[%s4891_s26 + $0x4a] ss:$2 sm:$0xff]  ;;  %v3864_v50 = vld [vmem:[%s4891_s26 + $0x35] ss:$2 sm:$0xff]  ;;  %v3865_v52 = vld [vmem:[%s4891_s26 + $0x45] ss:$2 sm:$0xff] }
  0x1d   : > { %4323 = vmatpush3.msk.msra.mxu1 %vm234_vm0, %v3819_v10  ;;  %4293 = vmatprep.mubr.msk.f32.mxu1 %vm4818_vm1, %v4817_v1  ;;  %v3838_v33 = vld [vmem:[%s4891_s26 + $0xc] ss:$2 sm:$0xff]  ;;  %v3839_v35 = vld [vmem:[%s4891_s26 + $0x1c] ss:$2 sm:$0xff]  ;;  %v3866_v54 = vld [vmem:[%s4891_s26 + $0x55] ss:$2 sm:$0xff] }
  0x1e   : > { %4307 = vmatprep.mubr.msk.f32.mxu0 %vm4818_vm1, %v4817_v1  ;;  %4356 = vmatprep.subr.mxu1 %v4817_v1  ;;  %v3850_v36 = vld [vmem:[%s4891_s26 + $0x14] ss:$2 sm:$0xff]  ;;  %v3851_v39 = vld [vmem:[%s4891_s26 + $0x24] ss:$2 sm:$0xff]  ;;  %v3900_v60 = vld [vmem:[%s4891_s26 + $0x69] ss:$2 sm:$0xff] }
  0x1f   : > { %v3840_v38 = vld [vmem:[%s4891_s26 + $0x2c] ss:$2 sm:$0xff]  ;;  %v3841_v40 = vld [vmem:[%s4891_s26 + $0x3c] ss:$2 sm:$0xff]  ;;  %v3901_v63 = vld [vmem:[%s4891_s26 + $0x79] ss:$2 sm:$0xff] }
  0x20   : > { %4294 = vmatmul.mubr.msk.f32.gmra.mxu1 %vm218_vm2, %v3780_v11  ;;  %4308 = vmatmul.mubr.msk.f32.vlgmr.msra.gmra.mxu0 %vm218_vm2, %v3802_v12  ;;  %v3852_v41 = vld [vmem:[%s4891_s26 + $0x34] ss:$2 sm:$0xff]  ;;  %v3853_v43 = vld [vmem:[%s4891_s26 + $0x44] ss:$2 sm:$0xff]  ;;  %v3902_v2 = vld [vmem:[%s4891_s26 + $0x89] ss:$2 sm:$0xff] }
  0x21   : > { %4340 = vmatpush3.msk.msra.mxu0 %vm234_vm0, %v3831_v13  ;;  %4296 = vmatprep.mubr.msk.f32.mxu1 %vm4818_vm1, %v4817_v1  ;;  %v3842_v42 = vld [vmem:[%s4891_s26 + $0x4c] ss:$2 sm:$0xff]  ;;  %v3903_v4 = vld [vmem:[%s4891_s26 + $0x99] ss:$2 sm:$0xff]  ;;  %v3904_v5 = vld [vmem:[%s4891_s26 + $0xa9] ss:$2 sm:$0xff] }
  0x22   : > { %4310 = vmatprep.mubr.msk.f32.mxu0 %vm4818_vm1, %v4817_v1  ;;  %4373 = vmatprep.subr.mxu0 %v4817_v1  ;;  %v3854_v44 = vld [vmem:[%s4891_s26 + $0x54] ss:$2 sm:$0xff]  ;;  %v3929_v61 = vld [vmem:[%s5634_s1 + $0x30] sm:$0xf]  ;;  %s4733_s21 = smul.u32 5, %s5650_s12 }
  0x23   : > { %v3874_v48 = vld [vmem:[%s4891_s26 + $0x16] ss:$2 sm:$0xff]  ;;  %v3875_v51 = vld [vmem:[%s4891_s26 + $0x26] ss:$2 sm:$0xff] }
  0x24   : > { %4297 = vmatmul.mubr.msk.f32.gmra.mxu1 %vm218_vm2, %v3781_v14  ;;  %4311 = vmatmul.mubr.msk.f32.gmra.mxu0 %vm218_vm2, %v3803_v15  ;;  %v3876_v53 = vld [vmem:[%s4891_s26 + $0x36] ss:$2 sm:$0xff]  ;;  %v3877_v55 = vld [vmem:[%s4891_s26 + $0x46] ss:$2 sm:$0xff] }
  0x25   : > { %4299 = vmatprep.mubr.msk.f32.mxu1 %vm4818_vm1, %v4817_v1  ;;  %4313 = vmatprep.mubr.msk.f32.mxu0 %vm4818_vm1, %v4817_v1  ;;  %v3878_v56 = vld [vmem:[%s4891_s26 + $0x56] ss:$2 sm:$0xff] }
  0x26   : > { %v3888_v57 = vld [vmem:[%s4891_s26 + $0x68] ss:$2 sm:$0xff]  ;;  %v3889_v59 = vld [vmem:[%s4891_s26 + $0x78] ss:$2 sm:$0xff] }
  0x27   : > { %v3890_v62 = vld [vmem:[%s4891_s26 + $0x88] ss:$2 sm:$0xff]  ;;  %v3891_v0 = vld [vmem:[%s4891_s26 + $0x98] ss:$2 sm:$0xff] }
  0x28   : > { %4300 = vmatmul.mubr.msk.f32.gmra.mxu1 %vm218_vm2, %v3782_v16  ;;  %4314 = vmatmul.mubr.msk.f32.gmra.mxu0 %vm218_vm2, %v3804_v17  ;;  %v3892_v3 = vld [vmem:[%s4891_s26 + $0xa8] ss:$2 sm:$0xff]  ;;  %v3953_v10 = vld [vmem:[%s5634_s1 + $0x38] sm:$0xf] }
  0x29   : > { %4302 = vmatprep.mubr.msk.f32.mxu1 %vm4818_vm1, %v4817_v1  ;;  %4316 = vmatprep.mubr.msk.f32.mxu0 %vm4818_vm1, %v4817_v1  ;;  %v3912_v6 = vld [vmem:[%s4891_s26 + $0x6a] ss:$2 sm:$0xff]  ;;  %v3913_v8 = vld [vmem:[%s4891_s26 + $0x7a] ss:$2 sm:$0xff] }
  0x2a   : > { %v3941_v7 = vld [vmem:[%s5634_s1 + $0x34] sm:$0xf]  ;;  %v3925_v12 = vld [vmem:[%s4891_s26 + $0x82] ss:$2 sm:$0xff] }
  0x2b   : > { %v3924_v9 = vld [vmem:[%s4891_s26 + $0x72] ss:$2 sm:$0xff]  ;;  %v3927_v16 = vld [vmem:[%s4891_s26 + $0xa2] ss:$2 sm:$0xff] }
  0x2c   : > { %4303 = vmatmul.mubr.msk.f32.gmra.mxu1 %vm218_vm2, %v3783_v18  ;;  %4317 = vmatmul.mubr.msk.f32.gmra.mxu0 %vm218_vm2, %v3805_v19  ;;  %v3914_v11 = vld [vmem:[%s4891_s26 + $0x8a] ss:$2 sm:$0xff]  ;;  %v3915_v13 = vld [vmem:[%s4891_s26 + $0x9a] ss:$2 sm:$0xff]  ;;  %v3936_v18 = vld [vmem:[%s4891_s26 + $0x73] ss:$2 sm:$0xff] }
  0x2d   : > { %4319 = vmatprep.mubr.msk.f32.mxu0 %vm4818_vm1, %v4817_v1  ;;  %4324 = vmatprep.mubr.msk.f32.mxu1 %vm4818_vm1, %v4817_v1  ;;  %v3926_v14 = vld [vmem:[%s4891_s26 + $0x92] ss:$2 sm:$0xff] }
  0x2e   : > { %v3916_v15 = vld [vmem:[%s4891_s26 + $0xaa] ss:$2 sm:$0xff]  ;;  %v3965_v19 = vld [vmem:[%s5634_s1 + $0x3c] sm:$0xf] }
  0x2f   : > { %v3928_v17 = vld [vmem:[%s4891_s26 + $0xb2] ss:$2 sm:$0xff] }
  0x30   : > { %4320 = vmatmul.mubr.msk.f32.gmra.mxu0 %vm218_vm2, %v3806_v20  ;;  %4325 = vmatmul.mubr.msk.f32.vlgmr.msra.gmra.mxu1 %vm218_vm2, %v3814_v21  ;;  %v3937_v20 = vld [vmem:[%s4891_s26 + $0x83] ss:$2 sm:$0xff]  ;;  %v3948_v21 = vld [vmem:[%s4891_s26 + $0x74] ss:$2 sm:$0xff] }
  0x31   : > { %4357 = vmatpush3.msk.msra.mxu1 %vm234_vm0, %v3843_v22  ;;  %4327 = vmatprep.mubr.msk.f32.mxu1 %vm4818_vm1, %v4817_v1  ;;  %v3977_v22 = vld [vmem:[%s5634_s1 + $0x40] sm:$0xf] }
  0x32   : > { %4341 = vmatprep.mubr.msk.f32.mxu0 %vm4818_vm1, %v4817_v1  ;;  %4390 = vmatprep.subr.mxu1 %v4817_v1 }
  0x34   : > { %4328 = vmatmul.mubr.msk.f32.gmra.mxu1 %vm218_vm2, %v3815_v23  ;;  %4342 = vmatmul.mubr.msk.f32.vlgmr.msra.gmra.mxu0 %vm218_vm2, %v3826_v24  ;;  %v3938_v23 = vld [vmem:[%s4891_s26 + $0x93] ss:$2 sm:$0xff]  ;;  %v3949_v24 = vld [vmem:[%s4891_s26 + $0x84] ss:$2 sm:$0xff] }
  0x35   : > { %4374 = vmatpush3.msk.msra.mxu0 %vm234_vm0, %v3855_v25  ;;  %4330 = vmatprep.mubr.msk.f32.mxu1 %vm4818_vm1, %v4817_v1  ;;  %v3939_v25 = vld [vmem:[%s4891_s26 + $0xa3] ss:$2 sm:$0xff] }
  0x36   : > { %4344 = vmatprep.mubr.msk.f32.mxu0 %vm4818_vm1, %v4817_v1  ;;  %4407 = vmatprep.subr.mxu0 %v4817_v1 }
  0x38   : > { %4331 = vmatmul.mubr.msk.f32.gmra.mxu1 %vm218_vm2, %v3816_v26  ;;  %4345 = vmatmul.mubr.msk.f32.gmra.mxu0 %vm218_vm2, %v3827_v27  ;;  %v3950_v26 = vld [vmem:[%s4891_s26 + $0x94] ss:$2 sm:$0xff]  ;;  %v3940_v27 = vld [vmem:[%s4891_s26 + $0xb3] ss:$2 sm:$0xff] }
  0x39   : > { %4333 = vmatprep.mubr.msk.f32.mxu1 %vm4818_vm1, %v4817_v1  ;;  %4347 = vmatprep.mubr.msk.f32.mxu0 %vm4818_vm1, %v4817_v1 }
  0x3c   : > { %4334 = vmatmul.mubr.msk.f32.gmra.mxu1 %vm218_vm2, %v3817_v28  ;;  %4348 = vmatmul.mubr.msk.f32.gmra.mxu0 %vm218_vm2, %v3828_v29  ;;  %v3951_v28 = vld [vmem:[%s4891_s26 + $0xa4] ss:$2 sm:$0xff]  ;;  %v3952_v29 = vld [vmem:[%s4891_s26 + $0xb4] ss:$2 sm:$0xff] }
  0x3d   : > { %4336 = vmatprep.mubr.msk.f32.mxu1 %vm4818_vm1, %v4817_v1  ;;  %4350 = vmatprep.mubr.msk.f32.mxu0 %vm4818_vm1, %v4817_v1 }
  0x40   : > { %4337 = vmatmul.mubr.msk.f32.gmra.mxu1 %vm218_vm2, %v3818_v30  ;;  %4351 = vmatmul.mubr.msk.f32.gmra.mxu0 %vm218_vm2, %v3829_v31  ;;  %v3960_v30 = vld [vmem:[%s4891_s26 + $0x7c] ss:$2 sm:$0xff] }
  0x41   : > { %4353 = vmatprep.mubr.msk.f32.mxu0 %vm4818_vm1, %v4817_v1  ;;  %4358 = vmatprep.mubr.msk.f32.mxu1 %vm4818_vm1, %v4817_v1  ;;  %v3989_v31 = vld [vmem:[%s5634_s1 + $0x44] sm:$0xf] }
  0x44   : > { %4354 = vmatmul.mubr.msk.f32.gmra.mxu0 %vm218_vm2, %v3830_v32  ;;  %4359 = vmatmul.mubr.msk.f32.vlgmr.msra.gmra.mxu1 %vm218_vm2, %v3838_v33  ;;  %v3961_v32 = vld [vmem:[%s4891_s26 + $0x8c] ss:$2 sm:$0xff]  ;;  %v3972_v33 = vld [vmem:[%s4891_s26 + $0x7d] ss:$2 sm:$0xff] }
  0x45   : > { %4391 = vmatpush3.msk.msra.mxu1 %vm234_vm0, %v3867_v34  ;;  %4361 = vmatprep.mubr.msk.f32.mxu1 %vm4818_vm1, %v4817_v1  ;;  %v4003_v34 = vld [vmem:[%s5634_s1 + $0x48] sm:$0xf] }
  0x46   : > { %4375 = vmatprep.mubr.msk.f32.mxu0 %vm4818_vm1, %v4817_v1  ;;  %4424 = vmatprep.subr.mxu1 %v4817_v1 }
  0x48   : > { %4362 = vmatmul.mubr.msk.f32.gmra.mxu1 %vm218_vm2, %v3839_v35  ;;  %4376 = vmatmul.mubr.msk.f32.vlgmr.msra.gmra.mxu0 %vm218_vm2, %v3850_v36  ;;  %v3962_v35 = vld [vmem:[%s4891_s26 + $0x9c] ss:$2 sm:$0xff]  ;;  %v3973_v36 = vld [vmem:[%s4891_s26 + $0x8d] ss:$2 sm:$0xff] }
  0x49   : > { %4408 = vmatpush3.msk.msra.mxu0 %vm234_vm0, %v3879_v37  ;;  %4364 = vmatprep.mubr.msk.f32.mxu1 %vm4818_vm1, %v4817_v1  ;;  %v3963_v37 = vld [vmem:[%s4891_s26 + $0xac] ss:$2 sm:$0xff] }
  0x4a   : > { %4378 = vmatprep.mubr.msk.f32.mxu0 %vm4818_vm1, %v4817_v1  ;;  %4441 = vmatprep.subr.mxu0 %v4817_v1 }
  0x4c   : > { %4365 = vmatmul.mubr.msk.f32.gmra.mxu1 %vm218_vm2, %v3840_v38  ;;  %4379 = vmatmul.mubr.msk.f32.gmra.mxu0 %vm218_vm2, %v3851_v39  ;;  %v3974_v38 = vld [vmem:[%s4891_s26 + $0x9d] ss:$2 sm:$0xff]  ;;  %v3964_v39 = vld [vmem:[%s4891_s26 + $0xbc] ss:$2 sm:$0xff] }
  0x4d   : > { %4367 = vmatprep.mubr.msk.f32.mxu1 %vm4818_vm1, %v4817_v1  ;;  %4381 = vmatprep.mubr.msk.f32.mxu0 %vm4818_vm1, %v4817_v1 }
  0x50   : > { %4368 = vmatmul.mubr.msk.f32.gmra.mxu1 %vm218_vm2, %v3841_v40  ;;  %4382 = vmatmul.mubr.msk.f32.gmra.mxu0 %vm218_vm2, %v3852_v41  ;;  %v3975_v40 = vld [vmem:[%s4891_s26 + $0xad] ss:$2 sm:$0xff]  ;;  %v3976_v41 = vld [vmem:[%s4891_s26 + $0xbd] ss:$2 sm:$0xff] }
  0x51   : > { %4370 = vmatprep.mubr.msk.f32.mxu1 %vm4818_vm1, %v4817_v1  ;;  %4384 = vmatprep.mubr.msk.f32.mxu0 %vm4818_vm1, %v4817_v1 }
  0x54   : > { %4371 = vmatmul.mubr.msk.f32.gmra.mxu1 %vm218_vm2, %v3842_v42  ;;  %4385 = vmatmul.mubr.msk.f32.gmra.mxu0 %vm218_vm2, %v3853_v43  ;;  %v3984_v42 = vld [vmem:[%s4891_s26 + $0x7e] ss:$2 sm:$0xff] }
  0x55   : > { %4387 = vmatprep.mubr.msk.f32.mxu0 %vm4818_vm1, %v4817_v1  ;;  %4392 = vmatprep.mubr.msk.f32.mxu1 %vm4818_vm1, %v4817_v1  ;;  %v4015_v43 = vld [vmem:[%s5634_s1 + $0x4c] sm:$0xf] }
  0x58   : > { %4388 = vmatmul.mubr.msk.f32.gmra.mxu0 %vm218_vm2, %v3854_v44  ;;  %4393 = vmatmul.mubr.msk.f32.vlgmr.msra.gmra.mxu1 %vm218_vm2, %v3862_v45  ;;  %v3985_v44 = vld [vmem:[%s4891_s26 + $0x8e] ss:$2 sm:$0xff] }
  0x59   : > { %4425 = vmatpush3.msk.msra.mxu1 %vm234_vm0, %v3893_v46  ;;  %4395 = vmatprep.mubr.msk.f32.mxu1 %vm4818_vm1, %v4817_v1  ;;  %v3998_v45 = vld [vmem:[%s4891_s26 + $0xd0] ss:$2 sm:$0xff] }
  0x5a   : > { %4409 = vmatprep.mubr.msk.f32.mxu0 %vm4818_vm1, %v4817_v1  ;;  %4458 = vmatprep.subr.mxu1 %v4817_v1  ;;  %v4027_v46 = vld [vmem:[%s5634_s1 + $0x50] sm:$0xf] }
  0x5c   : > { %4396 = vmatmul.mubr.msk.f32.gmra.mxu1 %vm218_vm2, %v3863_v47  ;;  %4410 = vmatmul.mubr.msk.f32.vlgmr.msra.gmra.mxu0 %vm218_vm2, %v3874_v48  ;;  %v3986_v47 = vld [vmem:[%s4891_s26 + $0x9e] ss:$2 sm:$0xff] }
  0x5d   : > { %4442 = vmatpush3.msk.msra.mxu0 %vm234_vm0, %v3905_v49  ;;  %4398 = vmatprep.mubr.msk.f32.mxu1 %vm4818_vm1, %v4817_v1  ;;  %v3999_v48 = vld [vmem:[%s4891_s26 + $0xe0] ss:$2 sm:$0xff] }
  0x5e   : > { %4412 = vmatprep.mubr.msk.f32.mxu0 %vm4818_vm1, %v4817_v1  ;;  %4475 = vmatprep.subr.mxu0 %v4817_v1  ;;  %v3987_v49 = vld [vmem:[%s4891_s26 + $0xae] ss:$2 sm:$0xff] }
  0x60   : > { %4399 = vmatmul.mubr.msk.f32.gmra.mxu1 %vm218_vm2, %v3864_v50  ;;  %4413 = vmatmul.mubr.msk.f32.gmra.mxu0 %vm218_vm2, %v3875_v51  ;;  %v4000_v50 = vld [vmem:[%s4891_s26 + $0xf0] ss:$2 sm:$0xff] }
  0x61   : > { %4401 = vmatprep.mubr.msk.f32.mxu1 %vm4818_vm1, %v4817_v1  ;;  %4415 = vmatprep.mubr.msk.f32.mxu0 %vm4818_vm1, %v4817_v1  ;;  %v3988_v51 = vld [vmem:[%s4891_s26 + $0xbe] ss:$2 sm:$0xff] }
  0x64   : > { %4402 = vmatmul.mubr.msk.f32.gmra.mxu1 %vm218_vm2, %v3865_v52  ;;  %4416 = vmatmul.mubr.msk.f32.gmra.mxu0 %vm218_vm2, %v3876_v53  ;;  %v4001_v52 = vld [vmem:[%s4891_s26 + $0x100] ss:$2 sm:$0xff]  ;;  %v4002_v53 = vld [vmem:[%s4891_s26 + $0x110] ss:$2 sm:$0xff] }
  0x65   : > { %4404 = vmatprep.mubr.msk.f32.mxu1 %vm4818_vm1, %v4817_v1  ;;  %4418 = vmatprep.mubr.msk.f32.mxu0 %vm4818_vm1, %v4817_v1 }
  0x68   : > { %4405 = vmatmul.mubr.msk.f32.gmra.mxu1 %vm218_vm2, %v3866_v54  ;;  %4419 = vmatmul.mubr.msk.f32.gmra.mxu0 %vm218_vm2, %v3877_v55  ;;  %v4010_v54 = vld [vmem:[%s4891_s26 + $0xd1] ss:$2 sm:$0xff] }
  0x69   : > { %4421 = vmatprep.mubr.msk.f32.mxu0 %vm4818_vm1, %v4817_v1  ;;  %4426 = vmatprep.mubr.msk.f32.mxu1 %vm4818_vm1, %v4817_v1  ;;  %v4039_v55 = vld [vmem:[%s5634_s1 + $0x54] sm:$0xf] }
  0x6c   : > { %4422 = vmatmul.mubr.msk.f32.gmra.mxu0 %vm218_vm2, %v3878_v56  ;;  %4427 = vmatmul.mubr.msk.f32.vlgmr.msra.gmra.mxu1 %vm218_vm2, %v3888_v57  ;;  %v4011_v56 = vld [vmem:[%s4891_s26 + $0xe1] ss:$2 sm:$0xff]  ;;  %v4022_v57 = vld [vmem:[%s4891_s26 + $0xd2] ss:$2 sm:$0xff] }
  0x6d   : > { %4459 = vmatpush3.msk.msra.mxu1 %vm234_vm0, %v3917_v58  ;;  %4429 = vmatprep.mubr.msk.f32.mxu1 %vm4818_vm1, %v4817_v1  ;;  %v4051_v58 = vld [vmem:[%s5634_s1 + $0x58] sm:$0xf] }
  0x6e   : > { %4443 = vmatprep.mubr.msk.f32.mxu0 %vm4818_vm1, %v4817_v1  ;;  %4492 = vmatprep.subr.mxu1 %v4817_v1 }
  0x70   : > { %4430 = vmatmul.mubr.msk.f32.gmra.mxu1 %vm218_vm2, %v3889_v59  ;;  %4444 = vmatmul.mubr.msk.f32.vlgmr.msra.gmra.mxu0 %vm218_vm2, %v3900_v60 }
  0x71   : > { %4476 = vmatpush3.msk.msra.mxu0 %vm234_vm0, %v3929_v61  ;;  %4432 = vmatprep.mubr.msk.f32.mxu1 %vm4818_vm1, %v4817_v1  ;;  %v4012_v61 = vld [vmem:[%s4891_s26 + $0xf1] ss:$2 sm:$0xff] }
  0x72   : > { %4446 = vmatprep.mubr.msk.f32.mxu0 %vm4818_vm1, %v4817_v1  ;;  %4509 = vmatprep.subr.mxu0 %v4817_v1 }
  0x74   : > { %4433 = vmatmul.mubr.msk.f32.gmra.mxu1 %vm218_vm2, %v3890_v62  ;;  %4447 = vmatmul.mubr.msk.f32.gmra.mxu0 %vm218_vm2, %v3901_v63  ;;  %v4023_v62 = vld [vmem:[%s4891_s26 + $0xe2] ss:$2 sm:$0xff] }
  0x75   : > { %4435 = vmatprep.mubr.msk.f32.mxu1 %vm4818_vm1, %v4817_v1  ;;  %4449 = vmatprep.mubr.msk.f32.mxu0 %vm4818_vm1, %v4817_v1 }
  0x78   : > { %4436 = vmatmul.mubr.msk.f32.gmra.mxu1 %vm218_vm2, %v3891_v0  ;;  %4450 = vmatmul.mubr.msk.f32.gmra.mxu0 %vm218_vm2, %v3902_v2 }
  0x79   : > { %4438 = vmatprep.mubr.msk.f32.mxu1 %vm4818_vm1, %v4817_v1  ;;  %4452 = vmatprep.mubr.msk.f32.mxu0 %vm4818_vm1, %v4817_v1 }
  0x7c   : > { %4439 = vmatmul.mubr.msk.f32.gmra.mxu1 %vm218_vm2, %v3892_v3  ;;  %4453 = vmatmul.mubr.msk.f32.gmra.mxu0 %vm218_vm2, %v3903_v4  ;;  %v4013_v4 = vld [vmem:[%s4891_s26 + $0x101] ss:$2 sm:$0xff] }
  0x7d   : > { %4455 = vmatprep.mubr.msk.f32.mxu0 %vm4818_vm1, %v4817_v1  ;;  %4460 = vmatprep.mubr.msk.f32.mxu1 %vm4818_vm1, %v4817_v1 }
  0x80   : > { %4456 = vmatmul.mubr.msk.f32.gmra.mxu0 %vm218_vm2, %v3904_v5  ;;  %4461 = vmatmul.mubr.msk.f32.vlgmr.msra.gmra.mxu1 %vm218_vm2, %v3912_v6  ;;  %v4024_v5 = vld [vmem:[%s4891_s26 + $0xf2] ss:$2 sm:$0xff] }
  0x81   : > { %4493 = vmatpush3.msk.msra.mxu1 %vm234_vm0, %v3941_v7  ;;  %4463 = vmatprep.mubr.msk.f32.mxu1 %vm4818_vm1, %v4817_v1 }
  0x82   : > { %4477 = vmatprep.mubr.msk.f32.mxu0 %vm4818_vm1, %v4817_v1  ;;  %4526 = vmatprep.subr.mxu1 %v4817_v1 }
  0x84   : > { %4464 = vmatmul.mubr.msk.f32.gmra.mxu1 %vm218_vm2, %v3913_v8  ;;  %4478 = vmatmul.mubr.msk.f32.vlgmr.msra.gmra.mxu0 %vm218_vm2, %v3924_v9 }
  0x85   : > { %4510 = vmatpush3.msk.msra.mxu0 %vm234_vm0, %v3953_v10  ;;  %4466 = vmatprep.mubr.msk.f32.mxu1 %vm4818_vm1, %v4817_v1 }
  0x86   : > { %4480 = vmatprep.mubr.msk.f32.mxu0 %vm4818_vm1, %v4817_v1  ;;  %4543 = vmatprep.subr.mxu0 %v4817_v1 }
  0x88   : > { %4467 = vmatmul.mubr.msk.f32.gmra.mxu1 %vm218_vm2, %v3914_v11  ;;  %4481 = vmatmul.mubr.msk.f32.gmra.mxu0 %vm218_vm2, %v3925_v12  ;;  %v4014_v11 = vld [vmem:[%s4891_s26 + $0x111] ss:$2 sm:$0xff]  ;;  %v4025_v12 = vld [vmem:[%s4891_s26 + $0x102] ss:$2 sm:$0xff] }
  0x89   : > { %4469 = vmatprep.mubr.msk.f32.mxu1 %vm4818_vm1, %v4817_v1  ;;  %4483 = vmatprep.mubr.msk.f32.mxu0 %vm4818_vm1, %v4817_v1 }
  0x8c   : > { %4470 = vmatmul.mubr.msk.f32.gmra.mxu1 %vm218_vm2, %v3915_v13  ;;  %4484 = vmatmul.mubr.msk.f32.gmra.mxu0 %vm218_vm2, %v3926_v14 }
  0x8d   : > { %4472 = vmatprep.mubr.msk.f32.mxu1 %vm4818_vm1, %v4817_v1  ;;  %4486 = vmatprep.mubr.msk.f32.mxu0 %vm4818_vm1, %v4817_v1 }
  0x90   : > { %4473 = vmatmul.mubr.msk.f32.gmra.mxu1 %vm218_vm2, %v3916_v15  ;;  %4487 = vmatmul.mubr.msk.f32.gmra.mxu0 %vm218_vm2, %v3927_v16 }
  0x91   : > { %4489 = vmatprep.mubr.msk.f32.mxu0 %vm4818_vm1, %v4817_v1  ;;  %4494 = vmatprep.mubr.msk.f32.mxu1 %vm4818_vm1, %v4817_v1 }
  0x94   : > { %4490 = vmatmul.mubr.msk.f32.gmra.mxu0 %vm218_vm2, %v3928_v17  ;;  %4495 = vmatmul.mubr.msk.f32.vlgmr.msra.gmra.mxu1 %vm218_vm2, %v3936_v18 }
  0x95   : > { %4527 = vmatpush3.msk.msra.mxu1 %vm234_vm0, %v3965_v19  ;;  %4497 = vmatprep.mubr.msk.f32.mxu1 %vm4818_vm1, %v4817_v1  ;;  %v4026_v19 = vld [vmem:[%s4891_s26 + $0x112] ss:$2 sm:$0xff] }
  0x96   : > { %4511 = vmatprep.mubr.msk.f32.mxu0 %vm4818_vm1, %v4817_v1  ;;  %4560 = vmatprep.subr.mxu1 %v4817_v1 }
  0x98   : > { %4498 = vmatmul.mubr.msk.f32.gmra.mxu1 %vm218_vm2, %v3937_v20  ;;  %4512 = vmatmul.mubr.msk.f32.vlgmr.msra.gmra.mxu0 %vm218_vm2, %v3948_v21  ;;  %v4034_v20 = vld [vmem:[%s4891_s26 + $0xda] ss:$2 sm:$0xff] }
  0x99   : > { %4544 = vmatpush3.msk.msra.mxu0 %vm234_vm0, %v3977_v22  ;;  %4500 = vmatprep.mubr.msk.f32.mxu1 %vm4818_vm1, %v4817_v1 }
  0x9a   : > { %4514 = vmatprep.mubr.msk.f32.mxu0 %vm4818_vm1, %v4817_v1  ;;  %4577 = vmatprep.subr.mxu0 %v4817_v1 }
  0x9c   : > { %4501 = vmatmul.mubr.msk.f32.gmra.mxu1 %vm218_vm2, %v3938_v23  ;;  %4515 = vmatmul.mubr.msk.f32.gmra.mxu0 %vm218_vm2, %v3949_v24  ;;  %v4063_v23 = vld [vmem:[%s5634_s1 + $0x5c] sm:$0xf] }
  0x9d   : > { %4503 = vmatprep.mubr.msk.f32.mxu1 %vm4818_vm1, %v4817_v1  ;;  %4517 = vmatprep.mubr.msk.f32.mxu0 %vm4818_vm1, %v4817_v1 }
  0xa0   : > { %4504 = vmatmul.mubr.msk.f32.gmra.mxu1 %vm218_vm2, %v3939_v25  ;;  %4518 = vmatmul.mubr.msk.f32.gmra.mxu0 %vm218_vm2, %v3950_v26 }
  0xa1   : > { %4506 = vmatprep.mubr.msk.f32.mxu1 %vm4818_vm1, %v4817_v1  ;;  %4520 = vmatprep.mubr.msk.f32.mxu0 %vm4818_vm1, %v4817_v1 }
  0xa4   : > { %4507 = vmatmul.mubr.msk.f32.gmra.mxu1 %vm218_vm2, %v3940_v27  ;;  %4521 = vmatmul.mubr.msk.f32.gmra.mxu0 %vm218_vm2, %v3951_v28  ;;  %v4035_v28 = vld [vmem:[%s4891_s26 + $0xea] ss:$2 sm:$0xff] }
  0xa5   : > { %4523 = vmatprep.mubr.msk.f32.mxu0 %vm4818_vm1, %v4817_v1  ;;  %4528 = vmatprep.mubr.msk.f32.mxu1 %vm4818_vm1, %v4817_v1 }
  0xa8   : > { %4524 = vmatmul.mubr.msk.f32.gmra.mxu0 %vm218_vm2, %v3952_v29  ;;  %4529 = vmatmul.mubr.msk.f32.vlgmr.msra.gmra.mxu1 %vm218_vm2, %v3960_v30  ;;  %v4046_v29 = vld [vmem:[%s4891_s26 + $0xdb] ss:$2 sm:$0xff] }
  0xa9   : > { %4561 = vmatpush3.msk.msra.mxu1 %vm234_vm0, %v3989_v31  ;;  %4531 = vmatprep.mubr.msk.f32.mxu1 %vm4818_vm1, %v4817_v1 }
  0xaa   : > { %4545 = vmatprep.mubr.msk.f32.mxu0 %vm4818_vm1, %v4817_v1  ;;  %4594 = vmatprep.subr.mxu1 %v4817_v1 }
  0xac   : > { %4532 = vmatmul.mubr.msk.f32.gmra.mxu1 %vm218_vm2, %v3961_v32  ;;  %4546 = vmatmul.mubr.msk.f32.vlgmr.msra.gmra.mxu0 %vm218_vm2, %v3972_v33  ;;  %v4075_v32 = vld [vmem:[%s5634_s1 + $0x60] sm:$0xf] }
  0xad   : > { %4578 = vmatpush3.msk.msra.mxu0 %vm234_vm0, %v4003_v34  ;;  %4534 = vmatprep.mubr.msk.f32.mxu1 %vm4818_vm1, %v4817_v1 }
  0xae   : > { %4548 = vmatprep.mubr.msk.f32.mxu0 %vm4818_vm1, %v4817_v1  ;;  %4611 = vmatprep.subr.mxu0 %v4817_v1 }
  0xb0   : > { %4535 = vmatmul.mubr.msk.f32.gmra.mxu1 %vm218_vm2, %v3962_v35  ;;  %4549 = vmatmul.mubr.msk.f32.gmra.mxu0 %vm218_vm2, %v3973_v36 }
  0xb1   : > { %4537 = vmatprep.mubr.msk.f32.mxu1 %vm4818_vm1, %v4817_v1  ;;  %4551 = vmatprep.mubr.msk.f32.mxu0 %vm4818_vm1, %v4817_v1 }
  0xb4   : > { %4538 = vmatmul.mubr.msk.f32.gmra.mxu1 %vm218_vm2, %v3963_v37  ;;  %4552 = vmatmul.mubr.msk.f32.gmra.mxu0 %vm218_vm2, %v3974_v38  ;;  %v4036_v37 = vld [vmem:[%s4891_s26 + $0xfa] ss:$2 sm:$0xff]  ;;  %v4047_v38 = vld [vmem:[%s4891_s26 + $0xeb] ss:$2 sm:$0xff] }
  0xb5   : > { %4540 = vmatprep.mubr.msk.f32.mxu1 %vm4818_vm1, %v4817_v1  ;;  %4554 = vmatprep.mubr.msk.f32.mxu0 %vm4818_vm1, %v4817_v1 }
  0xb8   : > { %4541 = vmatmul.mubr.msk.f32.gmra.mxu1 %vm218_vm2, %v3964_v39  ;;  %4555 = vmatmul.mubr.msk.f32.gmra.mxu0 %vm218_vm2, %v3975_v40 }
  0xb9   : > { %4557 = vmatprep.mubr.msk.f32.mxu0 %vm4818_vm1, %v4817_v1  ;;  %4562 = vmatprep.mubr.msk.f32.mxu1 %vm4818_vm1, %v4817_v1 }
  0xbc   : > { %4558 = vmatmul.mubr.msk.f32.gmra.mxu0 %vm218_vm2, %v3976_v41  ;;  %4563 = vmatmul.mubr.msk.f32.vlgmr.msra.gmra.mxu1 %vm218_vm2, %v3984_v42 }
  0xbd   : > { %4595 = vmatpush3.msk.msra.mxu1 %vm234_vm0, %v4015_v43  ;;  %4565 = vmatprep.mubr.msk.f32.mxu1 %vm4818_vm1, %v4817_v1 }
  0xbe   : > { %4579 = vmatprep.mubr.msk.f32.mxu0 %vm4818_vm1, %v4817_v1  ;;  %4628 = vmatprep.subr.mxu1 %v4817_v1 }
  0xc0   : > { %4566 = vmatmul.mubr.msk.f32.gmra.mxu1 %vm218_vm2, %v3985_v44  ;;  %4580 = vmatmul.mubr.msk.f32.vlgmr.msra.gmra.mxu0 %vm218_vm2, %v3998_v45  ;;  %v4037_v45 = vld [vmem:[%s4891_s26 + $0x10a] ss:$2 sm:$0xff] }
  0xc1   : > { %4612 = vmatpush3.msk.msra.mxu0 %vm234_vm0, %v4027_v46  ;;  %4568 = vmatprep.mubr.msk.f32.mxu1 %vm4818_vm1, %v4817_v1  ;;  %v4048_v46 = vld [vmem:[%s4891_s26 + $0xfb] ss:$2 sm:$0xff] }
  0xc2   : > { %4582 = vmatprep.mubr.msk.f32.mxu0 %vm4818_vm1, %v4817_v1  ;;  %4645 = vmatprep.subr.mxu0 %v4817_v1 }
  0xc4   : > { %4569 = vmatmul.mubr.msk.f32.gmra.mxu1 %vm218_vm2, %v3986_v47  ;;  %4583 = vmatmul.mubr.msk.f32.gmra.mxu0 %vm218_vm2, %v3999_v48 }
  0xc5   : > { %4571 = vmatprep.mubr.msk.f32.mxu1 %vm4818_vm1, %v4817_v1  ;;  %4585 = vmatprep.mubr.msk.f32.mxu0 %vm4818_vm1, %v4817_v1 }
  0xc8   : > { %4572 = vmatmul.mubr.msk.f32.gmra.mxu1 %vm218_vm2, %v3987_v49  ;;  %4586 = vmatmul.mubr.msk.f32.gmra.mxu0 %vm218_vm2, %v4000_v50 }
  0xc9   : > { %4574 = vmatprep.mubr.msk.f32.mxu1 %vm4818_vm1, %v4817_v1  ;;  %4588 = vmatprep.mubr.msk.f32.mxu0 %vm4818_vm1, %v4817_v1 }
  0xcc   : > { %4575 = vmatmul.mubr.msk.f32.gmra.mxu1 %vm218_vm2, %v3988_v51  ;;  %4589 = vmatmul.mubr.msk.f32.gmra.mxu0 %vm218_vm2, %v4001_v52 }
  0xcd   : > { %4591 = vmatprep.mubr.msk.f32.mxu0 %vm4818_vm1, %v4817_v1  ;;  %4596 = vmatprep.mubr.msk.f32.mxu1 %vm4818_vm1, %v4817_v1 }
  0xd0   : > { %4592 = vmatmul.mubr.msk.f32.gmra.mxu0 %vm218_vm2, %v4002_v53  ;;  %4597 = vmatmul.mubr.msk.f32.vlgmr.msra.gmra.mxu1 %vm218_vm2, %v4010_v54  ;;  %v4038_v53 = vld [vmem:[%s4891_s26 + $0x11a] ss:$2 sm:$0xff]  ;;  %v4049_v54 = vld [vmem:[%s4891_s26 + $0x10b] ss:$2 sm:$0xff] }
  0xd1   : > { %4629 = vmatpush3.msk.msra.mxu1 %vm234_vm0, %v4039_v55  ;;  %4599 = vmatprep.mubr.msk.f32.mxu1 %vm4818_vm1, %v4817_v1 }
  0xd2   : > { %4613 = vmatprep.mubr.msk.f32.mxu0 %vm4818_vm1, %v4817_v1  ;;  %4662 = vmatprep.subr.mxu1 %v4817_v1 }
  0xd4   : > { %v304_v59 = vpop.f32.mrf.mxu0  ;;  %v5387_v60 = vpop.f32.mrf.mxu1  ;;  %4600 = vmatmul.mubr.msk.f32.gmra.mxu1 %vm218_vm2, %v4011_v56  ;;  %4614 = vmatmul.mubr.msk.f32.vlgmr.msra.gmra.mxu0 %vm218_vm2, %v4022_v57 }
  0xd5   : > { %4646 = vmatpush3.msk.msra.mxu0 %vm234_vm0, %v4051_v58  ;;  %4602 = vmatprep.mubr.msk.f32.mxu1 %vm4818_vm1, %v4817_v1 }
  0xd6   : > { %v4275_v63 = vpop.f32.mrf.mxu0  ;;  %v4284_v0 = vpop.f32.mrf.mxu1  ;;  %4616 = vmatprep.mubr.msk.f32.mxu0 %vm4818_vm1, %v4817_v1  ;;  %4679 = vmatprep.subr.mxu0 %v4817_v1 }
  0xd8   : > { %v309_v2 = vpop.f32.mrf.mxu0  ;;  %v5399_v3 = vpop.f32.mrf.mxu1  ;;  %4603 = vmatmul.mubr.msk.f32.gmra.mxu1 %vm218_vm2, %v4012_v61  ;;  %4617 = vmatmul.mubr.msk.f32.gmra.mxu0 %vm218_vm2, %v4023_v62  ;;  %v4050_v61 = vld [vmem:[%s4891_s26 + $0x11b] ss:$2 sm:$0xff]  ;;  %v4058_v62 = vld [vmem:[%s4891_s26 + $0xdc] ss:$2 sm:$0xff] }
  0xd9   : > { %4605 = vmatprep.mubr.msk.f32.mxu1 %vm4818_vm1, %v4817_v1  ;;  %4619 = vmatprep.mubr.msk.f32.mxu0 %vm4818_vm1, %v4817_v1 }
  0xda   : > { %v4278_v6 = vpop.f32.mrf.mxu0  ;;  %v4287_v7 = vpop.f32.mrf.mxu1 }
  0xdb   : > { %v4059_v7 = vld [vmem:[%s4891_s26 + $0xec] ss:$2 sm:$0xff] }
  0xdc   : > { %v314_v8 = vpop.f32.mrf.mxu0  ;;  %v412_v9 = vpop.f32.mrf.mxu1  ;;  %4606 = vmatmul.mubr.msk.f32.gmra.mxu1 %vm218_vm2, %v4013_v4  ;;  %4620 = vmatmul.mubr.msk.f32.gmra.mxu0 %vm218_vm2, %v4024_v5 }
  0xdd   : > { %v413_v10 = vadd.f32 %v412_v9, %v304_v59  ;;  %4608 = vmatprep.mubr.msk.f32.mxu1 %vm4818_vm1, %v4817_v1  ;;  %4622 = vmatprep.mubr.msk.f32.mxu0 %vm4818_vm1, %v4817_v1 }
  0xde   : > { %v4281_v13 = vpop.f32.mrf.mxu0  ;;  %v4292_v14 = vpop.f32.mrf.mxu1 }
  0xe0   : > { %v417_v15 = vpop.f32.mrf.mxu1  ;;  %v532_v16 = vpop.f32.mrf.mxu0  ;;  %4609 = vmatmul.mubr.msk.f32.gmra.mxu1 %vm218_vm2, %v4014_v11  ;;  %4623 = vmatmul.mubr.msk.f32.gmra.mxu0 %vm218_vm2, %v4025_v12  ;;  %v4099_v11 = vld [vmem:[%s5634_s1 + $0x68] sm:$0xf] }
  0xe1   : > { %v418_v17 = vadd.f32 %v417_v15, %v309_v2  ;;  %v556_v18 = vadd.f32 %v532_v16, %v413_v10  ;;  %4625 = vmatprep.mubr.msk.f32.mxu0 %vm4818_vm1, %v4817_v1  ;;  %4630 = vmatprep.mubr.msk.f32.mxu1 %vm4818_vm1, %v4817_v1  ;;  %v4087_v2 = vld [vmem:[%s5634_s1 + $0x64] sm:$0xf] }
  0xe2   : > { %v4295_v21 = vpop.f32.mrf.mxu1  ;;  %v4309_v22 = vpop.f32.mrf.mxu0  ;;  %v4060_v16 = vld [vmem:[%s4891_s26 + $0xfc] ss:$2 sm:$0xff] }
  0xe4   : > { %v422_v24 = vpop.f32.mrf.mxu1  ;;  %v537_v25 = vpop.f32.mrf.mxu0  ;;  %4626 = vmatmul.mubr.msk.f32.gmra.mxu0 %vm218_vm2, %v4026_v19  ;;  %4631 = vmatmul.mubr.msk.f32.vlgmr.msra.gmra.mxu1 %vm218_vm2, %v4034_v20 }
  0xe5   : > { %v423_v26 = vadd.f32 %v422_v24, %v314_v8  ;;  %v557_v27 = vadd.f32 %v537_v25, %v418_v17  ;;  %4663 = vmatpush3.msk.msra.mxu1 %vm234_vm0, %v4063_v23  ;;  %4633 = vmatprep.mubr.msk.f32.mxu1 %vm4818_vm1, %v4817_v1  ;;  %v4070_v8 = vld [vmem:[%s4891_s26 + $0xe4] ss:$2 sm:$0xff]  ;;  %v4071_v17 = vld [vmem:[%s4891_s26 + $0xf4] ss:$2 sm:$0xff] }
  0xe6   : > { %v4298_v30 = vpop.f32.mrf.mxu1  ;;  %v4312_v31 = vpop.f32.mrf.mxu0  ;;  %4647 = vmatprep.mubr.msk.f32.mxu0 %vm4818_vm1, %v4817_v1  ;;  %4696 = vmatprep.subr.mxu1 %v4817_v1  ;;  %v4061_v24 = vld [vmem:[%s4891_s26 + $0x10c] ss:$2 sm:$0xff] }
  0xe7   : > { %v4072_v25 = vld [vmem:[%s4891_s26 + $0x104] ss:$2 sm:$0xff] }
  0xe8   : > { %v427_v33 = vpop.f32.mrf.mxu1  ;;  %v542_v34 = vpop.f32.mrf.mxu0  ;;  %4634 = vmatmul.mubr.msk.f32.gmra.mxu1 %vm218_vm2, %v4035_v28  ;;  %4648 = vmatmul.mubr.msk.f32.vlgmr.msra.gmra.mxu0 %vm218_vm2, %v4046_v29 }
  0xe9   : > { %v428_v35 = vadd.f32 %v427_v33, %v5387_v60  ;;  %v558_v36 = vadd.f32 %v542_v34, %v423_v26  ;;  %4680 = vmatpush3.msk.msra.mxu0 %vm234_vm0, %v4075_v32  ;;  %4636 = vmatprep.mubr.msk.f32.mxu1 %vm4818_vm1, %v4817_v1  ;;  %v4062_v32 = vld [vmem:[%s4891_s26 + $0x11c] ss:$2 sm:$0xff] }
  0xea   : > { %v4301_v39 = vpop.f32.mrf.mxu1  ;;  %v4315_v40 = vpop.f32.mrf.mxu0  ;;  %4650 = vmatprep.mubr.msk.f32.mxu0 %vm4818_vm1, %v4817_v1  ;;  %4713 = vmatprep.subr.mxu0 %v4817_v1  ;;  %v4073_v33 = vld [vmem:[%s4891_s26 + $0x114] ss:$2 sm:$0xff] }
  0xeb   : > { %v4074_v40 = vld [vmem:[%s4891_s26 + $0x124] ss:$2 sm:$0xff] }
  0xec   : > { %v432_v41 = vpop.f32.mrf.mxu1  ;;  %v547_v42 = vpop.f32.mrf.mxu0  ;;  %4637 = vmatmul.mubr.msk.f32.gmra.mxu1 %vm218_vm2, %v4036_v37  ;;  %4651 = vmatmul.mubr.msk.f32.gmra.mxu0 %vm218_vm2, %v4047_v38 }
  0xed   : > { %v433_v43 = vadd.f32 %v432_v41, %v5399_v3  ;;  %v559_v44 = vadd.f32 %v547_v42, %v428_v35  ;;  %4639 = vmatprep.mubr.msk.f32.mxu1 %vm4818_vm1, %v4817_v1  ;;  %4653 = vmatprep.mubr.msk.f32.mxu0 %vm4818_vm1, %v4817_v1  ;;  %v4082_v41 = vld [vmem:[%s4891_s26 + $0xe5] ss:$2 sm:$0xff] }
  0xee   : > { %v4304_v47 = vpop.f32.mrf.mxu1  ;;  %v4318_v48 = vpop.f32.mrf.mxu0 }
  0xef   : > { %v4083_v48 = vld [vmem:[%s4891_s26 + $0xf5] ss:$2 sm:$0xff] }
  0xf0   : > { %v552_v49 = vpop.f32.mrf.mxu0  ;;  %v657_v50 = vpop.f32.mrf.mxu1  ;;  %4640 = vmatmul.mubr.msk.f32.gmra.mxu1 %vm218_vm2, %v4037_v45  ;;  %4654 = vmatmul.mubr.msk.f32.gmra.mxu0 %vm218_vm2, %v4048_v46 }
  0xf1   : > { %v560_v51 = vadd.f32 %v552_v49, %v433_v43  ;;  %v681_v52 = vadd.f32 %v657_v50, %v556_v18  ;;  %4642 = vmatprep.mubr.msk.f32.mxu1 %vm4818_vm1, %v4817_v1  ;;  %4656 = vmatprep.mubr.msk.f32.mxu0 %vm4818_vm1, %v4817_v1  ;;  %v4094_v49 = vld [vmem:[%s4891_s26 + $0xe6] ss:$2 sm:$0xff] }
  0xf2   : > { %v4321_v55 = vpop.f32.mrf.mxu0  ;;  %v4326_v56 = vpop.f32.mrf.mxu1 }
  0xf3   : > { %v4084_v56 = vld [vmem:[%s4891_s26 + $0x105] ss:$2 sm:$0xff] }
  0xf4   : > { %v662_v57 = vpop.f32.mrf.mxu1  ;;  %v782_v58 = vpop.f32.mrf.mxu0  ;;  %4643 = vmatmul.mubr.msk.f32.gmra.mxu1 %vm218_vm2, %v4038_v53  ;;  %4657 = vmatmul.mubr.msk.f32.gmra.mxu0 %vm218_vm2, %v4049_v54 }
  0xf5   : > { %v682_v59 = vadd.f32 %v662_v57, %v557_v27  ;;  %v806_v60 = vadd.f32 %v782_v58, %v681_v52  ;;  %4659 = vmatprep.mubr.msk.f32.mxu0 %vm4818_vm1, %v4817_v1  ;;  %4664 = vmatprep.mubr.msk.f32.mxu1 %vm4818_vm1, %v4817_v1  ;;  %v4095_v57 = vld [vmem:[%s4891_s26 + $0xf6] ss:$2 sm:$0xff] }
  0xf6   : > { %v4329_v63 = vpop.f32.mrf.mxu1  ;;  %v4343_v0 = vpop.f32.mrf.mxu0 }
  0xf7   : > { %v4085_v0 = vld [vmem:[%s4891_s26 + $0x115] ss:$2 sm:$0xff] }
  0xf8   : > { %v667_v3 = vpop.f32.mrf.mxu1  ;;  %v787_v4 = vpop.f32.mrf.mxu0  ;;  %4660 = vmatmul.mubr.msk.f32.gmra.mxu0 %vm218_vm2, %v4050_v61  ;;  %4665 = vmatmul.mubr.msk.f32.vlgmr.msra.gmra.mxu1 %vm218_vm2, %v4058_v62 }
  0xf9   : > { %v683_v5 = vadd.f32 %v667_v3, %v558_v36  ;;  %v807_v6 = vadd.f32 %v787_v4, %v682_v59  ;;  %4697 = vmatpush3.msk.msra.mxu1 %vm234_vm0, %v4087_v2  ;;  %4667 = vmatprep.mubr.msk.f32.mxu1 %vm4818_vm1, %v4817_v1  ;;  %v4096_v2 = vld [vmem:[%s4891_s26 + $0x106] ss:$2 sm:$0xff] }
  0xfa   : > { %v4332_v9 = vpop.f32.mrf.mxu1  ;;  %v4346_v10 = vpop.f32.mrf.mxu0  ;;  %4681 = vmatprep.mubr.msk.f32.mxu0 %vm4818_vm1, %v4817_v1 }
  0xfb   : > { %v4086_v9 = vld [vmem:[%s4891_s26 + $0x125] ss:$2 sm:$0xff]  ;;  %v4097_v10 = vld [vmem:[%s4891_s26 + $0x116] ss:$2 sm:$0xff] }
  0xfc   : > { %v672_v12 = vpop.f32.mrf.mxu1  ;;  %v792_v13 = vpop.f32.mrf.mxu0  ;;  %4668 = vmatmul.mubr.msk.f32.gmra.mxu1 %vm218_vm2, %v4059_v7  ;;  %4682 = vmatmul.mubr.msk.f32.vlgmr.msra.gmra.mxu0 %vm218_vm2, %v4070_v8 }
  0xfd   : > { %v684_v14 = vadd.f32 %v672_v12, %v559_v44  ;;  %v808_v15 = vadd.f32 %v792_v13, %v683_v5  ;;  %4714 = vmatpush3.msk.msra.mxu0 %vm234_vm0, %v4099_v11  ;;  %4670 = vmatprep.mubr.msk.f32.mxu1 %vm4818_vm1, %v4817_v1 }
  0xfe   : > { %v4335_v18 = vpop.f32.mrf.mxu1  ;;  %v4349_v19 = vpop.f32.mrf.mxu0  ;;  %4684 = vmatprep.mubr.msk.f32.mxu0 %vm4818_vm1, %v4817_v1 }
 0x100   : > { %v677_v20 = vpop.f32.mrf.mxu1  ;;  %v797_v21 = vpop.f32.mrf.mxu0  ;;  %4671 = vmatmul.mubr.msk.f32.gmra.mxu1 %vm218_vm2, %v4060_v16  ;;  %4685 = vmatmul.mubr.msk.f32.gmra.mxu0 %vm218_vm2, %v4071_v17  ;;  %v4098_v17 = vld [vmem:[%s4891_s26 + $0x126] ss:$2 sm:$0xff]  ;;  %s4734_s26 = smul.u32 20, %s5648_s13 }
 0x101   : > { %v685_v22 = vadd.f32 %v677_v20, %v560_v51  ;;  %v809_v23 = vadd.f32 %v797_v21, %v684_v14  ;;  %4673 = vmatprep.mubr.msk.f32.mxu1 %vm4818_vm1, %v4817_v1  ;;  %4687 = vmatprep.mubr.msk.f32.mxu0 %vm4818_vm1, %v4817_v1 }
 0x102   : > { %v4338_v26 = vpop.f32.mrf.mxu1  ;;  %v4352_v27 = vpop.f32.mrf.mxu0  ;;  %s190_s22 = sadd.s32 %s4734_s26, %s4733_s21 }
 0x103   : > { %s3777_s23 = sshll.u32 %s190_s22, 3 }
 0x104   : > { %v802_v28 = vpop.f32.mrf.mxu0  ;;  %v907_v29 = vpop.f32.mrf.mxu1  ;;  %4674 = vmatmul.mubr.msk.f32.gmra.mxu1 %vm218_vm2, %v4061_v24  ;;  %4688 = vmatmul.mubr.msk.f32.gmra.mxu0 %vm218_vm2, %v4072_v25  ;;  %s5608_s27 = scalar_lea.vmem %s5636_s3, %s3777_s23 }
 0x105   : > { %v810_v30 = vadd.f32 %v802_v28, %v685_v22  ;;  %v931_v31 = vadd.f32 %v907_v29, %v806_v60  ;;  %4676 = vmatprep.mubr.msk.f32.mxu1 %vm4818_vm1, %v4817_v1  ;;  %4690 = vmatprep.mubr.msk.f32.mxu0 %vm4818_vm1, %v4817_v1 }
 0x106   : > { %v4355_v34 = vpop.f32.mrf.mxu0  ;;  %v4360_v35 = vpop.f32.mrf.mxu1 }
 0x108   : > { %v912_v36 = vpop.f32.mrf.mxu1  ;;  %v1032_v37 = vpop.f32.mrf.mxu0  ;;  %4677 = vmatmul.mubr.msk.f32.gmra.mxu1 %vm218_vm2, %v4062_v32  ;;  %4691 = vmatmul.mubr.msk.f32.gmra.mxu0 %vm218_vm2, %v4073_v33 }
 0x109   : > { %v932_v38 = vadd.f32 %v912_v36, %v807_v6  ;;  %v1056_v39 = vadd.f32 %v1032_v37, %v931_v31  ;;  %4693 = vmatprep.mubr.msk.f32.mxu0 %vm4818_vm1, %v4817_v1  ;;  %4698 = vmatprep.mubr.msk.f32.mxu1 %vm4818_vm1, %v4817_v1 }
 0x10a   : > { %v4363_v42 = vpop.f32.mrf.mxu1  ;;  %v4377_v43 = vpop.f32.mrf.mxu0 }
 0x10c   : > { %v917_v44 = vpop.f32.mrf.mxu1  ;;  %v1037_v45 = vpop.f32.mrf.mxu0  ;;  %4694 = vmatmul.mubr.msk.f32.gmra.mxu0 %vm218_vm2, %v4074_v40  ;;  %4699 = vmatmul.mubr.msk.f32.vlgmr.msra.gmra.mxu1 %vm218_vm2, %v4082_v41 }
 0x10d   : > { %v933_v46 = vadd.f32 %v917_v44, %v808_v15  ;;  %v1057_v47 = vadd.f32 %v1037_v45, %v932_v38  ;;  %4701 = vmatprep.mubr.msk.f32.mxu1 %vm4818_vm1, %v4817_v1  ;;  %4715 = vmatprep.mubr.msk.f32.mxu0 %vm4818_vm1, %v4817_v1 }
 0x10e   : > { %v4366_v50 = vpop.f32.mrf.mxu1  ;;  %v4380_v51 = vpop.f32.mrf.mxu0 }
 0x110   : > { %v922_v52 = vpop.f32.mrf.mxu1  ;;  %v1042_v53 = vpop.f32.mrf.mxu0  ;;  %4702 = vmatmul.mubr.msk.f32.gmra.mxu1 %vm218_vm2, %v4083_v48  ;;  %4716 = vmatmul.mubr.msk.f32.vlgmr.msra.gmra.mxu0 %vm218_vm2, %v4094_v49 }
 0x111   : > { %v934_v54 = vadd.f32 %v922_v52, %v809_v23  ;;  %v1058_v55 = vadd.f32 %v1042_v53, %v933_v46  ;;  %4704 = vmatprep.mubr.msk.f32.mxu1 %vm4818_vm1, %v4817_v1  ;;  %4718 = vmatprep.mubr.msk.f32.mxu0 %vm4818_vm1, %v4817_v1 }
 0x112   : > { %v4369_v58 = vpop.f32.mrf.mxu1  ;;  %v4383_v59 = vpop.f32.mrf.mxu0 }
 0x114   : > { %v927_v60 = vpop.f32.mrf.mxu1  ;;  %v1047_v61 = vpop.f32.mrf.mxu0  ;;  %4705 = vmatmul.mubr.msk.f32.gmra.mxu1 %vm218_vm2, %v4084_v56  ;;  %4719 = vmatmul.mubr.msk.f32.gmra.mxu0 %vm218_vm2, %v4095_v57 }
 0x115   : > { %v935_v62 = vadd.f32 %v927_v60, %v810_v30  ;;  %v1059_v63 = vadd.f32 %v1047_v61, %v934_v54  ;;  %4707 = vmatprep.mubr.msk.f32.mxu1 %vm4818_vm1, %v4817_v1  ;;  %4721 = vmatprep.mubr.msk.f32.mxu0 %vm4818_vm1, %v4817_v1 }
 0x116   : > { %v4372_v3 = vpop.f32.mrf.mxu1  ;;  %v4386_v4 = vpop.f32.mrf.mxu0 }
 0x118   : > { %v1052_v5 = vpop.f32.mrf.mxu0  ;;  %v1157_v6 = vpop.f32.mrf.mxu1  ;;  %4708 = vmatmul.mubr.msk.f32.gmra.mxu1 %vm218_vm2, %v4085_v0  ;;  %4722 = vmatmul.mubr.msk.f32.gmra.mxu0 %vm218_vm2, %v4096_v2 }
 0x119   : > { %v1060_v7 = vadd.f32 %v1052_v5, %v935_v62  ;;  %v1181_v8 = vadd.f32 %v1157_v6, %v1056_v39  ;;  %4710 = vmatprep.mubr.msk.f32.mxu1 %vm4818_vm1, %v4817_v1  ;;  %4724 = vmatprep.mubr.msk.f32.mxu0 %vm4818_vm1, %v4817_v1 }
 0x11a   : > { %v4389_v11 = vpop.f32.mrf.mxu0  ;;  %v4394_v12 = vpop.f32.mrf.mxu1 }
 0x11c   : > { %v1162_v13 = vpop.f32.mrf.mxu1  ;;  %v1282_v14 = vpop.f32.mrf.mxu0  ;;  %4711 = vmatmul.mubr.msk.f32.gmra.mxu1 %vm218_vm2, %v4086_v9  ;;  %4725 = vmatmul.mubr.msk.f32.gmra.mxu0 %vm218_vm2, %v4097_v10 }
 0x11d   : > { %v1182_v15 = vadd.f32 %v1162_v13, %v1057_v47  ;;  %v1306_v16 = vadd.f32 %v1282_v14, %v1181_v8  ;;  %4727 = vmatprep.mubr.msk.f32.mxu0 %vm4818_vm1, %v4817_v1 }
 0x11e   : > { %v4397_v18 = vpop.f32.mrf.mxu1  ;;  %v4411_v19 = vpop.f32.mrf.mxu0 }
 0x120   : > { %v1167_v20 = vpop.f32.mrf.mxu1  ;;  %v1287_v21 = vpop.f32.mrf.mxu0  ;;  %4728 = vmatmul.mubr.msk.f32.gmra.mxu0 %vm218_vm2, %v4098_v17 }
 0x121   : > { %v1183_v22 = vadd.f32 %v1167_v20, %v1058_v55  ;;  %v1307_v23 = vadd.f32 %v1287_v21, %v1182_v15 }
 0x122   : > { %v4400_v24 = vpop.f32.mrf.mxu1  ;;  %v4414_v25 = vpop.f32.mrf.mxu0 }
 0x124   : > { %v1172_v26 = vpop.f32.mrf.mxu1  ;;  %v1292_v27 = vpop.f32.mrf.mxu0 }
 0x125   : > { %v1184_v28 = vadd.f32 %v1172_v26, %v1059_v63  ;;  %v1308_v29 = vadd.f32 %v1292_v27, %v1183_v22 }
 0x126   : > { %v4403_v30 = vpop.f32.mrf.mxu1  ;;  %v4417_v31 = vpop.f32.mrf.mxu0 }
 0x128   : > { %v1177_v32 = vpop.f32.mrf.mxu1  ;;  %v1297_v33 = vpop.f32.mrf.mxu0 }
 0x129   : > { %v1185_v1 = vadd.f32 %v1177_v32, %v1060_v7  ;;  %v1309_v34 = vadd.f32 %v1297_v33, %v1184_v28 }
 0x12a   : > { %v4406_v35 = vpop.f32.mrf.mxu1  ;;  %v4420_v36 = vpop.f32.mrf.mxu0 }
 0x12c   : > { %v1302_v37 = vpop.f32.mrf.mxu0  ;;  %v1409_v38 = vpop.f32.mrf.mxu1 }
 0x12d   : > { %v1310_v39 = vadd.f32 %v1302_v37, %v1185_v1  ;;  %v1433_v40 = vadd.f32 %v1409_v38, %v1306_v16 }
 0x12e   : > { %v4423_v41 = vpop.f32.mrf.mxu0  ;;  %v4428_v42 = vpop.f32.mrf.mxu1 }
 0x130   : > { %v1414_v43 = vpop.f32.mrf.mxu1  ;;  %v1534_v44 = vpop.f32.mrf.mxu0 }
 0x131   : > { %v1434_v45 = vadd.f32 %v1414_v43, %v1307_v23  ;;  %v1558_v46 = vadd.f32 %v1534_v44, %v1433_v40 }
 0x132   : > { %v4431_v47 = vpop.f32.mrf.mxu1  ;;  %v4445_v48 = vpop.f32.mrf.mxu0 }
 0x134   : > { %v1419_v49 = vpop.f32.mrf.mxu1  ;;  %v1539_v50 = vpop.f32.mrf.mxu0 }
 0x135   : > { %v1435_v51 = vadd.f32 %v1419_v49, %v1308_v29  ;;  %v1559_v52 = vadd.f32 %v1539_v50, %v1434_v45 }
 0x136   : > { %v4434_v53 = vpop.f32.mrf.mxu1  ;;  %v4448_v54 = vpop.f32.mrf.mxu0 }
 0x138   : > { %v1424_v55 = vpop.f32.mrf.mxu1  ;;  %v1544_v56 = vpop.f32.mrf.mxu0 }
 0x139   : > { %v1436_v57 = vadd.f32 %v1424_v55, %v1309_v34  ;;  %v1560_v58 = vadd.f32 %v1544_v56, %v1435_v51 }
 0x13a   : > { %v4437_v59 = vpop.f32.mrf.mxu1  ;;  %v4451_v60 = vpop.f32.mrf.mxu0 }
 0x13c   : > { %v1429_v61 = vpop.f32.mrf.mxu1  ;;  %v1549_v62 = vpop.f32.mrf.mxu0 }
 0x13d   : > { %v1437_v63 = vadd.f32 %v1429_v61, %v1310_v39  ;;  %v1561_v0 = vadd.f32 %v1549_v62, %v1436_v57 }
 0x13e   : > { %v4440_v2 = vpop.f32.mrf.mxu1  ;;  %v4454_v3 = vpop.f32.mrf.mxu0 }
 0x140   : > { %v1554_v4 = vpop.f32.mrf.mxu0  ;;  %v1659_v5 = vpop.f32.mrf.mxu1 }
 0x141   : > { %v1562_v6 = vadd.f32 %v1554_v4, %v1437_v63  ;;  %v1683_v7 = vadd.f32 %v1659_v5, %v1558_v46 }
 0x142   : > { %v4457_v8 = vpop.f32.mrf.mxu0  ;;  %v4462_v9 = vpop.f32.mrf.mxu1 }
 0x144   : > { %v1664_v10 = vpop.f32.mrf.mxu1  ;;  %v1784_v11 = vpop.f32.mrf.mxu0 }
 0x145   : > { %v1684_v12 = vadd.f32 %v1664_v10, %v1559_v52  ;;  %v1808_v13 = vadd.f32 %v1784_v11, %v1683_v7 }
 0x146   : > { %v4465_v14 = vpop.f32.mrf.mxu1  ;;  %v4479_v15 = vpop.f32.mrf.mxu0 }
 0x148   : > { %v1669_v16 = vpop.f32.mrf.mxu1  ;;  %v1789_v17 = vpop.f32.mrf.mxu0 }
 0x149   : > { %v1685_v18 = vadd.f32 %v1669_v16, %v1560_v58  ;;  %v1809_v19 = vadd.f32 %v1789_v17, %v1684_v12 }
 0x14a   : > { %v4468_v20 = vpop.f32.mrf.mxu1  ;;  %v4482_v21 = vpop.f32.mrf.mxu0 }
 0x14c   : > { %v1674_v22 = vpop.f32.mrf.mxu1  ;;  %v1794_v23 = vpop.f32.mrf.mxu0 }
 0x14d   : > { %v1686_v24 = vadd.f32 %v1674_v22, %v1561_v0  ;;  %v1810_v25 = vadd.f32 %v1794_v23, %v1685_v18 }
 0x14e   : > { %v4471_v26 = vpop.f32.mrf.mxu1  ;;  %v4485_v27 = vpop.f32.mrf.mxu0 }
 0x150   : > { %v1679_v28 = vpop.f32.mrf.mxu1  ;;  %v1799_v29 = vpop.f32.mrf.mxu0 }
 0x151   : > { %v1687_v30 = vadd.f32 %v1679_v28, %v1562_v6  ;;  %v1811_v31 = vadd.f32 %v1799_v29, %v1686_v24 }
 0x152   : > { %v4474_v32 = vpop.f32.mrf.mxu1  ;;  %v4488_v33 = vpop.f32.mrf.mxu0 }
 0x154   : > { %v1804_v1 = vpop.f32.mrf.mxu0  ;;  %v1909_v34 = vpop.f32.mrf.mxu1 }
 0x155   : > { %v1812_v35 = vadd.f32 %v1804_v1, %v1687_v30  ;;  %v1933_v36 = vadd.f32 %v1909_v34, %v1808_v13 }
 0x156   : > { %v4491_v37 = vpop.f32.mrf.mxu0  ;;  %v4496_v38 = vpop.f32.mrf.mxu1 }
 0x158   : > { %v1914_v39 = vpop.f32.mrf.mxu1  ;;  %v2034_v40 = vpop.f32.mrf.mxu0 }
 0x159   : > { %v1934_v41 = vadd.f32 %v1914_v39, %v1809_v19  ;;  %v2058_v42 = vadd.f32 %v2034_v40, %v1933_v36 }
 0x15a   : > { %v4499_v43 = vpop.f32.mrf.mxu1  ;;  %v4513_v44 = vpop.f32.mrf.mxu0 }
 0x15c   : > { %v1919_v45 = vpop.f32.mrf.mxu1  ;;  %v2039_v46 = vpop.f32.mrf.mxu0 }
 0x15d   : > { %v1935_v47 = vadd.f32 %v1919_v45, %v1810_v25  ;;  %v2059_v48 = vadd.f32 %v2039_v46, %v1934_v41 }
 0x15e   : > { %v4502_v49 = vpop.f32.mrf.mxu1  ;;  %v4516_v50 = vpop.f32.mrf.mxu0 }
 0x160   : > { %v1924_v51 = vpop.f32.mrf.mxu1  ;;  %v2044_v52 = vpop.f32.mrf.mxu0 }
 0x161   : > { %v1936_v53 = vadd.f32 %v1924_v51, %v1811_v31  ;;  %v2060_v54 = vadd.f32 %v2044_v52, %v1935_v47 }
 0x162   : > { %v4505_v55 = vpop.f32.mrf.mxu1  ;;  %v4519_v56 = vpop.f32.mrf.mxu0 }
 0x164   : > { %v1929_v57 = vpop.f32.mrf.mxu1  ;;  %v2049_v58 = vpop.f32.mrf.mxu0 }
 0x165   : > { %v1937_v59 = vadd.f32 %v1929_v57, %v1812_v35  ;;  %v2061_v60 = vadd.f32 %v2049_v58, %v1936_v53 }
 0x166   : > { %v4508_v61 = vpop.f32.mrf.mxu1  ;;  %v4522_v62 = vpop.f32.mrf.mxu0 }
 0x168   : > { %v2054_v63 = vpop.f32.mrf.mxu0  ;;  %v2159_v0 = vpop.f32.mrf.mxu1 }
 0x169   : > { %v2062_v2 = vadd.f32 %v2054_v63, %v1937_v59  ;;  %v2183_v3 = vadd.f32 %v2159_v0, %v2058_v42 }
 0x16a   : > { %v4525_v4 = vpop.f32.mrf.mxu0  ;;  %v4530_v5 = vpop.f32.mrf.mxu1 }
 0x16c   : > { %v2164_v6 = vpop.f32.mrf.mxu1  ;;  %v2284_v7 = vpop.f32.mrf.mxu0 }
 0x16d   : > { %v2184_v8 = vadd.f32 %v2164_v6, %v2059_v48  ;;  %v2308_v9 = vadd.f32 %v2284_v7, %v2183_v3 }
 0x16e   : > { %v4533_v10 = vpop.f32.mrf.mxu1  ;;  %v4547_v11 = vpop.f32.mrf.mxu0 }
 0x170   : > { %v2169_v12 = vpop.f32.mrf.mxu1  ;;  %v2289_v13 = vpop.f32.mrf.mxu0 }
 0x171   : > { %v2185_v14 = vadd.f32 %v2169_v12, %v2060_v54  ;;  %v2309_v15 = vadd.f32 %v2289_v13, %v2184_v8 }
 0x172   : > { %v4536_v16 = vpop.f32.mrf.mxu1  ;;  %v4550_v17 = vpop.f32.mrf.mxu0 }
 0x174   : > { %v2174_v18 = vpop.f32.mrf.mxu1  ;;  %v2294_v19 = vpop.f32.mrf.mxu0 }
 0x175   : > { %v2186_v20 = vadd.f32 %v2174_v18, %v2061_v60  ;;  %v2310_v21 = vadd.f32 %v2294_v19, %v2185_v14 }
 0x176   : > { %v4539_v22 = vpop.f32.mrf.mxu1  ;;  %v4553_v23 = vpop.f32.mrf.mxu0 }
 0x178   : > { %v2179_v24 = vpop.f32.mrf.mxu1  ;;  %v2299_v25 = vpop.f32.mrf.mxu0 }
 0x179   : > { %v2187_v26 = vadd.f32 %v2179_v24, %v2062_v2  ;;  %v2311_v27 = vadd.f32 %v2299_v25, %v2186_v20 }
 0x17a   : > { %v4542_v28 = vpop.f32.mrf.mxu1  ;;  %v4556_v29 = vpop.f32.mrf.mxu0 }
 0x17c   : > { %v2304_v30 = vpop.f32.mrf.mxu0  ;;  %v2409_v31 = vpop.f32.mrf.mxu1 }
 0x17d   : > { %v2312_v32 = vadd.f32 %v2304_v30, %v2187_v26  ;;  %v2433_v33 = vadd.f32 %v2409_v31, %v2308_v9 }
 0x17e   : > { %v4559_v1 = vpop.f32.mrf.mxu0  ;;  %v4564_v34 = vpop.f32.mrf.mxu1 }
 0x180   : > { %v2414_v35 = vpop.f32.mrf.mxu1  ;;  %v2536_v36 = vpop.f32.mrf.mxu0 }
 0x181   : > { %v2434_v37 = vadd.f32 %v2414_v35, %v2309_v15  ;;  %v5563_v38 = vadd.f32 %v2536_v36, %v2433_v33 }
 0x182   : > { %v4567_v39 = vpop.f32.mrf.mxu1  ;;  %v4581_v40 = vpop.f32.mrf.mxu0 }
 0x184   : > { %v2419_v41 = vpop.f32.mrf.mxu1  ;;  %v2541_v42 = vpop.f32.mrf.mxu0 }
 0x185   : > { %v2435_v43 = vadd.f32 %v2419_v41, %v2310_v21  ;;  %v5565_v44 = vadd.f32 %v2541_v42, %v2434_v37 }
 0x186   : > { %v4570_v45 = vpop.f32.mrf.mxu1  ;;  %v4584_v46 = vpop.f32.mrf.mxu0 }
 0x188   : > { %v2424_v47 = vpop.f32.mrf.mxu1  ;;  %v2546_v48 = vpop.f32.mrf.mxu0 }
 0x189   : > { %v2436_v49 = vadd.f32 %v2424_v47, %v2311_v27  ;;  %v5567_v50 = vadd.f32 %v2546_v48, %v2435_v43 }
 0x18a   : > { %v4573_v51 = vpop.f32.mrf.mxu1  ;;  %v4587_v52 = vpop.f32.mrf.mxu0 }
 0x18c   : > { %v2429_v53 = vpop.f32.mrf.mxu1  ;;  %v2551_v54 = vpop.f32.mrf.mxu0 }
 0x18d   : > { %v2437_v55 = vadd.f32 %v2429_v53, %v2312_v32  ;;  %v5569_v56 = vadd.f32 %v2551_v54, %v2436_v49 }
 0x18e   : > { %v4576_v57 = vpop.f32.mrf.mxu1  ;;  %v4590_v58 = vpop.f32.mrf.mxu0 }
 0x190   : > { %v2556_v59 = vpop.f32.mrf.mxu0  ;;  %v2661_v60 = vpop.f32.mrf.mxu1 }
 0x191   : > { %v5571_v61 = vadd.f32 %v2556_v59, %v2437_v55  ;;  %v2685_v51 = vadd.f32 %v2661_v60, %v5563_v38 }
 0x192   : > { %v4593_v62 = vpop.f32.mrf.mxu0  ;;  %v4598_v63 = vpop.f32.mrf.mxu1 }
 0x194   : > { %v2666_v0 = vpop.f32.mrf.mxu1  ;;  %v2786_v2 = vpop.f32.mrf.mxu0 }
 0x195   : > { %v2810_v54 = vadd.f32 %v2786_v2, %v2685_v51  ;;  %v2686_v58 = vadd.f32 %v2666_v0, %v5565_v44 }
 0x196   : > { %v4601_v3 = vpop.f32.mrf.mxu1  ;;  %v4615_v4 = vpop.f32.mrf.mxu0 }
 0x198   : > { %v2671_v5 = vpop.f32.mrf.mxu1  ;;  %v2791_v6 = vpop.f32.mrf.mxu0 }
 0x199   : > { %v2811_v3 = vadd.f32 %v2791_v6, %v2686_v58 }
 0x19a   : > { %v4604_v7 = vpop.f32.mrf.mxu1  ;;  %v4618_v8 = vpop.f32.mrf.mxu0 }
 0x19c   : > { %v5573_v9 = vpop.f32.mrf.mxu1  ;;  %v2796_v10 = vpop.f32.mrf.mxu0 }
 0x19d   : > { %v2688_v0 = vadd.f32 %v5573_v9, %v5569_v56 }
 0x19e   : > { %v4607_v11 = vpop.f32.mrf.mxu1  ;;  %v4621_v12 = vpop.f32.mrf.mxu0 }
 0x19f   : > { %v2687_v11 = vadd.f32 %v2671_v5, %v5567_v50  ;;  %v4106_v50 = vld [vmem:[%s5635_s2] ss:$0 sm:$0xff] }
 0x1a0   : > { %v5575_v13 = vpop.f32.mrf.mxu1  ;;  %v5577_v14 = vpop.f32.mrf.mxu0 }
 0x1a1   : > { %v2813_v5 = vadd.f32 %v5577_v14, %v2688_v0 }
 0x1a2   : > { %v4610_v15 = vpop.f32.mrf.mxu1  ;;  %v4624_v16 = vpop.f32.mrf.mxu0 }
 0x1a3   : > { %v2812_v15 = vadd.f32 %v2796_v10, %v2687_v11 }
 0x1a4   : > { %v5579_v17 = vpop.f32.mrf.mxu0  ;;  %v2911_v18 = vpop.f32.mrf.mxu1 }
 0x1a5   : > { %v2935_v59 = vadd.f32 %v2911_v18, %v2810_v54 }
 0x1a6   : > { %v4627_v19 = vpop.f32.mrf.mxu0  ;;  %v4632_v20 = vpop.f32.mrf.mxu1 }
 0x1a8   : > { %v2916_v21 = vpop.f32.mrf.mxu1  ;;  %v3036_v22 = vpop.f32.mrf.mxu0 }
 0x1a9   : > { %v3060_v4 = vadd.f32 %v3036_v22, %v2935_v59  ;;  %v2936_v38 = vadd.f32 %v2916_v21, %v2811_v3 }
 0x1aa   : > { %v4635_v23 = vpop.f32.mrf.mxu1  ;;  %v4649_v24 = vpop.f32.mrf.mxu0 }
 0x1ac   : > { %v2921_v25 = vpop.f32.mrf.mxu1  ;;  %v3041_v26 = vpop.f32.mrf.mxu0 }
 0x1ad   : > { %v3061_v16 = vadd.f32 %v3041_v26, %v2936_v38  ;;  %v2937_v6 = vadd.f32 %v2921_v25, %v2812_v15 }
 0x1ae   : > { %v4638_v27 = vpop.f32.mrf.mxu1  ;;  %v4652_v28 = vpop.f32.mrf.mxu0 }
 0x1af   : > { %v2689_v27 = vadd.f32 %v5575_v13, %v5571_v61 }
 0x1b0   : > { %v5581_v29 = vpop.f32.mrf.mxu1  ;;  %v3046_v30 = vpop.f32.mrf.mxu0 }
 0x1b1   : > { %v3062_v10 = vadd.f32 %v3046_v30, %v2937_v6  ;;  %v2938_v9 = vadd.f32 %v5581_v29, %v2813_v5 }
 0x1b2   : > { %v4641_v31 = vpop.f32.mrf.mxu1  ;;  %v4655_v32 = vpop.f32.mrf.mxu0 }
 0x1b4   : > { %v5583_v33 = vpop.f32.mrf.mxu1  ;;  %v5585_v1 = vpop.f32.mrf.mxu0 }
 0x1b6   : > { %v4644_v34 = vpop.f32.mrf.mxu1  ;;  %v4658_v35 = vpop.f32.mrf.mxu0 }
 0x1b7   : > { %v2814_v34 = vadd.f32 %v5579_v17, %v2689_v27  ;;  %v3063_v35 = vadd.f32 %v5585_v1, %v2938_v9 }
 0x1b8   : > { %v5587_v36 = vpop.f32.mrf.mxu0  ;;  %v3161_v37 = vpop.f32.mrf.mxu1 }
 0x1b9   : > { %v3185_v60 = vadd.f32 %v3161_v37, %v3060_v4 }
 0x1ba   : > { %v4661_v39 = vpop.f32.mrf.mxu0  ;;  %v4666_v40 = vpop.f32.mrf.mxu1 }
 0x1bb   : > { %v2939_v40 = vadd.f32 %v5583_v33, %v2814_v34 }
 0x1bc   : > { %v3166_v41 = vpop.f32.mrf.mxu1  ;;  %v3286_v42 = vpop.f32.mrf.mxu0 }
 0x1bd   : > { %v3310_v19 = vadd.f32 %v3286_v42, %v3185_v60  ;;  %v3186_v18 = vadd.f32 %v3166_v41, %v3061_v16 }
 0x1be   : > { %v4669_v43 = vpop.f32.mrf.mxu1  ;;  %v4683_v45 = vpop.f32.mrf.mxu0 }
 0x1c0   : > { %v3171_v46 = vpop.f32.mrf.mxu1  ;;  %v3291_v47 = vpop.f32.mrf.mxu0 }
 0x1c1   : > { %v3311_v21 = vadd.f32 %v3291_v47, %v3186_v18  ;;  %v3187_v25 = vadd.f32 %v3171_v46, %v3062_v10  ;;  %v3064_v46 = vadd.f32 %v5587_v36, %v2939_v40 }
 0x1c2   : > { %v4672_v48 = vpop.f32.mrf.mxu1  ;;  %v4686_v49 = vpop.f32.mrf.mxu0 }
 0x1c4   : > { %v3176_v52 = vpop.f32.mrf.mxu1  ;;  %v3296_v53 = vpop.f32.mrf.mxu0 }
 0x1c5   : > { %v3312_v61 = vadd.f32 %v3296_v53, %v3187_v25  ;;  %v3188_v41 = vadd.f32 %v3176_v52, %v3063_v35 }
 0x1c6   : > { %v4675_v55 = vpop.f32.mrf.mxu1  ;;  %v4689_v57 = vpop.f32.mrf.mxu0 }
 0x1c8   : > { %v3181_v62 = vpop.f32.mrf.mxu1  ;;  %v3301_v63 = vpop.f32.mrf.mxu0 }
 0x1c9   : > { %v3313_v47 = vadd.f32 %v3301_v63, %v3188_v41  ;;  %v3189_v53 = vadd.f32 %v3181_v62, %v3064_v46 }
 0x1ca   : > { %v4678_v7 = vpop.f32.mrf.mxu1  ;;  %v4692_v8 = vpop.f32.mrf.mxu0 }
 0x1cc   : > { %v3306_v12 = vpop.f32.mrf.mxu0  ;;  %v3411_v2 = vpop.f32.mrf.mxu1 }
 0x1cd   : > { %v3435_v22 = vadd.f32 %v3411_v2, %v3310_v19  ;;  %v3314_v57 = vadd.f32 %v3306_v12, %v3189_v53 }
 0x1ce   : > { %v4695_v20 = vpop.f32.mrf.mxu0  ;;  %v4700_v44 = vpop.f32.mrf.mxu1 }
 0x1d0   : > { %v3416_v23 = vpop.f32.mrf.mxu1  ;;  %v3536_v24 = vpop.f32.mrf.mxu0 }
 0x1d1   : > { %v3560_v26 = vadd.f32 %v3536_v24, %v3435_v22  ;;  %v3436_v31 = vadd.f32 %v3416_v23, %v3311_v21 }
 0x1d2   : > { %v4703_v28 = vpop.f32.mrf.mxu1  ;;  %v4717_v56 = vpop.f32.mrf.mxu0 }
 0x1d3   : > { %v3572_v32 = vadd.f32 %v4106_v50, %v3560_v26 }
 0x1d4   : > { %v3421_v14 = vpop.f32.mrf.mxu1  ;;  %v3541_v30 = vpop.f32.mrf.mxu0 }
 0x1d5   : > { %v3577_v13 = vmax.f32 %v3572_v32, 0.0  ;;  %v3561_v37 = vadd.f32 %v3541_v30, %v3436_v31  ;;  %v3437_v17 = vadd.f32 %v3421_v14, %v3312_v61 }
 0x1d6   : > { %v4706_v39 = vpop.f32.mrf.mxu1  ;;  %v4720_v29 = vpop.f32.mrf.mxu0 }
 0x1d7   : > { %3582 = vst [vmem:[%s5608_s27] sm:$0xff] %v3577_v13  ;;  %v3573_v42 = vadd.f32 %v4106_v50, %v3561_v37 }
 0x1d8   : > { %v3426_v43 = vpop.f32.mrf.mxu1  ;;  %v3546_v45 = vpop.f32.mrf.mxu0 }
 0x1d9   : > { %v3578_v48 = vmax.f32 %v3573_v42, 0.0  ;;  %v3562_v1 = vadd.f32 %v3546_v45, %v3437_v17  ;;  %v3438_v54 = vadd.f32 %v3426_v43, %v3313_v47 }
 0x1da   : > { %v4709_v49 = vpop.f32.mrf.mxu1  ;;  %v4723_v51 = vpop.f32.mrf.mxu0 }
 0x1db   : > { %3583 = vst [vmem:[%s5608_s27 + $0x8] sm:$0xff] %v3578_v48  ;;  %v3574_v55 = vadd.f32 %v4106_v50, %v3562_v1 }
 0x1dc   : > { %v3431_v33 = vpop.f32.mrf.mxu1  ;;  %v3551_v52 = vpop.f32.mrf.mxu0 }
 0x1dd   : > { %v3579_v58 = vmax.f32 %v3574_v55, 0.0  ;;  %v3563_v59 = vadd.f32 %v3551_v52, %v3438_v54  ;;  %v3439_v36 = vadd.f32 %v3431_v33, %v3314_v57 }
 0x1de   : > { %v4712_v3 = vpop.f32.mrf.mxu1  ;;  %v4726_v4 = vpop.f32.mrf.mxu0 }
 0x1df   : > { %3584 = vst [vmem:[%s5608_s27 + $0x10] sm:$0xff] %v3579_v58  ;;  %v3575_v63 = vadd.f32 %v4106_v50, %v3563_v59 }
 0x1e0   : > { %v3556_v7 = vpop.f32.mrf.mxu0 }
 0x1e1   : > { %v3580_v8 = vmax.f32 %v3575_v63, 0.0  ;;  %v3564_v11 = vadd.f32 %v3556_v7, %v3439_v36 }
 0x1e2   : > { %v4729_v38 = vpop.f32.mrf.mxu0 }
 0x1e3   : > { %3585 = vst [vmem:[%s5608_s27 + $0x18] sm:$0xff] %v3580_v8  ;;  %v3576_v62 = vadd.f32 %v4106_v50, %v3564_v11 }
 0x1e5   : > { %v3581_v60 = vmax.f32 %v3576_v62, 0.0 }
 0x1e7   : > { %3586 = vst [vmem:[%s5608_s27 + $0x20] sm:$0xff] %v3581_v60 }
 0x1e8 PF: > { %s13_s16 = sadd.s32 1, %s4815_s16   ;;  %s5637_s12 = smov %s4807_s14 }
 0x1e9   : > { %p10_p7 = scmp.ge.s32.totalorder %s13_s16, 10   ;;  %s5638_s13 = smov %s4811_s15 }
 0x1ea   : > { %s5639_s14 = smov %s5642_s17  ;;  %s5640_s15 = smov %s5646_s18 }
 0x1eb   :  { %12 = sbr.rel (!%p10_p7) target bundleno = 3 (0x3), region = 223 }

// kernel: a_call__.5
= control target key start
LH: loop header
LB: loop body
LE: loop exit
PB: predicated region body
PF: predicated region fallthrough
CT: control target
= control target key end

     0   :  { %s5418_s15 = smov 0   ;;  %s5420_s16 = smov 0   ;;  %s7585_s0 = inlined_call_operand.vmem [shape: f32[2,6,40,128], index: 0, kind: input, shape index: {}]   ;;  %s7586_s1 = inlined_call_operand.vmem [shape: f32[27,128,128], index: 1, kind: input, shape index: {}]   ;;  %s7587_s2 = inlined_call_operand.vmem [shape: f32[1,128], index: 2, kind: input, shape index: {}]   ;;  %s7588_s3 = inlined_call_operand.vmem [shape: f32[2,4,24,128], index: 3, kind: input, shape index: {}]   ;;  %s7589_s4 = inlined_call_operand.vmem [shape: f32[2,4,24,128], index: 4, kind: output, shape index: {}]  }
   0x1   :  { %s5422_s17 = smov 0   ;;  %s5424_s18 = smov 0  }
   0x2   :  { %s5426_s19 = smov 0  }
   0x3 LB: > { %s23_s20 = sadd.s32 1, %s5381_s17  ;;  %s26_s21 = sadd.s32 1, %s5385_s18  ;;  %s5389_s19 = sphi %s5426_s19, %s14_s19   ;;  %s5385_s18 = sphi %s5424_s18, %s7593_s18   ;;  %s5381_s17 = sphi %s5422_s17, %s7592_s17   ;;  %s5377_s16 = sphi %s5420_s16, %s7591_s16   ;;  %s5373_s15 = sphi %s5418_s15, %s7590_s15  }
   0x4   : > { %p24_p0 = scmp.ge.s32.totalorder %s23_s20, 4  ;;  %p3177_p1 = scmp.ge.s32.totalorder %s5389_s19, 1 }
   0x5   : > { %p192_p2 = scmp.lt.s32.totalorder %s5389_s19, 9 }
   0x6   : > { %s7595_s20 = smov (%p24_p0, %s23_s20), 0  ;;  %s7597_s21 = smov (!%p24_p0, %s26_s21), %s5385_s18 }
   0x7   : > { %p193_p3 = pnand %p3177_p1, %p192_p2  ;;  %p28_p4 = scmp.ge.s32.totalorder %s7597_s21, 2 }
   0x8   : > { %p231_p5 = scmp.lt.s32.totalorder (!%p193_p3), %s5377_s16, 1  ;;  %s254_s11 = smul.u32 (!%p193_p3), 40, %s5373_s15 }
   0x9   : > { %s7599_s21 = smov (%p28_p4, %s7597_s21), 0  ;;  %196 = sbr.rel (%p193_p3) target bundleno = 748 (0x2ec), region = 36 }
   0xa   : > { %p238_p6 = scmp.lt.s32.totalorder (!%p193_p3), %s5373_s15, 3 }
   0xe   : > { %v3196_v0 = vld [vmem:[%s7586_s1 + $0xf8] sm:$0xff]  ;;  %v5391_v2 = vmov 0.0   ;;  %v3195_v3 = vld [vmem:[%s7586_s1 + $0xf0] sm:$0xff]  ;;  %v3194_v5 = vld [vmem:[%s7586_s1 + $0xe8] sm:$0xff]  ;;  %s7601_s16 = smov (!%p231_p5, %s5377_s16), 1  ;;  %vm5392_vm0 = vmmov 0  }
   0xf   : > { %v274_v1 = vld [vmem:[%s7586_s1 + $0x78] sm:$0xff]  ;;  %4167 = vmatprep.subr.mxu0 %v5391_v2  ;;  %4208 = vmatprep.subr.mxu1 %v5391_v2  ;;  %v273_v4 = vld [vmem:[%s7586_s1 + $0x70] sm:$0xff]  ;;  %v272_v6 = vld [vmem:[%s7586_s1 + $0x68] sm:$0xff]  ;;  %s5306_s6 = smul.u32 240, %s7601_s16  ;;  %s7603_s15 = smov (!%p238_p6, %s5373_s15), 3 }
  0x10   : > { %4168 = vmatpush3.msra.mxu0 %v3196_v0  ;;  %4209 = vmatpush3.msra.mxu1 %v274_v1  ;;  %v3193_v7 = vld [vmem:[%s7586_s1 + $0xe0] sm:$0xff]  ;;  %v3192_v9 = vld [vmem:[%s7586_s1 + $0xd8] sm:$0xff]  ;;  %v3191_v11 = vld [vmem:[%s7586_s1 + $0xd0] sm:$0xff]  ;;  %s5307_s24 = smul.u32 3, %s7603_s15 }
  0x11   : > { %4169 = vmatprep.subr.mxu0 %v5391_v2  ;;  %4210 = vmatprep.subr.mxu1 %v5391_v2  ;;  %v271_v8 = vld [vmem:[%s7586_s1 + $0x60] sm:$0xff]  ;;  %v270_v10 = vld [vmem:[%s7586_s1 + $0x58] sm:$0xff]  ;;  %v269_v12 = vld [vmem:[%s7586_s1 + $0x50] sm:$0xff]  ;;  %s235_s25 = scalar_lea.vmem %s7585_s0, %s5306_s6 }
  0x12   : > { %4170 = vmatpush3.msra.mxu0 %v3195_v3  ;;  %4211 = vmatpush3.msra.mxu1 %v273_v4  ;;  %v3190_v13 = vld [vmem:[%s7586_s1 + $0xc8] sm:$0xff]  ;;  %v3189_v15 = vld [vmem:[%s7586_s1 + $0xc0] sm:$0xff]  ;;  %v3188_v17 = vld [vmem:[%s7586_s1 + $0xb8] sm:$0xff]  ;;  %s5579_s30 = scalar_lea.vmem %s235_s25, %s254_s11 }
  0x13   : > { %4171 = vmatprep.subr.mxu0 %v5391_v2  ;;  %4212 = vmatprep.subr.mxu1 %v5391_v2  ;;  %v268_v14 = vld [vmem:[%s7586_s1 + $0x48] sm:$0xff]  ;;  %v267_v16 = vld [vmem:[%s7586_s1 + $0x40] sm:$0xff]  ;;  %v266_v18 = vld [vmem:[%s7586_s1 + $0x38] sm:$0xff] }
  0x14   : > { %4172 = vmatpush3.msra.mxu0 %v3194_v5  ;;  %4213 = vmatpush3.msra.mxu1 %v272_v6  ;;  %v3187_v19 = vld [vmem:[%s7586_s1 + $0xb0] sm:$0xff]  ;;  %v3186_v21 = vld [vmem:[%s7586_s1 + $0xa8] sm:$0xff]  ;;  %v3185_v23 = vld [vmem:[%s7586_s1 + $0xa0] sm:$0xff] }
  0x15   : > { %4173 = vmatprep.subr.mxu0 %v5391_v2  ;;  %4214 = vmatprep.subr.mxu1 %v5391_v2  ;;  %v265_v20 = vld [vmem:[%s7586_s1 + $0x30] sm:$0xff]  ;;  %v264_v22 = vld [vmem:[%s7586_s1 + $0x28] sm:$0xff]  ;;  %v263_v24 = vld [vmem:[%s7586_s1 + $0x20] sm:$0xff] }
  0x16   : > { %4174 = vmatpush3.msra.mxu0 %v3193_v7  ;;  %4215 = vmatpush3.msra.mxu1 %v271_v8  ;;  %v3184_v25 = vld [vmem:[%s7586_s1 + $0x98] sm:$0xff]  ;;  %v3183_v27 = vld [vmem:[%s7586_s1 + $0x90] sm:$0xff]  ;;  %v3182_v29 = vld [vmem:[%s7586_s1 + $0x88] sm:$0xff] }
  0x17   : > { %4175 = vmatprep.subr.mxu0 %v5391_v2  ;;  %4216 = vmatprep.subr.mxu1 %v5391_v2  ;;  %v262_v26 = vld [vmem:[%s7586_s1 + $0x18] sm:$0xff]  ;;  %v261_v28 = vld [vmem:[%s7586_s1 + $0x10] sm:$0xff]  ;;  %v260_v30 = vld [vmem:[%s7586_s1 + $0x8] sm:$0xff] }
  0x18   : > { %4176 = vmatpush3.msra.mxu0 %v3192_v9  ;;  %4217 = vmatpush3.msra.mxu1 %v270_v10  ;;  %v3181_v31 = vld [vmem:[%s7586_s1 + $0x80] sm:$0xff]  ;;  %v3212_v35 = vld [vmem:[%s7586_s1 + $0x178] sm:$0xff]  ;;  %v3211_v37 = vld [vmem:[%s7586_s1 + $0x170] sm:$0xff] }
  0x19   : > { %4177 = vmatprep.subr.mxu0 %v5391_v2  ;;  %4218 = vmatprep.subr.mxu1 %v5391_v2  ;;  %v259_v32 = vld [vmem:[%s7586_s1] sm:$0xff]  ;;  %v3228_v36 = vld [vmem:[%s7586_s1 + $0x1f8] sm:$0xff]  ;;  %v3227_v38 = vld [vmem:[%s7586_s1 + $0x1f0] sm:$0xff] }
  0x1a   : > { %4178 = vmatpush3.msra.mxu0 %v3191_v11  ;;  %4219 = vmatpush3.msra.mxu1 %v269_v12  ;;  %v256_v33 = vld [vmem:[%s5579_s30] sm:$0xff]  ;;  %v3210_v39 = vld [vmem:[%s7586_s1 + $0x168] sm:$0xff]  ;;  %v3208_v43 = vld [vmem:[%s7586_s1 + $0x158] sm:$0xff] }
  0x1b   : > { %4179 = vmatprep.subr.mxu0 %v5391_v2  ;;  %4220 = vmatprep.subr.mxu1 %v5391_v2  ;;  %v275_v34 = vld [vmem:[%s5579_s30 + $0x1] sm:$0xff]  ;;  %v3224_v44 = vld [vmem:[%s7586_s1 + $0x1d8] sm:$0xff]  ;;  %v3207_v45 = vld [vmem:[%s7586_s1 + $0x150] sm:$0xff] }
  0x1c   : > { %4180 = vmatpush3.msra.mxu0 %v3190_v13  ;;  %4221 = vmatpush3.msra.mxu1 %v268_v14  ;;  %v3226_v40 = vld [vmem:[%s7586_s1 + $0x1e8] sm:$0xff]  ;;  %v3209_v41 = vld [vmem:[%s7586_s1 + $0x160] sm:$0xff]  ;;  %v3223_v46 = vld [vmem:[%s7586_s1 + $0x1d0] sm:$0xff] }
  0x1d   : > { %4181 = vmatprep.subr.mxu0 %v5391_v2  ;;  %4222 = vmatprep.subr.mxu1 %v5391_v2  ;;  %v3225_v42 = vld [vmem:[%s7586_s1 + $0x1e0] sm:$0xff]  ;;  %v3206_v47 = vld [vmem:[%s7586_s1 + $0x148] sm:$0xff]  ;;  %v3204_v51 = vld [vmem:[%s7586_s1 + $0x138] sm:$0xff] }
  0x1e   : > { %4182 = vmatpush3.msra.mxu0 %v3189_v15  ;;  %4223 = vmatpush3.msra.mxu1 %v267_v16  ;;  %v3222_v48 = vld [vmem:[%s7586_s1 + $0x1c8] sm:$0xff]  ;;  %v3205_v49 = vld [vmem:[%s7586_s1 + $0x140] sm:$0xff]  ;;  %v3220_v52 = vld [vmem:[%s7586_s1 + $0x1b8] sm:$0xff] }
  0x1f   : > { %4183 = vmatprep.subr.mxu0 %v5391_v2  ;;  %4224 = vmatprep.subr.mxu1 %v5391_v2  ;;  %v3221_v50 = vld [vmem:[%s7586_s1 + $0x1c0] sm:$0xff]  ;;  %v3203_v53 = vld [vmem:[%s7586_s1 + $0x130] sm:$0xff]  ;;  %v3202_v55 = vld [vmem:[%s7586_s1 + $0x128] sm:$0xff] }
  0x20   : > { %4184 = vmatpush3.msra.mxu0 %v3188_v17  ;;  %4225 = vmatpush3.msra.mxu1 %v266_v18  ;;  %v3219_v54 = vld [vmem:[%s7586_s1 + $0x1b0] sm:$0xff]  ;;  %v3218_v56 = vld [vmem:[%s7586_s1 + $0x1a8] sm:$0xff]  ;;  %v3201_v58 = vld [vmem:[%s7586_s1 + $0x120] sm:$0xff] }
  0x21   : > { %4185 = vmatprep.subr.mxu0 %v5391_v2  ;;  %4226 = vmatprep.subr.mxu1 %v5391_v2  ;;  %v5686_v57 = vld [vmem:[%s5579_s30 + $0x8] sm:$0xff]  ;;  %v3217_v59 = vld [vmem:[%s7586_s1 + $0x1a0] sm:$0xff]  ;;  %v3200_v61 = vld [vmem:[%s7586_s1 + $0x118] sm:$0xff] }
  0x22   : > { %4186 = vmatpush3.msra.mxu0 %v3187_v19  ;;  %4227 = vmatpush3.msra.mxu1 %v265_v20  ;;  %v276_v60 = vld [vmem:[%s5579_s30 + $0x9] sm:$0xff]  ;;  %v3216_v62 = vld [vmem:[%s7586_s1 + $0x198] sm:$0xff]  ;;  %v3197_v6 = vld [vmem:[%s7586_s1 + $0x100] sm:$0xff] }
  0x23   : > { %4187 = vmatprep.subr.mxu0 %v5391_v2  ;;  %4228 = vmatprep.subr.mxu1 %v5391_v2  ;;  %v5711_v63 = vld [vmem:[%s5579_s30 + $0x10] sm:$0xff]  ;;  %v3198_v4 = vld [vmem:[%s7586_s1 + $0x108] sm:$0xff]  ;;  %v3213_v7 = vld [vmem:[%s7586_s1 + $0x180] sm:$0xff] }
  0x24   : > { %4188 = vmatpush3.msra.mxu0 %v3186_v21  ;;  %4229 = vmatpush3.msra.mxu1 %v264_v22  ;;  %v3199_v0 = vld [vmem:[%s7586_s1 + $0x110] sm:$0xff]  ;;  %v3214_v5 = vld [vmem:[%s7586_s1 + $0x188] sm:$0xff]  ;;  %v3244_v10 = vld [vmem:[%s7586_s1 + $0x278] sm:$0xff] }
  0x25   : > { %4189 = vmatprep.subr.mxu0 %v5391_v2  ;;  %4230 = vmatprep.subr.mxu1 %v5391_v2  ;;  %v3215_v1 = vld [vmem:[%s7586_s1 + $0x190] sm:$0xff]  ;;  %v455_v8 = vld [vmem:[%s5579_s30 + $0x2] sm:$0xff]  ;;  %v3260_v11 = vld [vmem:[%s7586_s1 + $0x2f8] sm:$0xff] }
  0x26   : > { %4190 = vmatpush3.msra.mxu0 %v3185_v23  ;;  %4231 = vmatpush3.msra.mxu1 %v263_v24  ;;  %v277_v3 = vld [vmem:[%s5579_s30 + $0x11] sm:$0xff]  ;;  %v558_v9 = vld [vmem:[%s5579_s30 + $0x6] sm:$0xff] }
  0x27   : > { %4191 = vmatprep.subr.mxu0 %v5391_v2  ;;  %4232 = vmatprep.subr.mxu1 %v5391_v2  ;;  %v3243_v12 = vld [vmem:[%s7586_s1 + $0x270] sm:$0xff]  ;;  %v3242_v15 = vld [vmem:[%s7586_s1 + $0x268] sm:$0xff]  ;;  %v3241_v18 = vld [vmem:[%s7586_s1 + $0x260] sm:$0xff] }
  0x28   : > { %4192 = vmatpush3.msra.mxu0 %v3184_v25  ;;  %4233 = vmatpush3.msra.mxu1 %v262_v26  ;;  %v3259_v13 = vld [vmem:[%s7586_s1 + $0x2f0] sm:$0xff]  ;;  %v3258_v16 = vld [vmem:[%s7586_s1 + $0x2e8] sm:$0xff]  ;;  %v3257_v19 = vld [vmem:[%s7586_s1 + $0x2e0] sm:$0xff] }
  0x29   : > { %4193 = vmatprep.subr.mxu0 %v5391_v2  ;;  %4234 = vmatprep.subr.mxu1 %v5391_v2  ;;  %v456_v14 = vld [vmem:[%s5579_s30 + $0xa] sm:$0xff]  ;;  %v457_v20 = vld [vmem:[%s5579_s30 + $0x12] sm:$0xff] }
  0x2a   : > { %4194 = vmatpush3.msra.mxu0 %v3183_v27  ;;  %4235 = vmatpush3.msra.mxu1 %v261_v28  ;;  %v5777_v17 = vld [vmem:[%s5579_s30 + $0xe] sm:$0xff]  ;;  %v3240_v21 = vld [vmem:[%s7586_s1 + $0x258] sm:$0xff]  ;;  %v3237_v28 = vld [vmem:[%s7586_s1 + $0x240] sm:$0xff] }
  0x2b   : > { %4195 = vmatprep.subr.mxu0 %v5391_v2  ;;  %4236 = vmatprep.subr.mxu1 %v5391_v2  ;;  %v3256_v22 = vld [vmem:[%s7586_s1 + $0x2d8] sm:$0xff]  ;;  %v3239_v24 = vld [vmem:[%s7586_s1 + $0x250] sm:$0xff]  ;;  %v3238_v26 = vld [vmem:[%s7586_s1 + $0x248] sm:$0xff] }
  0x2c   : > { %4196 = vmatpush3.msra.mxu0 %v3182_v29  ;;  %4237 = vmatpush3.msra.mxu1 %v260_v30  ;;  %v5802_v23 = vld [vmem:[%s5579_s30 + $0x16] sm:$0xff]  ;;  %v3254_v27 = vld [vmem:[%s7586_s1 + $0x2c8] sm:$0xff]  ;;  %v3253_v29 = vld [vmem:[%s7586_s1 + $0x2c0] sm:$0xff] }
  0x2d   : > { %4197 = vmatprep.subr.mxu0 %v5391_v2  ;;  %4238 = vmatprep.subr.mxu1 %v5391_v2  ;;  %v3255_v25 = vld [vmem:[%s7586_s1 + $0x2d0] sm:$0xff]  ;;  %v3236_v30 = vld [vmem:[%s7586_s1 + $0x238] sm:$0xff] }
  0x2e   : > { %4198 = vmatpush3.msra.mxu0 %v3181_v31  ;;  %4239 = vmatpush3.msra.mxu1 %v259_v32  ;;  %v3252_v31 = vld [vmem:[%s7586_s1 + $0x2b8] sm:$0xff]  ;;  %v3235_v32 = vld [vmem:[%s7586_s1 + $0x230] sm:$0xff] }
  0x2f   : > { %4240 = vmatprep.mubr.msk.f32.mxu1 %vm5392_vm0, %v5391_v2  ;;  %4199 = vmatprep.mubr.msk.f32.mxu0 %vm5392_vm0, %v5391_v2 }
  0x30   : > { %4241 = vmatmul.mubr.f32.vlgmr.msra.gmra.mxu1 %v256_v33  ;;  %4249 = vmatprep.subr.mxu0 %v5391_v2  ;;  %v3251_v33 = vld [vmem:[%s7586_s1 + $0x2b0] sm:$0xff] }
  0x31   : > { %4290 = vmatprep.subr.mxu1 %v5391_v2  ;;  %4200 = vmatmul.mubr.f32.vlgmr.msra.gmra.mxu0 %v275_v34  ;;  %v3234_v34 = vld [vmem:[%s7586_s1 + $0x228] sm:$0xff] }
  0x32   : > { %4250 = vmatpush3.msra.mxu0 %v3212_v35  ;;  %4291 = vmatpush3.msra.mxu1 %v3228_v36  ;;  %v3250_v35 = vld [vmem:[%s7586_s1 + $0x2a8] sm:$0xff]  ;;  %v3233_v36 = vld [vmem:[%s7586_s1 + $0x220] sm:$0xff] }
  0x33   : > { %4251 = vmatprep.subr.mxu0 %v5391_v2  ;;  %4292 = vmatprep.subr.mxu1 %v5391_v2 }
  0x34   : > { %4252 = vmatpush3.msra.mxu0 %v3211_v37  ;;  %4293 = vmatpush3.msra.mxu1 %v3227_v38  ;;  %v3249_v37 = vld [vmem:[%s7586_s1 + $0x2a0] sm:$0xff]  ;;  %v3232_v38 = vld [vmem:[%s7586_s1 + $0x218] sm:$0xff] }
  0x35   : > { %4253 = vmatprep.subr.mxu0 %v5391_v2  ;;  %4294 = vmatprep.subr.mxu1 %v5391_v2 }
  0x36   : > { %4254 = vmatpush3.msra.mxu0 %v3210_v39  ;;  %4295 = vmatpush3.msra.mxu1 %v3226_v40  ;;  %v3248_v39 = vld [vmem:[%s7586_s1 + $0x298] sm:$0xff]  ;;  %v3231_v40 = vld [vmem:[%s7586_s1 + $0x210] sm:$0xff] }
  0x37   : > { %4255 = vmatprep.subr.mxu0 %v5391_v2  ;;  %4296 = vmatprep.subr.mxu1 %v5391_v2 }
  0x38   : > { %4256 = vmatpush3.msra.mxu0 %v3209_v41  ;;  %4297 = vmatpush3.msra.mxu1 %v3225_v42  ;;  %v3247_v41 = vld [vmem:[%s7586_s1 + $0x290] sm:$0xff]  ;;  %v3230_v42 = vld [vmem:[%s7586_s1 + $0x208] sm:$0xff] }
  0x39   : > { %4257 = vmatprep.subr.mxu0 %v5391_v2  ;;  %4298 = vmatprep.subr.mxu1 %v5391_v2 }
  0x3a   : > { %4258 = vmatpush3.msra.mxu0 %v3208_v43  ;;  %4299 = vmatpush3.msra.mxu1 %v3224_v44  ;;  %v3246_v43 = vld [vmem:[%s7586_s1 + $0x288] sm:$0xff]  ;;  %v3229_v44 = vld [vmem:[%s7586_s1 + $0x200] sm:$0xff] }
  0x3b   : > { %4259 = vmatprep.subr.mxu0 %v5391_v2  ;;  %4300 = vmatprep.subr.mxu1 %v5391_v2 }
  0x3c   : > { %4260 = vmatpush3.msra.mxu0 %v3207_v45  ;;  %4301 = vmatpush3.msra.mxu1 %v3223_v46  ;;  %v3245_v45 = vld [vmem:[%s7586_s1 + $0x280] sm:$0xff] }
  0x3d   : > { %4261 = vmatprep.subr.mxu0 %v5391_v2  ;;  %4302 = vmatprep.subr.mxu1 %v5391_v2  ;;  %v661_v46 = vld [vmem:[%s5579_s30 + $0x7] sm:$0xff] }
  0x3e   : > { %4262 = vmatpush3.msra.mxu0 %v3206_v47  ;;  %4303 = vmatpush3.msra.mxu1 %v3222_v48  ;;  %v3276_v47 = vld [vmem:[%s7586_s1 + $0x378] sm:$0xff] }
  0x3f   : > { %4263 = vmatprep.subr.mxu0 %v5391_v2  ;;  %4304 = vmatprep.subr.mxu1 %v5391_v2  ;;  %v3292_v48 = vld [vmem:[%s7586_s1 + $0x3f8] sm:$0xff] }
  0x40   : > { %4264 = vmatpush3.msra.mxu0 %v3205_v49  ;;  %4305 = vmatpush3.msra.mxu1 %v3221_v50  ;;  %v3275_v49 = vld [vmem:[%s7586_s1 + $0x370] sm:$0xff] }
  0x41   : > { %4265 = vmatprep.subr.mxu0 %v5391_v2  ;;  %4306 = vmatprep.subr.mxu1 %v5391_v2  ;;  %v3291_v50 = vld [vmem:[%s7586_s1 + $0x3f0] sm:$0xff] }
  0x42   : > { %4266 = vmatpush3.msra.mxu0 %v3204_v51  ;;  %4307 = vmatpush3.msra.mxu1 %v3220_v52  ;;  %v662_v51 = vld [vmem:[%s5579_s30 + $0xf] sm:$0xff] }
  0x43   : > { %4267 = vmatprep.subr.mxu0 %v5391_v2  ;;  %4308 = vmatprep.subr.mxu1 %v5391_v2  ;;  %v3274_v52 = vld [vmem:[%s7586_s1 + $0x368] sm:$0xff] }
  0x44   : > { %4268 = vmatpush3.msra.mxu0 %v3203_v53  ;;  %4309 = vmatpush3.msra.mxu1 %v3219_v54  ;;  %v3290_v53 = vld [vmem:[%s7586_s1 + $0x3e8] sm:$0xff]  ;;  %v3273_v54 = vld [vmem:[%s7586_s1 + $0x360] sm:$0xff] }
  0x45   : > { %4269 = vmatprep.subr.mxu0 %v5391_v2  ;;  %4310 = vmatprep.subr.mxu1 %v5391_v2 }
  0x46   : > { %4270 = vmatpush3.msra.mxu0 %v3202_v55  ;;  %4311 = vmatpush3.msra.mxu1 %v3218_v56  ;;  %v3289_v55 = vld [vmem:[%s7586_s1 + $0x3e0] sm:$0xff]  ;;  %v663_v56 = vld [vmem:[%s5579_s30 + $0x17] sm:$0xff] }
  0x47   : > { %4243 = vmatprep.mubr.msk.f32.mxu1 %vm5392_vm0, %v5391_v2  ;;  %4271 = vmatprep.subr.mxu0 %v5391_v2 }
  0x48   : > { %4312 = vmatprep.subr.mxu1 %v5391_v2  ;;  %4202 = vmatprep.mubr.msk.f32.mxu0 %vm5392_vm0, %v5391_v2 }
  0x49   : > { %4244 = vmatmul.mubr.f32.gmra.mxu1 %v5686_v57  ;;  %4272 = vmatpush3.msra.mxu0 %v3201_v58  ;;  %v3288_v58 = vld [vmem:[%s7586_s1 + $0x3d8] sm:$0xff] }
  0x4a   : > { %4313 = vmatpush3.msra.mxu1 %v3217_v59  ;;  %4203 = vmatmul.mubr.f32.gmra.mxu0 %v276_v60  ;;  %v766_v59 = vld [vmem:[%s5579_s30 + $0x18] sm:$0xff]  ;;  %v3271_v60 = vld [vmem:[%s7586_s1 + $0x350] sm:$0xff] }
  0x4b   : > { %4273 = vmatprep.subr.mxu0 %v5391_v2  ;;  %4314 = vmatprep.subr.mxu1 %v5391_v2 }
  0x4c   : > { %4274 = vmatpush3.msra.mxu0 %v3200_v61  ;;  %4315 = vmatpush3.msra.mxu1 %v3216_v62  ;;  %v3287_v61 = vld [vmem:[%s7586_s1 + $0x3d0] sm:$0xff]  ;;  %v3270_v62 = vld [vmem:[%s7586_s1 + $0x348] sm:$0xff] }
  0x4d   : > { %4246 = vmatprep.mubr.msk.f32.mxu1 %vm5392_vm0, %v5391_v2  ;;  %4275 = vmatprep.subr.mxu0 %v5391_v2 }
  0x4e   : > { %4316 = vmatprep.subr.mxu1 %v5391_v2  ;;  %4205 = vmatprep.mubr.msk.f32.mxu0 %vm5392_vm0, %v5391_v2 }
  0x4f   : > { %4247 = vmatmul.mubr.f32.gmra.mxu1 %v5711_v63  ;;  %4276 = vmatpush3.msra.mxu0 %v3199_v0  ;;  %v3269_v0 = vld [vmem:[%s7586_s1 + $0x340] sm:$0xff] }
  0x50   : > { %4317 = vmatpush3.msra.mxu1 %v3215_v1  ;;  %4206 = vmatmul.mubr.f32.gmra.mxu0 %v277_v3  ;;  %v3285_v1 = vld [vmem:[%s7586_s1 + $0x3c0] sm:$0xff]  ;;  %v3268_v3 = vld [vmem:[%s7586_s1 + $0x338] sm:$0xff] }
  0x51   : > { %4277 = vmatprep.subr.mxu0 %v5391_v2  ;;  %4318 = vmatprep.subr.mxu1 %v5391_v2 }
  0x52   : > { %4278 = vmatpush3.msra.mxu0 %v3198_v4  ;;  %4319 = vmatpush3.msra.mxu1 %v3214_v5  ;;  %v3284_v4 = vld [vmem:[%s7586_s1 + $0x3b8] sm:$0xff]  ;;  %v3267_v5 = vld [vmem:[%s7586_s1 + $0x330] sm:$0xff] }
  0x53   : > { %4279 = vmatprep.subr.mxu0 %v5391_v2  ;;  %4320 = vmatprep.subr.mxu1 %v5391_v2 }
  0x54   : > { %4280 = vmatpush3.msra.mxu0 %v3197_v6  ;;  %4281 = vmatprep.mubr.msk.f32.mxu0 %vm5392_vm0, %v5391_v2  ;;  %v3283_v6 = vld [vmem:[%s7586_s1 + $0x3b0] sm:$0xff] }
  0x55   : > { %4321 = vmatpush3.msra.mxu1 %v3213_v7  ;;  %4322 = vmatprep.mubr.msk.f32.mxu1 %vm5392_vm0, %v5391_v2  ;;  %v3266_v7 = vld [vmem:[%s7586_s1 + $0x328] sm:$0xff] }
  0x56   : > { %4282 = vmatmul.mubr.f32.vlgmr.msra.gmra.mxu0 %v455_v8  ;;  %4323 = vmatmul.mubr.f32.vlgmr.msra.gmra.mxu1 %v558_v9  ;;  %v3282_v8 = vld [vmem:[%s7586_s1 + $0x3a8] sm:$0xff]  ;;  %v3265_v9 = vld [vmem:[%s7586_s1 + $0x320] sm:$0xff] }
  0x57   : > { %4331 = vmatprep.subr.mxu0 %v5391_v2  ;;  %4372 = vmatprep.subr.mxu1 %v5391_v2 }
  0x58   : > { %4332 = vmatpush3.msra.mxu0 %v3244_v10  ;;  %4373 = vmatpush3.msra.mxu1 %v3260_v11  ;;  %v3281_v10 = vld [vmem:[%s7586_s1 + $0x3a0] sm:$0xff]  ;;  %v3264_v11 = vld [vmem:[%s7586_s1 + $0x318] sm:$0xff] }
  0x59   : > { %4333 = vmatprep.subr.mxu0 %v5391_v2  ;;  %4374 = vmatprep.subr.mxu1 %v5391_v2 }
  0x5a   : > { %4284 = vmatprep.mubr.msk.f32.mxu0 %vm5392_vm0, %v5391_v2  ;;  %4334 = vmatpush3.msra.mxu0 %v3243_v12  ;;  %v3280_v12 = vld [vmem:[%s7586_s1 + $0x398] sm:$0xff] }
  0x5b   : > { %4375 = vmatpush3.msra.mxu1 %v3259_v13  ;;  %4285 = vmatmul.mubr.f32.gmra.mxu0 %v456_v14  ;;  %v3263_v13 = vld [vmem:[%s7586_s1 + $0x310] sm:$0xff] }
  0x5c   : > { %4335 = vmatprep.subr.mxu0 %v5391_v2  ;;  %4376 = vmatprep.subr.mxu1 %v5391_v2  ;;  %v3279_v14 = vld [vmem:[%s7586_s1 + $0x390] sm:$0xff] }
  0x5d   : > { %4325 = vmatprep.mubr.msk.f32.mxu1 %vm5392_vm0, %v5391_v2  ;;  %4336 = vmatpush3.msra.mxu0 %v3242_v15  ;;  %v3262_v15 = vld [vmem:[%s7586_s1 + $0x308] sm:$0xff] }
  0x5e   : > { %4377 = vmatpush3.msra.mxu1 %v3258_v16  ;;  %4337 = vmatprep.subr.mxu0 %v5391_v2  ;;  %v3278_v16 = vld [vmem:[%s7586_s1 + $0x388] sm:$0xff] }
  0x5f   : > { %4326 = vmatmul.mubr.f32.gmra.mxu1 %v5777_v17  ;;  %4378 = vmatprep.subr.mxu1 %v5391_v2 }
  0x60   : > { %4287 = vmatprep.mubr.msk.f32.mxu0 %vm5392_vm0, %v5391_v2  ;;  %4338 = vmatpush3.msra.mxu0 %v3241_v18  ;;  %v3261_v18 = vld [vmem:[%s7586_s1 + $0x300] sm:$0xff] }
  0x61   : > { %4379 = vmatpush3.msra.mxu1 %v3257_v19  ;;  %4288 = vmatmul.mubr.f32.gmra.mxu0 %v457_v20  ;;  %v3277_v19 = vld [vmem:[%s7586_s1 + $0x380] sm:$0xff]  ;;  %v867_v20 = vld [vmem:[%s5579_s30 + $0xc] sm:$0xff] }
  0x62   : > { %4339 = vmatprep.subr.mxu0 %v5391_v2  ;;  %4380 = vmatprep.subr.mxu1 %v5391_v2 }
  0x63   : > { %4328 = vmatprep.mubr.msk.f32.mxu1 %vm5392_vm0, %v5391_v2  ;;  %4340 = vmatpush3.msra.mxu0 %v3240_v21  ;;  %v970_v21 = vld [vmem:[%s5579_s30 + $0xd] sm:$0xff] }
  0x64   : > { %4381 = vmatpush3.msra.mxu1 %v3256_v22  ;;  %4341 = vmatprep.subr.mxu0 %v5391_v2  ;;  %v3308_v22 = vld [vmem:[%s7586_s1 + $0x478] sm:$0xff] }
  0x65   : > { %4329 = vmatmul.mubr.f32.gmra.mxu1 %v5802_v23  ;;  %4382 = vmatprep.subr.mxu1 %v5391_v2 }
  0x66   : > { %4342 = vmatpush3.msra.mxu0 %v3239_v24  ;;  %4383 = vmatpush3.msra.mxu1 %v3255_v25  ;;  %v3327_v24 = vld [vmem:[%s7586_s1 + $0x4f8] sm:$0xff]  ;;  %v3307_v25 = vld [vmem:[%s7586_s1 + $0x470] sm:$0xff] }
  0x67   : > { %4343 = vmatprep.subr.mxu0 %v5391_v2  ;;  %4384 = vmatprep.subr.mxu1 %v5391_v2 }
  0x68   : > { %4344 = vmatpush3.msra.mxu0 %v3238_v26  ;;  %4385 = vmatpush3.msra.mxu1 %v3254_v27  ;;  %v3326_v26 = vld [vmem:[%s7586_s1 + $0x4f0] sm:$0xff] }
  0x69   : > { %4345 = vmatprep.subr.mxu0 %v5391_v2  ;;  %4386 = vmatprep.subr.mxu1 %v5391_v2  ;;  %v868_v27 = vld [vmem:[%s5579_s30 + $0x14] sm:$0xff] }
  0x6a   : > { %4346 = vmatpush3.msra.mxu0 %v3237_v28  ;;  %4387 = vmatpush3.msra.mxu1 %v3253_v29  ;;  %v3306_v28 = vld [vmem:[%s7586_s1 + $0x468] sm:$0xff] }
  0x6b   : > { %4347 = vmatprep.subr.mxu0 %v5391_v2  ;;  %4388 = vmatprep.subr.mxu1 %v5391_v2  ;;  %v3325_v29 = vld [vmem:[%s7586_s1 + $0x4e8] sm:$0xff] }
  0x6c   : > { %4348 = vmatpush3.msra.mxu0 %v3236_v30  ;;  %4389 = vmatpush3.msra.mxu1 %v3252_v31  ;;  %v971_v30 = vld [vmem:[%s5579_s30 + $0x15] sm:$0xff]  ;;  %v3305_v31 = vld [vmem:[%s7586_s1 + $0x460] sm:$0xff] }
  0x6d   : > { %4349 = vmatprep.subr.mxu0 %v5391_v2  ;;  %4390 = vmatprep.subr.mxu1 %v5391_v2 }
  0x6e   : > { %4350 = vmatpush3.msra.mxu0 %v3235_v32  ;;  %4391 = vmatpush3.msra.mxu1 %v3251_v33  ;;  %v3324_v32 = vld [vmem:[%s7586_s1 + $0x4e0] sm:$0xff] }
  0x6f   : > { %4351 = vmatprep.subr.mxu0 %v5391_v2  ;;  %4392 = vmatprep.subr.mxu1 %v5391_v2  ;;  %v869_v33 = vld [vmem:[%s5579_s30 + $0x1c] sm:$0xff] }
  0x70   : > { %4352 = vmatpush3.msra.mxu0 %v3234_v34  ;;  %4393 = vmatpush3.msra.mxu1 %v3250_v35  ;;  %v3304_v34 = vld [vmem:[%s7586_s1 + $0x458] sm:$0xff] }
  0x71   : > { %4353 = vmatprep.subr.mxu0 %v5391_v2  ;;  %4394 = vmatprep.subr.mxu1 %v5391_v2  ;;  %v3323_v35 = vld [vmem:[%s7586_s1 + $0x4d8] sm:$0xff] }
  0x72   : > { %4354 = vmatpush3.msra.mxu0 %v3233_v36  ;;  %4395 = vmatpush3.msra.mxu1 %v3249_v37  ;;  %v972_v36 = vld [vmem:[%s5579_s30 + $0x1d] sm:$0xff]  ;;  %v3303_v37 = vld [vmem:[%s7586_s1 + $0x450] sm:$0xff] }
  0x73   : > { %4355 = vmatprep.subr.mxu0 %v5391_v2  ;;  %4396 = vmatprep.subr.mxu1 %v5391_v2 }
  0x74   : > { %4356 = vmatpush3.msra.mxu0 %v3232_v38  ;;  %4397 = vmatpush3.msra.mxu1 %v3248_v39  ;;  %v3322_v38 = vld [vmem:[%s7586_s1 + $0x4d0] sm:$0xff]  ;;  %v3302_v39 = vld [vmem:[%s7586_s1 + $0x448] sm:$0xff] }
  0x75   : > { %4357 = vmatprep.subr.mxu0 %v5391_v2  ;;  %4398 = vmatprep.subr.mxu1 %v5391_v2 }
  0x76   : > { %4358 = vmatpush3.msra.mxu0 %v3231_v40  ;;  %4399 = vmatpush3.msra.mxu1 %v3247_v41  ;;  %v3321_v40 = vld [vmem:[%s7586_s1 + $0x4c8] sm:$0xff]  ;;  %v3301_v41 = vld [vmem:[%s7586_s1 + $0x440] sm:$0xff] }
  0x77   : > { %4359 = vmatprep.subr.mxu0 %v5391_v2  ;;  %4400 = vmatprep.subr.mxu1 %v5391_v2 }
  0x78   : > { %4360 = vmatpush3.msra.mxu0 %v3230_v42  ;;  %4401 = vmatpush3.msra.mxu1 %v3246_v43  ;;  %v3320_v42 = vld [vmem:[%s7586_s1 + $0x4c0] sm:$0xff]  ;;  %v3300_v43 = vld [vmem:[%s7586_s1 + $0x438] sm:$0xff] }
  0x79   : > { %4361 = vmatprep.subr.mxu0 %v5391_v2  ;;  %4402 = vmatprep.subr.mxu1 %v5391_v2 }
  0x7a   : > { %4362 = vmatpush3.msra.mxu0 %v3229_v44  ;;  %4363 = vmatprep.mubr.msk.f32.mxu0 %vm5392_vm0, %v5391_v2  ;;  %v3319_v44 = vld [vmem:[%s7586_s1 + $0x4b8] sm:$0xff] }
  0x7b   : > { %4403 = vmatpush3.msra.mxu1 %v3245_v45  ;;  %4404 = vmatprep.mubr.msk.f32.mxu1 %vm5392_vm0, %v5391_v2  ;;  %v3299_v45 = vld [vmem:[%s7586_s1 + $0x430] sm:$0xff] }
  0x7c   : > { %4364 = vmatmul.mubr.f32.vlgmr.msra.gmra.mxu0 %v661_v46  ;;  %4405 = vmatmul.mubr.f32.vlgmr.msra.gmra.mxu1 %v5686_v57  ;;  %v3272_v57 = vld [vmem:[%s7586_s1 + $0x358] sm:$0xff]  ;;  %v3318_v46 = vld [vmem:[%s7586_s1 + $0x4b0] sm:$0xff] }
  0x7d   : > { %4413 = vmatprep.subr.mxu0 %v5391_v2  ;;  %4454 = vmatprep.subr.mxu1 %v5391_v2 }
  0x7e   : > { %4414 = vmatpush3.msra.mxu0 %v3276_v47  ;;  %4455 = vmatpush3.msra.mxu1 %v3292_v48  ;;  %v3298_v47 = vld [vmem:[%s7586_s1 + $0x428] sm:$0xff] }
  0x7f   : > { %4415 = vmatprep.subr.mxu0 %v5391_v2  ;;  %4456 = vmatprep.subr.mxu1 %v5391_v2  ;;  %v3317_v48 = vld [vmem:[%s7586_s1 + $0x4a8] sm:$0xff] }
  0x80   : > { %4366 = vmatprep.mubr.msk.f32.mxu0 %vm5392_vm0, %v5391_v2  ;;  %4416 = vmatpush3.msra.mxu0 %v3275_v49  ;;  %v3297_v49 = vld [vmem:[%s7586_s1 + $0x420] sm:$0xff] }
  0x81   : > { %4457 = vmatpush3.msra.mxu1 %v3291_v50  ;;  %4367 = vmatmul.mubr.f32.gmra.mxu0 %v662_v51  ;;  %v3316_v50 = vld [vmem:[%s7586_s1 + $0x4a0] sm:$0xff]  ;;  %v3296_v51 = vld [vmem:[%s7586_s1 + $0x418] sm:$0xff] }
  0x82   : > { %4417 = vmatprep.subr.mxu0 %v5391_v2  ;;  %4458 = vmatprep.subr.mxu1 %v5391_v2 }
  0x83   : > { %4407 = vmatprep.mubr.msk.f32.mxu1 %vm5392_vm0, %v5391_v2  ;;  %4418 = vmatpush3.msra.mxu0 %v3274_v52  ;;  %v3315_v52 = vld [vmem:[%s7586_s1 + $0x498] sm:$0xff] }
  0x84   : > { %4459 = vmatpush3.msra.mxu1 %v3290_v53  ;;  %4419 = vmatprep.subr.mxu0 %v5391_v2  ;;  %v3295_v53 = vld [vmem:[%s7586_s1 + $0x410] sm:$0xff] }
  0x85   : > { %4408 = vmatmul.mubr.f32.gmra.mxu1 %v5711_v63  ;;  %4460 = vmatprep.subr.mxu1 %v5391_v2  ;;  %v3286_v63 = vld [vmem:[%s7586_s1 + $0x3c8] sm:$0xff] }
  0x86   : > { %4369 = vmatprep.mubr.msk.f32.mxu0 %vm5392_vm0, %v5391_v2  ;;  %4420 = vmatpush3.msra.mxu0 %v3273_v54  ;;  %v3314_v54 = vld [vmem:[%s7586_s1 + $0x490] sm:$0xff] }
  0x87   : > { %4461 = vmatpush3.msra.mxu1 %v3289_v55  ;;  %4370 = vmatmul.mubr.f32.gmra.mxu0 %v663_v56  ;;  %v3294_v55 = vld [vmem:[%s7586_s1 + $0x408] sm:$0xff] }
  0x88   : > { %4421 = vmatprep.subr.mxu0 %v5391_v2  ;;  %4462 = vmatprep.subr.mxu1 %v5391_v2  ;;  %v3313_v56 = vld [vmem:[%s7586_s1 + $0x488] sm:$0xff] }
  0x89   : > { %4410 = vmatprep.mubr.msk.f32.mxu1 %vm5392_vm0, %v5391_v2  ;;  %4422 = vmatpush3.msra.mxu0 %v3272_v57  ;;  %v3293_v57 = vld [vmem:[%s7586_s1 + $0x400] sm:$0xff] }
  0x8a   : > { %4463 = vmatpush3.msra.mxu1 %v3288_v58  ;;  %4423 = vmatprep.subr.mxu0 %v5391_v2  ;;  %v3312_v58 = vld [vmem:[%s7586_s1 + $0x480] sm:$0xff] }
  0x8b   : > { %4411 = vmatmul.mubr.f32.gmra.mxu1 %v766_v59  ;;  %4464 = vmatprep.subr.mxu1 %v5391_v2  ;;  %v3309_v59 = vld [vmem:[%s5579_s30 + $0x28] sm:$0xff] }
  0x8c   : > { %4424 = vmatpush3.msra.mxu0 %v3271_v60  ;;  %4465 = vmatpush3.msra.mxu1 %v3287_v61  ;;  %v3346_v60 = vld [vmem:[%s7586_s1 + $0x578] sm:$0xff] }
  0x8d   : > { %4425 = vmatprep.subr.mxu0 %v5391_v2  ;;  %4466 = vmatprep.subr.mxu1 %v5391_v2  ;;  %v3365_v61 = vld [vmem:[%s7586_s1 + $0x5f8] sm:$0xff] }
  0x8e   : > { %4426 = vmatpush3.msra.mxu0 %v3270_v62  ;;  %4467 = vmatpush3.msra.mxu1 %v3286_v63  ;;  %v3345_v62 = vld [vmem:[%s7586_s1 + $0x570] sm:$0xff] }
  0x8f   : > { %4427 = vmatprep.subr.mxu0 %v5391_v2  ;;  %4468 = vmatprep.subr.mxu1 %v5391_v2  ;;  %v3364_v63 = vld [vmem:[%s7586_s1 + $0x5f0] sm:$0xff] }
  0x90   : > { %4428 = vmatpush3.msra.mxu0 %v3269_v0  ;;  %4469 = vmatpush3.msra.mxu1 %v3285_v1  ;;  %v3363_v0 = vld [vmem:[%s7586_s1 + $0x5e8] sm:$0xff]  ;;  %v6221_v1 = vld [vmem:[%s5579_s30 + $0x30] sm:$0xff] }
  0x91   : > { %4429 = vmatprep.subr.mxu0 %v5391_v2  ;;  %4470 = vmatprep.subr.mxu1 %v5391_v2 }
  0x92   : > { %4430 = vmatpush3.msra.mxu0 %v3268_v3  ;;  %4471 = vmatpush3.msra.mxu1 %v3284_v4  ;;  %v3343_v3 = vld [vmem:[%s7586_s1 + $0x560] sm:$0xff] }
  0x93   : > { %4431 = vmatprep.subr.mxu0 %v5391_v2  ;;  %4472 = vmatprep.subr.mxu1 %v5391_v2  ;;  %v1075_v4 = vld [vmem:[%s5579_s30 + $0x1e] sm:$0xff] }
  0x94   : > { %4432 = vmatpush3.msra.mxu0 %v3267_v5  ;;  %4473 = vmatpush3.msra.mxu1 %v3283_v6  ;;  %v3342_v5 = vld [vmem:[%s7586_s1 + $0x558] sm:$0xff] }
  0x95   : > { %4433 = vmatprep.subr.mxu0 %v5391_v2  ;;  %4474 = vmatprep.subr.mxu1 %v5391_v2  ;;  %v3361_v6 = vld [vmem:[%s7586_s1 + $0x5d8] sm:$0xff] }
  0x96   : > { %4434 = vmatpush3.msra.mxu0 %v3266_v7  ;;  %4475 = vmatpush3.msra.mxu1 %v3282_v8  ;;  %v6246_v7 = vld [vmem:[%s5579_s30 + $0x38] sm:$0xff]  ;;  %v3341_v8 = vld [vmem:[%s7586_s1 + $0x550] sm:$0xff] }
  0x97   : > { %4435 = vmatprep.subr.mxu0 %v5391_v2  ;;  %4476 = vmatprep.subr.mxu1 %v5391_v2 }
  0x98   : > { %4436 = vmatpush3.msra.mxu0 %v3265_v9  ;;  %4477 = vmatpush3.msra.mxu1 %v3281_v10  ;;  %v3360_v9 = vld [vmem:[%s7586_s1 + $0x5d0] sm:$0xff]  ;;  %v3340_v10 = vld [vmem:[%s7586_s1 + $0x548] sm:$0xff] }
  0x99   : > { %4437 = vmatprep.subr.mxu0 %v5391_v2  ;;  %4478 = vmatprep.subr.mxu1 %v5391_v2 }
  0x9a   : > { %4438 = vmatpush3.msra.mxu0 %v3264_v11  ;;  %4479 = vmatpush3.msra.mxu1 %v3280_v12  ;;  %v3359_v11 = vld [vmem:[%s7586_s1 + $0x5c8] sm:$0xff]  ;;  %v3339_v12 = vld [vmem:[%s7586_s1 + $0x540] sm:$0xff] }
  0x9b   : > { %4439 = vmatprep.subr.mxu0 %v5391_v2  ;;  %4480 = vmatprep.subr.mxu1 %v5391_v2 }
  0x9c   : > { %4440 = vmatpush3.msra.mxu0 %v3263_v13  ;;  %4481 = vmatpush3.msra.mxu1 %v3279_v14  ;;  %v3358_v13 = vld [vmem:[%s7586_s1 + $0x5c0] sm:$0xff]  ;;  %v3338_v14 = vld [vmem:[%s7586_s1 + $0x538] sm:$0xff] }
  0x9d   : > { %4441 = vmatprep.subr.mxu0 %v5391_v2  ;;  %4482 = vmatprep.subr.mxu1 %v5391_v2 }
  0x9e   : > { %4442 = vmatpush3.msra.mxu0 %v3262_v15  ;;  %4483 = vmatpush3.msra.mxu1 %v3278_v16  ;;  %v3357_v15 = vld [vmem:[%s7586_s1 + $0x5b8] sm:$0xff]  ;;  %v3337_v16 = vld [vmem:[%s7586_s1 + $0x530] sm:$0xff] }
  0x9f   : > { %4443 = vmatprep.subr.mxu0 %v5391_v2  ;;  %4484 = vmatprep.subr.mxu1 %v5391_v2 }
  0xa0   : > { %4444 = vmatpush3.msra.mxu0 %v3261_v18  ;;  %4445 = vmatprep.mubr.msk.f32.mxu0 %vm5392_vm0, %v5391_v2  ;;  %v3356_v18 = vld [vmem:[%s7586_s1 + $0x5b0] sm:$0xff] }
  0xa1   : > { %4485 = vmatpush3.msra.mxu1 %v3277_v19  ;;  %4486 = vmatprep.mubr.msk.f32.mxu1 %vm5392_vm0, %v5391_v2  ;;  %v3336_v19 = vld [vmem:[%s7586_s1 + $0x528] sm:$0xff] }
  0xa2   : > { %4446 = vmatmul.mubr.f32.vlgmr.msra.gmra.mxu0 %v867_v20  ;;  %4487 = vmatmul.mubr.f32.vlgmr.msra.gmra.mxu1 %v970_v21  ;;  %v3355_v20 = vld [vmem:[%s7586_s1 + $0x5a8] sm:$0xff]  ;;  %v3335_v21 = vld [vmem:[%s7586_s1 + $0x520] sm:$0xff] }
  0xa3   : > { %4495 = vmatprep.subr.mxu0 %v5391_v2  ;;  %4536 = vmatprep.subr.mxu1 %v5391_v2 }
  0xa4   : > { %4496 = vmatpush3.msra.mxu0 %v3308_v22  ;;  %4537 = vmatpush3.msra.mxu1 %v3327_v24  ;;  %v3354_v22 = vld [vmem:[%s7586_s1 + $0x5a0] sm:$0xff]  ;;  %v3334_v24 = vld [vmem:[%s7586_s1 + $0x518] sm:$0xff] }
  0xa5   : > { %4497 = vmatprep.subr.mxu0 %v5391_v2  ;;  %4538 = vmatprep.subr.mxu1 %v5391_v2 }
  0xa6   : > { %4448 = vmatprep.mubr.msk.f32.mxu0 %vm5392_vm0, %v5391_v2  ;;  %4498 = vmatpush3.msra.mxu0 %v3307_v25  ;;  %v3353_v25 = vld [vmem:[%s7586_s1 + $0x598] sm:$0xff] }
  0xa7   : > { %4539 = vmatpush3.msra.mxu1 %v3326_v26  ;;  %4449 = vmatmul.mubr.f32.gmra.mxu0 %v868_v27  ;;  %v3333_v26 = vld [vmem:[%s7586_s1 + $0x510] sm:$0xff] }
  0xa8   : > { %4499 = vmatprep.subr.mxu0 %v5391_v2  ;;  %4540 = vmatprep.subr.mxu1 %v5391_v2  ;;  %v3352_v27 = vld [vmem:[%s7586_s1 + $0x590] sm:$0xff] }
  0xa9   : > { %4489 = vmatprep.mubr.msk.f32.mxu1 %vm5392_vm0, %v5391_v2  ;;  %4500 = vmatpush3.msra.mxu0 %v3306_v28  ;;  %v3332_v28 = vld [vmem:[%s7586_s1 + $0x508] sm:$0xff] }
  0xaa   : > { %4541 = vmatpush3.msra.mxu1 %v3325_v29  ;;  %4501 = vmatprep.subr.mxu0 %v5391_v2  ;;  %v3351_v29 = vld [vmem:[%s7586_s1 + $0x588] sm:$0xff] }
  0xab   : > { %4490 = vmatmul.mubr.f32.gmra.mxu1 %v971_v30  ;;  %4542 = vmatprep.subr.mxu1 %v5391_v2  ;;  %v3331_v30 = vld [vmem:[%s7586_s1 + $0x500] sm:$0xff] }
  0xac   : > { %4451 = vmatprep.mubr.msk.f32.mxu0 %vm5392_vm0, %v5391_v2  ;;  %4502 = vmatpush3.msra.mxu0 %v3305_v31  ;;  %v3350_v31 = vld [vmem:[%s7586_s1 + $0x580] sm:$0xff] }
  0xad   : > { %4543 = vmatpush3.msra.mxu1 %v3324_v32  ;;  %4452 = vmatmul.mubr.f32.gmra.mxu0 %v869_v33  ;;  %v3328_v32 = vld [vmem:[%s5579_s30 + $0x29] sm:$0xff] }
  0xae   : > { %4503 = vmatprep.subr.mxu0 %v5391_v2  ;;  %4544 = vmatprep.subr.mxu1 %v5391_v2  ;;  %v3347_v33 = vld [vmem:[%s5579_s30 + $0x2a] sm:$0xff] }
  0xaf   : > { %4492 = vmatprep.mubr.msk.f32.mxu1 %vm5392_vm0, %v5391_v2  ;;  %4504 = vmatpush3.msra.mxu0 %v3304_v34  ;;  %v3384_v34 = vld [vmem:[%s7586_s1 + $0x678] sm:$0xff] }
  0xb0   : > { %4545 = vmatpush3.msra.mxu1 %v3323_v35  ;;  %4505 = vmatprep.subr.mxu0 %v5391_v2  ;;  %v3403_v35 = vld [vmem:[%s7586_s1 + $0x6f8] sm:$0xff] }
  0xb1   : > { %4493 = vmatmul.mubr.f32.gmra.mxu1 %v972_v36  ;;  %4546 = vmatprep.subr.mxu1 %v5391_v2  ;;  %v3383_v36 = vld [vmem:[%s7586_s1 + $0x670] sm:$0xff] }
  0xb2   : > { %4506 = vmatpush3.msra.mxu0 %v3303_v37  ;;  %4547 = vmatpush3.msra.mxu1 %v3322_v38  ;;  %v3402_v37 = vld [vmem:[%s7586_s1 + $0x6f0] sm:$0xff] }
  0xb3   : > { %4507 = vmatprep.subr.mxu0 %v5391_v2  ;;  %4548 = vmatprep.subr.mxu1 %v5391_v2  ;;  %v3329_v38 = vld [vmem:[%s5579_s30 + $0x31] sm:$0xff] }
  0xb4   : > { %4508 = vmatpush3.msra.mxu0 %v3302_v39  ;;  %4549 = vmatpush3.msra.mxu1 %v3321_v40 }
  0xb5   : > { %4509 = vmatprep.subr.mxu0 %v5391_v2  ;;  %4550 = vmatprep.subr.mxu1 %v5391_v2 }
  0xb6   : > { %4510 = vmatpush3.msra.mxu0 %v3301_v41  ;;  %4551 = vmatpush3.msra.mxu1 %v3320_v42  ;;  %v3382_v41 = vld [vmem:[%s7586_s1 + $0x668] sm:$0xff] }
  0xb7   : > { %4511 = vmatprep.subr.mxu0 %v5391_v2  ;;  %4552 = vmatprep.subr.mxu1 %v5391_v2 }
  0xb8   : > { %4512 = vmatpush3.msra.mxu0 %v3300_v43  ;;  %4553 = vmatpush3.msra.mxu1 %v3319_v44  ;;  %v3401_v44 = vld [vmem:[%s7586_s1 + $0x6e8] sm:$0xff] }
  0xb9   : > { %4513 = vmatprep.subr.mxu0 %v5391_v2  ;;  %4554 = vmatprep.subr.mxu1 %v5391_v2 }
  0xba   : > { %4514 = vmatpush3.msra.mxu0 %v3299_v45  ;;  %4555 = vmatpush3.msra.mxu1 %v3318_v46  ;;  %v3348_v46 = vld [vmem:[%s5579_s30 + $0x32] sm:$0xff] }
  0xbb   : > { %4515 = vmatprep.subr.mxu0 %v5391_v2  ;;  %4556 = vmatprep.subr.mxu1 %v5391_v2 }
  0xbc   : > { %4516 = vmatpush3.msra.mxu0 %v3298_v47  ;;  %4557 = vmatpush3.msra.mxu1 %v3317_v48  ;;  %v3381_v47 = vld [vmem:[%s7586_s1 + $0x660] sm:$0xff] }
  0xbd   : > { %4517 = vmatprep.subr.mxu0 %v5391_v2  ;;  %4558 = vmatprep.subr.mxu1 %v5391_v2  ;;  %v3400_v48 = vld [vmem:[%s7586_s1 + $0x6e0] sm:$0xff] }
  0xbe   : > { %4518 = vmatpush3.msra.mxu0 %v3297_v49  ;;  %4559 = vmatpush3.msra.mxu1 %v3316_v50  ;;  %v3330_v49 = vld [vmem:[%s5579_s30 + $0x39] sm:$0xff] }
  0xbf   : > { %4519 = vmatprep.subr.mxu0 %v5391_v2  ;;  %4560 = vmatprep.subr.mxu1 %v5391_v2  ;;  %v3380_v50 = vld [vmem:[%s7586_s1 + $0x658] sm:$0xff] }
  0xc0   : > { %4520 = vmatpush3.msra.mxu0 %v3296_v51  ;;  %4561 = vmatpush3.msra.mxu1 %v3315_v52  ;;  %v3399_v51 = vld [vmem:[%s7586_s1 + $0x6d8] sm:$0xff] }
  0xc1   : > { %4521 = vmatprep.subr.mxu0 %v5391_v2  ;;  %4562 = vmatprep.subr.mxu1 %v5391_v2  ;;  %v3349_v52 = vld [vmem:[%s5579_s30 + $0x3a] sm:$0xff] }
  0xc2   : > { %4522 = vmatpush3.msra.mxu0 %v3295_v53  ;;  %4563 = vmatpush3.msra.mxu1 %v3314_v54  ;;  %v3379_v53 = vld [vmem:[%s7586_s1 + $0x650] sm:$0xff] }
  0xc3   : > { %4523 = vmatprep.subr.mxu0 %v5391_v2  ;;  %4564 = vmatprep.subr.mxu1 %v5391_v2  ;;  %v3398_v54 = vld [vmem:[%s7586_s1 + $0x6d0] sm:$0xff] }
  0xc4   : > { %4524 = vmatpush3.msra.mxu0 %v3294_v55  ;;  %4565 = vmatpush3.msra.mxu1 %v3313_v56  ;;  %v3378_v55 = vld [vmem:[%s7586_s1 + $0x648] sm:$0xff] }
  0xc5   : > { %4525 = vmatprep.subr.mxu0 %v5391_v2  ;;  %4566 = vmatprep.subr.mxu1 %v5391_v2  ;;  %v3397_v56 = vld [vmem:[%s7586_s1 + $0x6c8] sm:$0xff] }
  0xc6   : > { %4526 = vmatpush3.msra.mxu0 %v3293_v57  ;;  %4527 = vmatprep.mubr.msk.f32.mxu0 %vm5392_vm0, %v5391_v2  ;;  %v3377_v57 = vld [vmem:[%s7586_s1 + $0x640] sm:$0xff] }
  0xc7   : > { %4567 = vmatpush3.msra.mxu1 %v3312_v58  ;;  %4568 = vmatprep.mubr.msk.f32.mxu1 %vm5392_vm0, %v5391_v2  ;;  %v3396_v58 = vld [vmem:[%s7586_s1 + $0x6c0] sm:$0xff] }
  0xc8   : > { %4528 = vmatmul.mubr.f32.vlgmr.msra.gmra.mxu0 %v5777_v17  ;;  %4569 = vmatmul.mubr.f32.vlgmr.msra.gmra.mxu1 %v3309_v59  ;;  %v3344_v17 = vld [vmem:[%s7586_s1 + $0x568] sm:$0xff]  ;;  %v3376_v59 = vld [vmem:[%s7586_s1 + $0x638] sm:$0xff] }
  0xc9   : > { %4577 = vmatprep.subr.mxu0 %v5391_v2  ;;  %4618 = vmatprep.subr.mxu1 %v5391_v2 }
  0xca   : > { %4578 = vmatpush3.msra.mxu0 %v3346_v60  ;;  %4619 = vmatpush3.msra.mxu1 %v3365_v61  ;;  %v3395_v60 = vld [vmem:[%s7586_s1 + $0x6b8] sm:$0xff]  ;;  %v3375_v61 = vld [vmem:[%s7586_s1 + $0x630] sm:$0xff] }
  0xcb   : > { %4579 = vmatprep.subr.mxu0 %v5391_v2  ;;  %4620 = vmatprep.subr.mxu1 %v5391_v2 }
  0xcc   : > { %4530 = vmatprep.mubr.msk.f32.mxu0 %vm5392_vm0, %v5391_v2  ;;  %4580 = vmatpush3.msra.mxu0 %v3345_v62  ;;  %v3394_v62 = vld [vmem:[%s7586_s1 + $0x6b0] sm:$0xff] }
  0xcd   : > { %4621 = vmatpush3.msra.mxu1 %v3364_v63  ;;  %4531 = vmatmul.mubr.f32.gmra.mxu0 %v5802_v23  ;;  %v3362_v23 = vld [vmem:[%s7586_s1 + $0x5e0] sm:$0xff]  ;;  %v3374_v63 = vld [vmem:[%s7586_s1 + $0x628] sm:$0xff] }
  0xce   : > { %4581 = vmatprep.subr.mxu0 %v5391_v2  ;;  %4622 = vmatprep.subr.mxu1 %v5391_v2 }
  0xcf   : > { %4571 = vmatprep.mubr.msk.f32.mxu1 %vm5392_vm0, %v5391_v2  ;;  %4582 = vmatpush3.msra.mxu0 %v3344_v17  ;;  %v3393_v17 = vld [vmem:[%s7586_s1 + $0x6a8] sm:$0xff] }
  0xd0   : > { %4623 = vmatpush3.msra.mxu1 %v3363_v0  ;;  %4583 = vmatprep.subr.mxu0 %v5391_v2  ;;  %v3373_v0 = vld [vmem:[%s7586_s1 + $0x620] sm:$0xff] }
  0xd1   : > { %4572 = vmatmul.mubr.f32.gmra.mxu1 %v6221_v1  ;;  %4624 = vmatprep.subr.mxu1 %v5391_v2 }
  0xd2   : > { %4533 = vmatprep.mubr.msk.f32.mxu0 %vm5392_vm0, %v5391_v2  ;;  %4584 = vmatpush3.msra.mxu0 %v3343_v3  ;;  %v3392_v3 = vld [vmem:[%s7586_s1 + $0x6a0] sm:$0xff] }
  0xd3   : > { %4625 = vmatpush3.msra.mxu1 %v3362_v23  ;;  %4534 = vmatmul.mubr.f32.gmra.mxu0 %v1075_v4  ;;  %v3372_v23 = vld [vmem:[%s7586_s1 + $0x618] sm:$0xff] }
  0xd4   : > { %4585 = vmatprep.subr.mxu0 %v5391_v2  ;;  %4626 = vmatprep.subr.mxu1 %v5391_v2  ;;  %v3391_v4 = vld [vmem:[%s7586_s1 + $0x698] sm:$0xff] }
  0xd5   : > { %4574 = vmatprep.mubr.msk.f32.mxu1 %vm5392_vm0, %v5391_v2  ;;  %4586 = vmatpush3.msra.mxu0 %v3342_v5 }
  0xd6   : > { %4627 = vmatpush3.msra.mxu1 %v3361_v6  ;;  %4587 = vmatprep.subr.mxu0 %v5391_v2 }
  0xd7   : > { %4575 = vmatmul.mubr.f32.gmra.mxu1 %v6246_v7  ;;  %4628 = vmatprep.subr.mxu1 %v5391_v2 }
  0xd8   : > { %4588 = vmatpush3.msra.mxu0 %v3341_v8  ;;  %4629 = vmatpush3.msra.mxu1 %v3360_v9  ;;  %v3371_v8 = vld [vmem:[%s7586_s1 + $0x610] sm:$0xff] }
  0xd9   : > { %4589 = vmatprep.subr.mxu0 %v5391_v2  ;;  %4630 = vmatprep.subr.mxu1 %v5391_v2  ;;  %v3390_v9 = vld [vmem:[%s7586_s1 + $0x690] sm:$0xff] }
  0xda   : > { %4590 = vmatpush3.msra.mxu0 %v3340_v10  ;;  %4631 = vmatpush3.msra.mxu1 %v3359_v11 }
  0xdb   : > { %4591 = vmatprep.subr.mxu0 %v5391_v2  ;;  %4632 = vmatprep.subr.mxu1 %v5391_v2 }
  0xdc   : > { %4592 = vmatpush3.msra.mxu0 %v3339_v12  ;;  %4633 = vmatpush3.msra.mxu1 %v3358_v13  ;;  %v3370_v13 = vld [vmem:[%s7586_s1 + $0x608] sm:$0xff] }
  0xdd   : > { %4593 = vmatprep.subr.mxu0 %v5391_v2  ;;  %4634 = vmatprep.subr.mxu1 %v5391_v2 }
  0xde   : > { %4594 = vmatpush3.msra.mxu0 %v3338_v14  ;;  %4635 = vmatpush3.msra.mxu1 %v3357_v15  ;;  %v3389_v14 = vld [vmem:[%s7586_s1 + $0x688] sm:$0xff]  ;;  %v3369_v15 = vld [vmem:[%s7586_s1 + $0x600] sm:$0xff] }
  0xdf   : > { %4595 = vmatprep.subr.mxu0 %v5391_v2  ;;  %4636 = vmatprep.subr.mxu1 %v5391_v2 }
  0xe0   : > { %4596 = vmatpush3.msra.mxu0 %v3337_v16  ;;  %4637 = vmatpush3.msra.mxu1 %v3356_v18  ;;  %v3388_v18 = vld [vmem:[%s7586_s1 + $0x680] sm:$0xff] }
  0xe1   : > { %4597 = vmatprep.subr.mxu0 %v5391_v2  ;;  %4638 = vmatprep.subr.mxu1 %v5391_v2 }
  0xe2   : > { %4598 = vmatpush3.msra.mxu0 %v3336_v19  ;;  %4639 = vmatpush3.msra.mxu1 %v3355_v20  ;;  %v3366_v20 = vld [vmem:[%s5579_s30 + $0x2e] sm:$0xff] }
  0xe3   : > { %4599 = vmatprep.subr.mxu0 %v5391_v2  ;;  %4640 = vmatprep.subr.mxu1 %v5391_v2 }
  0xe4   : > { %4600 = vmatpush3.msra.mxu0 %v3335_v21  ;;  %4641 = vmatpush3.msra.mxu1 %v3354_v22  ;;  %v3385_v21 = vld [vmem:[%s5579_s30 + $0x2f] sm:$0xff] }
  0xe5   : > { %4601 = vmatprep.subr.mxu0 %v5391_v2  ;;  %4642 = vmatprep.subr.mxu1 %v5391_v2 }
  0xe6   : > { %4602 = vmatpush3.msra.mxu0 %v3334_v24  ;;  %4643 = vmatpush3.msra.mxu1 %v3353_v25 }
  0xe7   : > { %4603 = vmatprep.subr.mxu0 %v5391_v2  ;;  %4644 = vmatprep.subr.mxu1 %v5391_v2 }
  0xe8   : > { %4604 = vmatpush3.msra.mxu0 %v3333_v26  ;;  %4645 = vmatpush3.msra.mxu1 %v3352_v27  ;;  %v3422_v26 = vld [vmem:[%s7586_s1 + $0x778] sm:$0xff] }
  0xe9   : > { %4605 = vmatprep.subr.mxu0 %v5391_v2  ;;  %4646 = vmatprep.subr.mxu1 %v5391_v2  ;;  %v3441_v27 = vld [vmem:[%s7586_s1 + $0x7f8] sm:$0xff] }
  0xea   : > { %4606 = vmatpush3.msra.mxu0 %v3332_v28  ;;  %4647 = vmatpush3.msra.mxu1 %v3351_v29  ;;  %v3421_v28 = vld [vmem:[%s7586_s1 + $0x770] sm:$0xff] }
  0xeb   : > { %4607 = vmatprep.subr.mxu0 %v5391_v2  ;;  %4648 = vmatprep.subr.mxu1 %v5391_v2  ;;  %v3440_v29 = vld [vmem:[%s7586_s1 + $0x7f0] sm:$0xff] }
  0xec   : > { %4608 = vmatpush3.msra.mxu0 %v3331_v30  ;;  %4609 = vmatprep.mubr.msk.f32.mxu0 %vm5392_vm0, %v5391_v2  ;;  %v6512_v30 = vld [vmem:[%s5579_s30 + $0x36] sm:$0xff] }
  0xed   : > { %4649 = vmatpush3.msra.mxu1 %v3350_v31  ;;  %4650 = vmatprep.mubr.msk.f32.mxu1 %vm5392_vm0, %v5391_v2 }
  0xee   : > { %4610 = vmatmul.mubr.f32.vlgmr.msra.gmra.mxu0 %v3328_v32  ;;  %4651 = vmatmul.mubr.f32.vlgmr.msra.gmra.mxu1 %v3347_v33 }
  0xef   : > { %4659 = vmatprep.subr.mxu0 %v5391_v2  ;;  %4700 = vmatprep.subr.mxu1 %v5391_v2 }
  0xf0   : > { %4660 = vmatpush3.msra.mxu0 %v3384_v34  ;;  %4701 = vmatpush3.msra.mxu1 %v3403_v35  ;;  %v441_v39 = vpop.f32.mrf.mxu1  ;;  %v3420_v34 = vld [vmem:[%s7586_s1 + $0x768] sm:$0xff] }
  0xf1   : > { %4661 = vmatprep.subr.mxu0 %v5391_v2  ;;  %4702 = vmatprep.subr.mxu1 %v5391_v2  ;;  %v361_v40 = vpop.f32.mrf.mxu0 }
  0xf2   : > { %4612 = vmatprep.mubr.msk.f32.mxu0 %vm5392_vm0, %v5391_v2  ;;  %4662 = vmatpush3.msra.mxu0 %v3383_v36  ;;  %v6367_v42 = vadd.f32 %v441_v39, %v361_v40  ;;  %v4242_v43 = vpop.f32.mrf.mxu1  ;;  %v3386_v39 = vld [vmem:[%s5579_s30 + $0x37] sm:$0xff]  ;;  %v3419_v40 = vld [vmem:[%s7586_s1 + $0x760] sm:$0xff] }
  0xf3   : > { %4703 = vmatpush3.msra.mxu1 %v3402_v37  ;;  %4613 = vmatmul.mubr.f32.gmra.mxu0 %v3329_v38  ;;  %v4201_v45 = vpop.f32.mrf.mxu0  ;;  %v3439_v37 = vld [vmem:[%s7586_s1 + $0x7e8] sm:$0xff]  ;;  %v6541_v43 = vld [vmem:[%s5579_s30 + $0x3e] sm:$0xff] }
  0xf4   : > { %4663 = vmatprep.subr.mxu0 %v5391_v2  ;;  %4704 = vmatprep.subr.mxu1 %v5391_v2 }
  0xf5   : > { %4653 = vmatprep.mubr.msk.f32.mxu1 %vm5392_vm0, %v5391_v2  ;;  %4664 = vmatpush3.msra.mxu0 %v3382_v41 }
  0xf6   : > { %4705 = vmatpush3.msra.mxu1 %v3401_v44  ;;  %4665 = vmatprep.subr.mxu0 %v5391_v2 }
  0xf7   : > { %4654 = vmatmul.mubr.f32.gmra.mxu1 %v3348_v46  ;;  %4706 = vmatprep.subr.mxu1 %v5391_v2  ;;  %v3418_v46 = vld [vmem:[%s7586_s1 + $0x758] sm:$0xff] }
  0xf8   : > { %4615 = vmatprep.mubr.msk.f32.mxu0 %vm5392_vm0, %v5391_v2  ;;  %4666 = vmatpush3.msra.mxu0 %v3381_v47  ;;  %v3437_v47 = vld [vmem:[%s7586_s1 + $0x7d8] sm:$0xff] }
  0xf9   : > { %4707 = vmatpush3.msra.mxu1 %v3400_v48  ;;  %4616 = vmatmul.mubr.f32.gmra.mxu0 %v3330_v49  ;;  %v3387_v49 = vld [vmem:[%s5579_s30 + $0x3f] sm:$0xff] }
  0xfa   : > { %4667 = vmatprep.subr.mxu0 %v5391_v2  ;;  %4708 = vmatprep.subr.mxu1 %v5391_v2 }
  0xfb   : > { %4656 = vmatprep.mubr.msk.f32.mxu1 %vm5392_vm0, %v5391_v2  ;;  %4668 = vmatpush3.msra.mxu0 %v3380_v50 }
  0xfc   : > { %4709 = vmatpush3.msra.mxu1 %v3399_v51  ;;  %4669 = vmatprep.subr.mxu0 %v5391_v2  ;;  %v3417_v51 = vld [vmem:[%s7586_s1 + $0x750] sm:$0xff] }
  0xfd   : > { %4657 = vmatmul.mubr.f32.gmra.mxu1 %v3349_v52  ;;  %4710 = vmatprep.subr.mxu1 %v5391_v2  ;;  %v3436_v52 = vld [vmem:[%s7586_s1 + $0x7d0] sm:$0xff] }
  0xfe   : > { %4670 = vmatpush3.msra.mxu0 %v3379_v53  ;;  %4711 = vmatpush3.msra.mxu1 %v3398_v54 }
  0xff   : > { %4671 = vmatprep.subr.mxu0 %v5391_v2  ;;  %4712 = vmatprep.subr.mxu1 %v5391_v2 }
 0x100   : > { %4672 = vmatpush3.msra.mxu0 %v3378_v55  ;;  %4713 = vmatpush3.msra.mxu1 %v3397_v56  ;;  %v3416_v56 = vld [vmem:[%s7586_s1 + $0x748] sm:$0xff] }
 0x101   : > { %4673 = vmatprep.subr.mxu0 %v5391_v2  ;;  %4714 = vmatprep.subr.mxu1 %v5391_v2 }
 0x102   : > { %4674 = vmatpush3.msra.mxu0 %v3377_v57  ;;  %4715 = vmatpush3.msra.mxu1 %v3396_v58  ;;  %v3435_v57 = vld [vmem:[%s7586_s1 + $0x7c8] sm:$0xff] }
 0x103   : > { %4675 = vmatprep.subr.mxu0 %v5391_v2  ;;  %4716 = vmatprep.subr.mxu1 %v5391_v2 }
 0x104   : > { %4676 = vmatpush3.msra.mxu0 %v3376_v59  ;;  %4717 = vmatpush3.msra.mxu1 %v3395_v60  ;;  %v3415_v59 = vld [vmem:[%s7586_s1 + $0x740] sm:$0xff] }
 0x105   : > { %4677 = vmatprep.subr.mxu0 %v5391_v2  ;;  %4718 = vmatprep.subr.mxu1 %v5391_v2  ;;  %v3434_v60 = vld [vmem:[%s7586_s1 + $0x7c0] sm:$0xff] }
 0x106   : > { %4678 = vmatpush3.msra.mxu0 %v3375_v61  ;;  %4719 = vmatpush3.msra.mxu1 %v3394_v62 }
 0x107   : > { %4679 = vmatprep.subr.mxu0 %v5391_v2  ;;  %4720 = vmatprep.subr.mxu1 %v5391_v2 }
 0x108   : > { %4680 = vmatpush3.msra.mxu0 %v3374_v63  ;;  %4721 = vmatpush3.msra.mxu1 %v3393_v17  ;;  %v3414_v63 = vld [vmem:[%s7586_s1 + $0x738] sm:$0xff] }
 0x109   : > { %4681 = vmatprep.subr.mxu0 %v5391_v2  ;;  %4722 = vmatprep.subr.mxu1 %v5391_v2  ;;  %v446_v5 = vpop.f32.mrf.mxu1  ;;  %v3433_v17 = vld [vmem:[%s7586_s1 + $0x7b8] sm:$0xff] }
 0x10a   : > { %4682 = vmatpush3.msra.mxu0 %v3373_v0  ;;  %4723 = vmatpush3.msra.mxu1 %v3392_v3  ;;  %v366_v6 = vpop.f32.mrf.mxu0  ;;  %v3413_v3 = vld [vmem:[%s7586_s1 + $0x730] sm:$0xff] }
 0x10b   : > { %4683 = vmatprep.subr.mxu0 %v5391_v2  ;;  %4724 = vmatprep.subr.mxu1 %v5391_v2  ;;  %v6469_v10 = vadd.f32 %v446_v5, %v366_v6  ;;  %v4245_v11 = vpop.f32.mrf.mxu1  ;;  %v3431_v5 = vld [vmem:[%s7586_s1 + $0x7a8] sm:$0xff]  ;;  %v3411_v6 = vld [vmem:[%s7586_s1 + $0x720] sm:$0xff] }
 0x10c   : > { %4684 = vmatpush3.msra.mxu0 %v3372_v23  ;;  %4725 = vmatpush3.msra.mxu1 %v3391_v4  ;;  %v4204_v12 = vpop.f32.mrf.mxu0  ;;  %v3432_v23 = vld [vmem:[%s7586_s1 + $0x7b0] sm:$0xff]  ;;  %v3412_v4 = vld [vmem:[%s7586_s1 + $0x728] sm:$0xff] }
 0x10d   : > { %4685 = vmatprep.subr.mxu0 %v5391_v2  ;;  %4726 = vmatprep.subr.mxu1 %v5391_v2  ;;  %v3409_v11 = vld [vmem:[%s7586_s1 + $0x710] sm:$0xff] }
 0x10e   : > { %4686 = vmatpush3.msra.mxu0 %v3371_v8  ;;  %4727 = vmatpush3.msra.mxu1 %v3390_v9  ;;  %v3430_v8 = vld [vmem:[%s7586_s1 + $0x7a0] sm:$0xff]  ;;  %v3410_v9 = vld [vmem:[%s7586_s1 + $0x718] sm:$0xff]  ;;  %v3428_v12 = vld [vmem:[%s7586_s1 + $0x790] sm:$0xff] }
 0x10f   : > { %4687 = vmatprep.subr.mxu0 %v5391_v2  ;;  %4728 = vmatprep.subr.mxu1 %v5391_v2  ;;  %v451_v16 = vpop.f32.mrf.mxu1 }
 0x110   : > { %4688 = vmatpush3.msra.mxu0 %v3370_v13  ;;  %4729 = vmatpush3.msra.mxu1 %v3389_v14  ;;  %v371_v19 = vpop.f32.mrf.mxu0  ;;  %v3408_v13 = vld [vmem:[%s7586_s1 + $0x708] sm:$0xff] }
 0x111   : > { %4689 = vmatprep.subr.mxu0 %v5391_v2  ;;  %4730 = vmatprep.subr.mxu1 %v5391_v2  ;;  %v6491_v22 = vadd.f32 %v451_v16, %v371_v19  ;;  %v4248_v24 = vpop.f32.mrf.mxu1  ;;  %v3427_v14 = vld [vmem:[%s7586_s1 + $0x788] sm:$0xff]  ;;  %v3426_v16 = vld [vmem:[%s7586_s1 + $0x780] sm:$0xff]  ;;  %v3460_v19 = vld [vmem:[%s7586_s1 + $0x878] sm:$0xff] }
 0x112   : > { %4690 = vmatpush3.msra.mxu0 %v3369_v15  ;;  %4691 = vmatprep.mubr.msk.f32.mxu0 %vm5392_vm0, %v5391_v2  ;;  %v4207_v25 = vpop.f32.mrf.mxu0  ;;  %v3407_v15 = vld [vmem:[%s7586_s1 + $0x700] sm:$0xff] }
 0x113   : > { %4731 = vmatpush3.msra.mxu1 %v3388_v18  ;;  %4732 = vmatprep.mubr.msk.f32.mxu1 %vm5392_vm0, %v5391_v2  ;;  %v3423_v18 = vld [vmem:[%s5579_s30 + $0x34] sm:$0xff] }
 0x114   : > { %4692 = vmatmul.mubr.f32.vlgmr.msra.gmra.mxu0 %v3366_v20  ;;  %4733 = vmatmul.mubr.f32.vlgmr.msra.gmra.mxu1 %v3385_v21  ;;  %v3479_v20 = vld [vmem:[%s7586_s1 + $0x8f8] sm:$0xff]  ;;  %v3459_v21 = vld [vmem:[%s7586_s1 + $0x870] sm:$0xff] }
 0x115   : > { %4741 = vmatprep.subr.mxu0 %v5391_v2  ;;  %4782 = vmatprep.subr.mxu1 %v5391_v2 }
 0x116   : > { %4742 = vmatpush3.msra.mxu0 %v3422_v26  ;;  %4783 = vmatpush3.msra.mxu1 %v3441_v27  ;;  %v541_v31 = vpop.f32.mrf.mxu0  ;;  %v644_v32 = vpop.f32.mrf.mxu1  ;;  %v3458_v26 = vld [vmem:[%s7586_s1 + $0x868] sm:$0xff] }
 0x117   : > { %4743 = vmatprep.subr.mxu0 %v5391_v2  ;;  %4784 = vmatprep.subr.mxu1 %v5391_v2  ;;  %v555_v33 = vadd.f32 %v541_v31, %v6367_v42  ;;  %v3438_v42 = vld [vmem:[%s7586_s1 + $0x7e0] sm:$0xff] }
 0x118   : > { %4694 = vmatprep.mubr.msk.f32.mxu0 %vm5392_vm0, %v5391_v2  ;;  %4744 = vmatpush3.msra.mxu0 %v3421_v28  ;;  %v4283_v35 = vpop.f32.mrf.mxu0  ;;  %v4324_v36 = vpop.f32.mrf.mxu1 }
 0x119   : > { %4785 = vmatpush3.msra.mxu1 %v3440_v29  ;;  %4695 = vmatmul.mubr.f32.gmra.mxu0 %v6512_v30  ;;  %v6526_v38 = vadd.f32 %v644_v32, %v555_v33  ;;  %v3477_v29 = vld [vmem:[%s7586_s1 + $0x8e8] sm:$0xff]  ;;  %v3424_v32 = vld [vmem:[%s5579_s30 + $0x3c] sm:$0xff] }
 0x11a   : > { %4745 = vmatprep.subr.mxu0 %v5391_v2  ;;  %4786 = vmatprep.subr.mxu1 %v5391_v2  ;;  %v3457_v33 = vld [vmem:[%s7586_s1 + $0x860] sm:$0xff] }
 0x11b   : > { %4735 = vmatprep.mubr.msk.f32.mxu1 %vm5392_vm0, %v5391_v2  ;;  %4746 = vmatpush3.msra.mxu0 %v3420_v34  ;;  %v546_v41 = vpop.f32.mrf.mxu0  ;;  %v3476_v34 = vld [vmem:[%s7586_s1 + $0x8e0] sm:$0xff] }
 0x11c   : > { %4787 = vmatpush3.msra.mxu1 %v3439_v37  ;;  %4747 = vmatprep.subr.mxu0 %v5391_v2  ;;  %v556_v44 = vadd.f32 %v546_v41, %v6469_v10  ;;  %v3429_v10 = vld [vmem:[%s7586_s1 + $0x798] sm:$0xff]  ;;  %v3406_v35 = vld [vmem:[%s5579_s30 + $0x40] sm:$0xff] }
 0x11d   : > { %4736 = vmatmul.mubr.f32.gmra.mxu1 %v3386_v39  ;;  %4788 = vmatprep.subr.mxu1 %v5391_v2  ;;  %v4286_v45 = vpop.f32.mrf.mxu0  ;;  %v3475_v39 = vld [vmem:[%s7586_s1 + $0x8d8] sm:$0xff]  ;;  %v3425_v41 = vld [vmem:[%s5579_s30 + $0x44] sm:$0xff] }
 0x11e   : > { %4697 = vmatprep.mubr.msk.f32.mxu0 %vm5392_vm0, %v5391_v2  ;;  %4748 = vmatpush3.msra.mxu0 %v3419_v40  ;;  %v3474_v45 = vld [vmem:[%s7586_s1 + $0x8d0] sm:$0xff] }
 0x11f   : > { %4789 = vmatpush3.msra.mxu1 %v3438_v42  ;;  %4698 = vmatmul.mubr.f32.gmra.mxu0 %v6541_v43  ;;  %v649_v48 = vpop.f32.mrf.mxu1 }
 0x120   : > { %4749 = vmatprep.subr.mxu0 %v5391_v2  ;;  %4790 = vmatprep.subr.mxu1 %v5391_v2  ;;  %v6557_v50 = vadd.f32 %v649_v48, %v556_v44  ;;  %v3455_v44 = vld [vmem:[%s7586_s1 + $0x850] sm:$0xff] }
 0x121   : > { %4738 = vmatprep.mubr.msk.f32.mxu1 %vm5392_vm0, %v5391_v2  ;;  %4750 = vmatpush3.msra.mxu0 %v3418_v46  ;;  %v551_v53 = vpop.f32.mrf.mxu0  ;;  %v4327_v54 = vpop.f32.mrf.mxu1 }
 0x122   : > { %4791 = vmatpush3.msra.mxu1 %v3437_v47  ;;  %4751 = vmatprep.subr.mxu0 %v5391_v2  ;;  %v557_v55 = vadd.f32 %v551_v53, %v6491_v22  ;;  %v3478_v22 = vld [vmem:[%s7586_s1 + $0x8f0] sm:$0xff]  ;;  %v3472_v53 = vld [vmem:[%s7586_s1 + $0x8c0] sm:$0xff] }
 0x123   : > { %4739 = vmatmul.mubr.f32.gmra.mxu1 %v3387_v49  ;;  %4792 = vmatprep.subr.mxu1 %v5391_v2  ;;  %v4289_v58 = vpop.f32.mrf.mxu0  ;;  %v3454_v49 = vld [vmem:[%s7586_s1 + $0x848] sm:$0xff] }
 0x124   : > { %4752 = vmatpush3.msra.mxu0 %v3417_v51  ;;  %4793 = vmatpush3.msra.mxu1 %v3436_v52  ;;  %v3453_v52 = vld [vmem:[%s7586_s1 + $0x840] sm:$0xff] }
 0x125   : > { %4753 = vmatprep.subr.mxu0 %v5391_v2  ;;  %4794 = vmatprep.subr.mxu1 %v5391_v2  ;;  %v654_v61 = vpop.f32.mrf.mxu1 }
 0x126   : > { %4754 = vmatpush3.msra.mxu0 %v3416_v56  ;;  %4795 = vmatpush3.msra.mxu1 %v3435_v57  ;;  %v6584_v62 = vadd.f32 %v654_v61, %v557_v55  ;;  %v3452_v56 = vld [vmem:[%s7586_s1 + $0x838] sm:$0xff]  ;;  %v3450_v61 = vld [vmem:[%s7586_s1 + $0x828] sm:$0xff] }
 0x127   : > { %4755 = vmatprep.subr.mxu0 %v5391_v2  ;;  %4796 = vmatprep.subr.mxu1 %v5391_v2  ;;  %v4330_v0 = vpop.f32.mrf.mxu1  ;;  %v3471_v57 = vld [vmem:[%s7586_s1 + $0x8b8] sm:$0xff] }
 0x128   : > { %4756 = vmatpush3.msra.mxu0 %v3415_v59  ;;  %4797 = vmatpush3.msra.mxu1 %v3434_v60  ;;  %v3451_v59 = vld [vmem:[%s7586_s1 + $0x830] sm:$0xff]  ;;  %v3448_v0 = vld [vmem:[%s7586_s1 + $0x818] sm:$0xff] }
 0x129   : > { %4757 = vmatprep.subr.mxu0 %v5391_v2  ;;  %4798 = vmatprep.subr.mxu1 %v5391_v2  ;;  %v3470_v60 = vld [vmem:[%s7586_s1 + $0x8b0] sm:$0xff] }
 0x12a   : > { %4758 = vmatpush3.msra.mxu0 %v3414_v63  ;;  %4799 = vmatpush3.msra.mxu1 %v3433_v17  ;;  %v3449_v63 = vld [vmem:[%s7586_s1 + $0x820] sm:$0xff] }
 0x12b   : > { %4759 = vmatprep.subr.mxu0 %v5391_v2  ;;  %4800 = vmatprep.subr.mxu1 %v5391_v2  ;;  %v3468_v17 = vld [vmem:[%s7586_s1 + $0x8a0] sm:$0xff] }
 0x12c   : > { %4760 = vmatpush3.msra.mxu0 %v3413_v3  ;;  %4801 = vmatpush3.msra.mxu1 %v3432_v23  ;;  %v3467_v3 = vld [vmem:[%s7586_s1 + $0x898] sm:$0xff]  ;;  %v3447_v23 = vld [vmem:[%s7586_s1 + $0x810] sm:$0xff] }
 0x12d   : > { %4761 = vmatprep.subr.mxu0 %v5391_v2  ;;  %4802 = vmatprep.subr.mxu1 %v5391_v2 }
 0x12e   : > { %4762 = vmatpush3.msra.mxu0 %v3412_v4  ;;  %4803 = vmatpush3.msra.mxu1 %v3431_v5  ;;  %v3466_v4 = vld [vmem:[%s7586_s1 + $0x890] sm:$0xff]  ;;  %v3446_v5 = vld [vmem:[%s7586_s1 + $0x808] sm:$0xff] }
 0x12f   : > { %4763 = vmatprep.subr.mxu0 %v5391_v2  ;;  %4804 = vmatprep.subr.mxu1 %v5391_v2 }
 0x130   : > { %4764 = vmatpush3.msra.mxu0 %v3411_v6  ;;  %4805 = vmatpush3.msra.mxu1 %v3430_v8  ;;  %v3465_v6 = vld [vmem:[%s7586_s1 + $0x888] sm:$0xff]  ;;  %v3445_v8 = vld [vmem:[%s7586_s1 + $0x800] sm:$0xff] }
 0x131   : > { %4765 = vmatprep.subr.mxu0 %v5391_v2  ;;  %4806 = vmatprep.subr.mxu1 %v5391_v2 }
 0x132   : > { %4766 = vmatpush3.msra.mxu0 %v3410_v9  ;;  %4807 = vmatpush3.msra.mxu1 %v3429_v10  ;;  %v3464_v9 = vld [vmem:[%s7586_s1 + $0x880] sm:$0xff]  ;;  %v3442_v10 = vld [vmem:[%s5579_s30 + $0x35] sm:$0xff] }
 0x133   : > { %4767 = vmatprep.subr.mxu0 %v5391_v2  ;;  %4808 = vmatprep.subr.mxu1 %v5391_v2 }
 0x134   : > { %4768 = vmatpush3.msra.mxu0 %v3409_v11  ;;  %4809 = vmatpush3.msra.mxu1 %v3428_v12  ;;  %v3498_v11 = vld [vmem:[%s7586_s1 + $0x978] sm:$0xff] }
 0x135   : > { %4769 = vmatprep.subr.mxu0 %v5391_v2  ;;  %4810 = vmatprep.subr.mxu1 %v5391_v2  ;;  %v3517_v12 = vld [vmem:[%s7586_s1 + $0x9f8] sm:$0xff] }
 0x136   : > { %4770 = vmatpush3.msra.mxu0 %v3408_v13  ;;  %4811 = vmatpush3.msra.mxu1 %v3427_v14  ;;  %v3497_v13 = vld [vmem:[%s7586_s1 + $0x970] sm:$0xff] }
 0x137   : > { %4771 = vmatprep.subr.mxu0 %v5391_v2  ;;  %4812 = vmatprep.subr.mxu1 %v5391_v2  ;;  %v3516_v14 = vld [vmem:[%s7586_s1 + $0x9f0] sm:$0xff] }
 0x138   : > { %4772 = vmatpush3.msra.mxu0 %v3407_v15  ;;  %4773 = vmatprep.mubr.msk.f32.mxu0 %vm5392_vm0, %v5391_v2  ;;  %v3443_v15 = vld [vmem:[%s5579_s30 + $0x3d] sm:$0xff] }
 0x139   : > { %4813 = vmatpush3.msra.mxu1 %v3426_v16  ;;  %4814 = vmatprep.mubr.msk.f32.mxu1 %vm5392_vm0, %v5391_v2 }
 0x13a   : > { %4774 = vmatmul.mubr.f32.vlgmr.msra.gmra.mxu0 %v6221_v1  ;;  %4815 = vmatmul.mubr.f32.vlgmr.msra.gmra.mxu1 %v3423_v18 }
 0x13b   : > { %4823 = vmatprep.subr.mxu0 %v5391_v2  ;;  %4864 = vmatprep.subr.mxu1 %v5391_v2 }
 0x13c   : > { %4824 = vmatpush3.msra.mxu0 %v3460_v19  ;;  %4865 = vmatpush3.msra.mxu1 %v3479_v20  ;;  %v747_v24 = vpop.f32.mrf.mxu0  ;;  %v850_v25 = vpop.f32.mrf.mxu1  ;;  %v3496_v19 = vld [vmem:[%s7586_s1 + $0x968] sm:$0xff] }
 0x13d   : > { %4825 = vmatprep.subr.mxu0 %v5391_v2  ;;  %4866 = vmatprep.subr.mxu1 %v5391_v2  ;;  %v761_v1 = vadd.f32 %v747_v24, %v6526_v38  ;;  %v3456_v38 = vld [vmem:[%s7586_s1 + $0x858] sm:$0xff] }
 0x13e   : > { %4776 = vmatprep.mubr.msk.f32.mxu0 %vm5392_vm0, %v5391_v2  ;;  %4826 = vmatpush3.msra.mxu0 %v3459_v21  ;;  %v4365_v27 = vpop.f32.mrf.mxu0  ;;  %v4406_v28 = vpop.f32.mrf.mxu1 }
 0x13f   : > { %4867 = vmatpush3.msra.mxu1 %v3478_v22  ;;  %4777 = vmatmul.mubr.f32.gmra.mxu0 %v6246_v7  ;;  %v6684_v31 = vadd.f32 %v850_v25, %v761_v1  ;;  %v3515_v22 = vld [vmem:[%s7586_s1 + $0x9e8] sm:$0xff]  ;;  %v3495_v25 = vld [vmem:[%s7586_s1 + $0x960] sm:$0xff] }
 0x140   : > { %4827 = vmatprep.subr.mxu0 %v5391_v2  ;;  %4868 = vmatprep.subr.mxu1 %v5391_v2  ;;  %v3444_v27 = vld [vmem:[%s5579_s30 + $0x45] sm:$0xff] }
 0x141   : > { %4817 = vmatprep.mubr.msk.f32.mxu1 %vm5392_vm0, %v5391_v2  ;;  %4828 = vmatpush3.msra.mxu0 %v3458_v26  ;;  %v752_v7 = vpop.f32.mrf.mxu0  ;;  %v3514_v26 = vld [vmem:[%s7586_s1 + $0x9e0] sm:$0xff] }
 0x142   : > { %4869 = vmatpush3.msra.mxu1 %v3477_v29  ;;  %4829 = vmatprep.subr.mxu0 %v5391_v2  ;;  %v762_v36 = vadd.f32 %v752_v7, %v6557_v50  ;;  %v3473_v50 = vld [vmem:[%s7586_s1 + $0x8c8] sm:$0xff] }
 0x143   : > { %4818 = vmatmul.mubr.f32.gmra.mxu1 %v3424_v32  ;;  %4870 = vmatprep.subr.mxu1 %v5391_v2  ;;  %v4368_v37 = vpop.f32.mrf.mxu0  ;;  %v3513_v32 = vld [vmem:[%s7586_s1 + $0x9d8] sm:$0xff] }
 0x144   : > { %4779 = vmatprep.mubr.msk.f32.mxu0 %vm5392_vm0, %v5391_v2  ;;  %4830 = vmatpush3.msra.mxu0 %v3457_v33 }
 0x145   : > { %4871 = vmatpush3.msra.mxu1 %v3476_v34  ;;  %4780 = vmatmul.mubr.f32.gmra.mxu0 %v3406_v35  ;;  %v855_v40 = vpop.f32.mrf.mxu1  ;;  %v3493_v34 = vld [vmem:[%s7586_s1 + $0x950] sm:$0xff] }
 0x146   : > { %4831 = vmatprep.subr.mxu0 %v5391_v2  ;;  %4872 = vmatprep.subr.mxu1 %v5391_v2  ;;  %v6712_v42 = vadd.f32 %v855_v40, %v762_v36  ;;  %v3512_v35 = vld [vmem:[%s7586_s1 + $0x9d0] sm:$0xff]  ;;  %v3511_v40 = vld [vmem:[%s7586_s1 + $0x9c8] sm:$0xff] }
 0x147   : > { %4820 = vmatprep.mubr.msk.f32.mxu1 %vm5392_vm0, %v5391_v2  ;;  %4832 = vmatpush3.msra.mxu0 %v3456_v38  ;;  %v757_v46 = vpop.f32.mrf.mxu0  ;;  %v4409_v47 = vpop.f32.mrf.mxu1 }
 0x148   : > { %4873 = vmatpush3.msra.mxu1 %v3475_v39  ;;  %4833 = vmatprep.subr.mxu0 %v5391_v2  ;;  %v763_v48 = vadd.f32 %v757_v46, %v6584_v62  ;;  %v3469_v62 = vld [vmem:[%s7586_s1 + $0x8a8] sm:$0xff]  ;;  %v3490_v47 = vld [vmem:[%s7586_s1 + $0x938] sm:$0xff] }
 0x149   : > { %4821 = vmatmul.mubr.f32.gmra.mxu1 %v3425_v41  ;;  %4874 = vmatprep.subr.mxu1 %v5391_v2  ;;  %v4371_v51 = vpop.f32.mrf.mxu0  ;;  %v3492_v39 = vld [vmem:[%s7586_s1 + $0x948] sm:$0xff] }
 0x14a   : > { %4834 = vmatpush3.msra.mxu0 %v3455_v44  ;;  %4875 = vmatpush3.msra.mxu1 %v3474_v45  ;;  %v3510_v44 = vld [vmem:[%s7586_s1 + $0x9c0] sm:$0xff]  ;;  %v3508_v51 = vld [vmem:[%s7586_s1 + $0x9b0] sm:$0xff] }
 0x14b   : > { %4835 = vmatprep.subr.mxu0 %v5391_v2  ;;  %4876 = vmatprep.subr.mxu1 %v5391_v2  ;;  %v860_v54 = vpop.f32.mrf.mxu1 }
 0x14c   : > { %4836 = vmatpush3.msra.mxu0 %v3454_v49  ;;  %4877 = vmatpush3.msra.mxu1 %v3473_v50  ;;  %v6739_v55 = vadd.f32 %v860_v54, %v763_v48  ;;  %v3509_v48 = vld [vmem:[%s7586_s1 + $0x9b8] sm:$0xff]  ;;  %v3489_v50 = vld [vmem:[%s7586_s1 + $0x930] sm:$0xff]  ;;  %v3487_v54 = vld [vmem:[%s7586_s1 + $0x920] sm:$0xff] }
 0x14d   : > { %4837 = vmatprep.subr.mxu0 %v5391_v2  ;;  %4878 = vmatprep.subr.mxu1 %v5391_v2  ;;  %v4412_v58 = vpop.f32.mrf.mxu1 }
 0x14e   : > { %4838 = vmatpush3.msra.mxu0 %v3453_v52  ;;  %4879 = vmatpush3.msra.mxu1 %v3472_v53  ;;  %v3488_v52 = vld [vmem:[%s7586_s1 + $0x928] sm:$0xff]  ;;  %v3485_v58 = vld [vmem:[%s7586_s1 + $0x910] sm:$0xff] }
 0x14f   : > { %4839 = vmatprep.subr.mxu0 %v5391_v2  ;;  %4880 = vmatprep.subr.mxu1 %v5391_v2  ;;  %v3507_v53 = vld [vmem:[%s7586_s1 + $0x9a8] sm:$0xff] }
 0x150   : > { %4840 = vmatpush3.msra.mxu0 %v3452_v56  ;;  %4881 = vmatpush3.msra.mxu1 %v3471_v57  ;;  %v3486_v56 = vld [vmem:[%s7586_s1 + $0x918] sm:$0xff] }
 0x151   : > { %4841 = vmatprep.subr.mxu0 %v5391_v2  ;;  %4882 = vmatprep.subr.mxu1 %v5391_v2  ;;  %v3505_v57 = vld [vmem:[%s7586_s1 + $0x998] sm:$0xff] }
 0x152   : > { %4842 = vmatpush3.msra.mxu0 %v3451_v59  ;;  %4883 = vmatpush3.msra.mxu1 %v3470_v60  ;;  %v3504_v59 = vld [vmem:[%s7586_s1 + $0x990] sm:$0xff]  ;;  %v3484_v60 = vld [vmem:[%s7586_s1 + $0x908] sm:$0xff] }
 0x153   : > { %4843 = vmatprep.subr.mxu0 %v5391_v2  ;;  %4884 = vmatprep.subr.mxu1 %v5391_v2 }
 0x154   : > { %4844 = vmatpush3.msra.mxu0 %v3450_v61  ;;  %4885 = vmatpush3.msra.mxu1 %v3469_v62  ;;  %v3503_v61 = vld [vmem:[%s7586_s1 + $0x988] sm:$0xff]  ;;  %v3483_v62 = vld [vmem:[%s7586_s1 + $0x900] sm:$0xff] }
 0x155   : > { %4845 = vmatprep.subr.mxu0 %v5391_v2  ;;  %4886 = vmatprep.subr.mxu1 %v5391_v2 }
 0x156   : > { %4846 = vmatpush3.msra.mxu0 %v3449_v63  ;;  %4887 = vmatpush3.msra.mxu1 %v3468_v17  ;;  %v3502_v63 = vld [vmem:[%s7586_s1 + $0x980] sm:$0xff]  ;;  %v3480_v17 = vld [vmem:[%s5579_s30 + $0x50] sm:$0xff] }
 0x157   : > { %4847 = vmatprep.subr.mxu0 %v5391_v2  ;;  %4888 = vmatprep.subr.mxu1 %v5391_v2 }
 0x158   : > { %4848 = vmatpush3.msra.mxu0 %v3448_v0  ;;  %4889 = vmatpush3.msra.mxu1 %v3467_v3  ;;  %v3499_v0 = vld [vmem:[%s5579_s30 + $0x51] sm:$0xff] }
 0x159   : > { %4849 = vmatprep.subr.mxu0 %v5391_v2  ;;  %4890 = vmatprep.subr.mxu1 %v5391_v2  ;;  %v3536_v3 = vld [vmem:[%s7586_s1 + $0xa78] sm:$0xff] }
 0x15a   : > { %4850 = vmatpush3.msra.mxu0 %v3447_v23  ;;  %4891 = vmatpush3.msra.mxu1 %v3466_v4  ;;  %v3555_v23 = vld [vmem:[%s7586_s1 + $0xaf8] sm:$0xff]  ;;  %v3535_v4 = vld [vmem:[%s7586_s1 + $0xa70] sm:$0xff] }
 0x15b   : > { %4851 = vmatprep.subr.mxu0 %v5391_v2  ;;  %4892 = vmatprep.subr.mxu1 %v5391_v2 }
 0x15c   : > { %4852 = vmatpush3.msra.mxu0 %v3446_v5  ;;  %4893 = vmatpush3.msra.mxu1 %v3465_v6  ;;  %v3554_v5 = vld [vmem:[%s7586_s1 + $0xaf0] sm:$0xff]  ;;  %v6983_v6 = vld [vmem:[%s5579_s30 + $0x58] sm:$0xff] }
 0x15d   : > { %4853 = vmatprep.subr.mxu0 %v5391_v2  ;;  %4894 = vmatprep.subr.mxu1 %v5391_v2 }
 0x15e   : > { %4854 = vmatpush3.msra.mxu0 %v3445_v8  ;;  %4855 = vmatprep.mubr.msk.f32.mxu0 %vm5392_vm0, %v5391_v2 }
 0x15f   : > { %4895 = vmatpush3.msra.mxu1 %v3464_v9  ;;  %4896 = vmatprep.mubr.msk.f32.mxu1 %vm5392_vm0, %v5391_v2 }
 0x160   : > { %4856 = vmatmul.mubr.f32.vlgmr.msra.gmra.mxu0 %v3442_v10  ;;  %4897 = vmatmul.mubr.f32.vlgmr.msra.gmra.mxu1 %v6512_v30 }
 0x161   : > { %4905 = vmatprep.subr.mxu0 %v5391_v2  ;;  %4946 = vmatprep.subr.mxu1 %v5391_v2 }
 0x162   : > { %4906 = vmatpush3.msra.mxu0 %v3498_v11  ;;  %4947 = vmatpush3.msra.mxu1 %v3517_v12  ;;  %v953_v16 = vpop.f32.mrf.mxu0  ;;  %v1056_v18 = vpop.f32.mrf.mxu1  ;;  %v3534_v11 = vld [vmem:[%s7586_s1 + $0xa68] sm:$0xff] }
 0x163   : > { %4907 = vmatprep.subr.mxu0 %v5391_v2  ;;  %4948 = vmatprep.subr.mxu1 %v5391_v2  ;;  %v967_v30 = vadd.f32 %v953_v16, %v6684_v31  ;;  %v3494_v31 = vld [vmem:[%s7586_s1 + $0x958] sm:$0xff] }
 0x164   : > { %4858 = vmatprep.mubr.msk.f32.mxu0 %vm5392_vm0, %v5391_v2  ;;  %4908 = vmatpush3.msra.mxu0 %v3497_v13  ;;  %v4447_v20 = vpop.f32.mrf.mxu0  ;;  %v4488_v21 = vpop.f32.mrf.mxu1  ;;  %v3500_v16 = vld [vmem:[%s5579_s30 + $0x59] sm:$0xff] }
 0x165   : > { %4949 = vmatpush3.msra.mxu1 %v3516_v14  ;;  %4859 = vmatmul.mubr.f32.gmra.mxu0 %v3443_v15  ;;  %v6839_v24 = vadd.f32 %v1056_v18, %v967_v30  ;;  %v3553_v14 = vld [vmem:[%s7586_s1 + $0xae8] sm:$0xff]  ;;  %v3533_v18 = vld [vmem:[%s7586_s1 + $0xa60] sm:$0xff] }
 0x166   : > { %4909 = vmatprep.subr.mxu0 %v5391_v2  ;;  %4950 = vmatprep.subr.mxu1 %v5391_v2  ;;  %v7012_v20 = vld [vmem:[%s5579_s30 + $0x60] sm:$0xff] }
 0x167   : > { %4899 = vmatprep.mubr.msk.f32.mxu1 %vm5392_vm0, %v5391_v2  ;;  %4910 = vmatpush3.msra.mxu0 %v3496_v19  ;;  %v958_v1 = vpop.f32.mrf.mxu0  ;;  %v3552_v19 = vld [vmem:[%s7586_s1 + $0xae0] sm:$0xff] }
 0x168   : > { %4951 = vmatpush3.msra.mxu1 %v3515_v22  ;;  %4911 = vmatprep.subr.mxu0 %v5391_v2  ;;  %v968_v28 = vadd.f32 %v958_v1, %v6712_v42  ;;  %v3491_v42 = vld [vmem:[%s7586_s1 + $0x940] sm:$0xff] }
 0x169   : > { %4900 = vmatmul.mubr.f32.gmra.mxu1 %v6541_v43  ;;  %4952 = vmatprep.subr.mxu1 %v5391_v2  ;;  %v4450_v29 = vpop.f32.mrf.mxu0  ;;  %v3463_v43 = vld [vmem:[%s5579_s30 + $0x46] sm:$0xff] }
 0x16a   : > { %4861 = vmatprep.mubr.msk.f32.mxu0 %vm5392_vm0, %v5391_v2  ;;  %4912 = vmatpush3.msra.mxu0 %v3495_v25  ;;  %v3551_v25 = vld [vmem:[%s7586_s1 + $0xad8] sm:$0xff]  ;;  %v3550_v29 = vld [vmem:[%s7586_s1 + $0xad0] sm:$0xff] }
 0x16b   : > { %4953 = vmatpush3.msra.mxu1 %v3514_v26  ;;  %4862 = vmatmul.mubr.f32.gmra.mxu0 %v3444_v27  ;;  %v1061_v33 = vpop.f32.mrf.mxu1  ;;  %v3501_v26 = vld [vmem:[%s5579_s30 + $0x61] sm:$0xff] }
 0x16c   : > { %4913 = vmatprep.subr.mxu0 %v5391_v2  ;;  %4954 = vmatprep.subr.mxu1 %v5391_v2  ;;  %v6867_v7 = vadd.f32 %v1061_v33, %v968_v28  ;;  %v3531_v28 = vld [vmem:[%s7586_s1 + $0xa50] sm:$0xff] }
 0x16d   : > { %4902 = vmatprep.mubr.msk.f32.mxu1 %vm5392_vm0, %v5391_v2  ;;  %4914 = vmatpush3.msra.mxu0 %v3494_v31  ;;  %v963_v36 = vpop.f32.mrf.mxu0  ;;  %v4491_v37 = vpop.f32.mrf.mxu1 }
 0x16e   : > { %4955 = vmatpush3.msra.mxu1 %v3513_v32  ;;  %4915 = vmatprep.subr.mxu0 %v5391_v2  ;;  %v969_v38 = vadd.f32 %v963_v36, %v6739_v55  ;;  %v3506_v55 = vld [vmem:[%s7586_s1 + $0x9a0] sm:$0xff] }
 0x16f   : > { %4903 = vmatmul.mubr.f32.gmra.mxu1 %v3463_v43  ;;  %4956 = vmatprep.subr.mxu1 %v5391_v2  ;;  %v4453_v41 = vpop.f32.mrf.mxu0  ;;  %v3530_v43 = vld [vmem:[%s7586_s1 + $0xa48] sm:$0xff]  ;;  %v3548_v36 = vld [vmem:[%s7586_s1 + $0xac0] sm:$0xff] }
 0x170   : > { %4916 = vmatpush3.msra.mxu0 %v3493_v34  ;;  %4957 = vmatpush3.msra.mxu1 %v3512_v35  ;;  %v3529_v35 = vld [vmem:[%s7586_s1 + $0xa40] sm:$0xff] }
 0x171   : > { %4917 = vmatprep.subr.mxu0 %v5391_v2  ;;  %4958 = vmatprep.subr.mxu1 %v5391_v2  ;;  %v1066_v45 = vpop.f32.mrf.mxu1 }
 0x172   : > { %4918 = vmatpush3.msra.mxu0 %v3492_v39  ;;  %4959 = vmatpush3.msra.mxu1 %v3511_v40  ;;  %v6894_v46 = vadd.f32 %v1066_v45, %v969_v38  ;;  %v3528_v39 = vld [vmem:[%s7586_s1 + $0xa38] sm:$0xff]  ;;  %v3526_v45 = vld [vmem:[%s7586_s1 + $0xa28] sm:$0xff] }
 0x173   : > { %4919 = vmatprep.subr.mxu0 %v5391_v2  ;;  %4960 = vmatprep.subr.mxu1 %v5391_v2  ;;  %v4494_v49 = vpop.f32.mrf.mxu1  ;;  %v3547_v40 = vld [vmem:[%s7586_s1 + $0xab8] sm:$0xff] }
 0x174   : > { %4920 = vmatpush3.msra.mxu0 %v3491_v42  ;;  %4961 = vmatpush3.msra.mxu1 %v3510_v44  ;;  %v3527_v42 = vld [vmem:[%s7586_s1 + $0xa30] sm:$0xff]  ;;  %v3524_v49 = vld [vmem:[%s7586_s1 + $0xa18] sm:$0xff] }
 0x175   : > { %4921 = vmatprep.subr.mxu0 %v5391_v2  ;;  %4962 = vmatprep.subr.mxu1 %v5391_v2  ;;  %v3546_v44 = vld [vmem:[%s7586_s1 + $0xab0] sm:$0xff] }
 0x176   : > { %4922 = vmatpush3.msra.mxu0 %v3490_v47  ;;  %4963 = vmatpush3.msra.mxu1 %v3509_v48  ;;  %v3525_v47 = vld [vmem:[%s7586_s1 + $0xa20] sm:$0xff] }
 0x177   : > { %4923 = vmatprep.subr.mxu0 %v5391_v2  ;;  %4964 = vmatprep.subr.mxu1 %v5391_v2  ;;  %v3544_v48 = vld [vmem:[%s7586_s1 + $0xaa0] sm:$0xff] }
 0x178   : > { %4924 = vmatpush3.msra.mxu0 %v3489_v50  ;;  %4965 = vmatpush3.msra.mxu1 %v3508_v51  ;;  %v3543_v50 = vld [vmem:[%s7586_s1 + $0xa98] sm:$0xff]  ;;  %v3523_v51 = vld [vmem:[%s7586_s1 + $0xa10] sm:$0xff] }
 0x179   : > { %4925 = vmatprep.subr.mxu0 %v5391_v2  ;;  %4966 = vmatprep.subr.mxu1 %v5391_v2 }
 0x17a   : > { %4926 = vmatpush3.msra.mxu0 %v3488_v52  ;;  %4967 = vmatpush3.msra.mxu1 %v3507_v53  ;;  %v3542_v52 = vld [vmem:[%s7586_s1 + $0xa90] sm:$0xff]  ;;  %v3522_v53 = vld [vmem:[%s7586_s1 + $0xa08] sm:$0xff] }
 0x17b   : > { %4927 = vmatprep.subr.mxu0 %v5391_v2  ;;  %4968 = vmatprep.subr.mxu1 %v5391_v2 }
 0x17c   : > { %4928 = vmatpush3.msra.mxu0 %v3487_v54  ;;  %4969 = vmatpush3.msra.mxu1 %v3506_v55  ;;  %v3541_v54 = vld [vmem:[%s7586_s1 + $0xa88] sm:$0xff]  ;;  %v3521_v55 = vld [vmem:[%s7586_s1 + $0xa00] sm:$0xff] }
 0x17d   : > { %4929 = vmatprep.subr.mxu0 %v5391_v2  ;;  %4970 = vmatprep.subr.mxu1 %v5391_v2 }
 0x17e   : > { %4930 = vmatpush3.msra.mxu0 %v3486_v56  ;;  %4971 = vmatpush3.msra.mxu1 %v3505_v57  ;;  %v3540_v56 = vld [vmem:[%s7586_s1 + $0xa80] sm:$0xff]  ;;  %v3518_v57 = vld [vmem:[%s5579_s30 + $0x52] sm:$0xff] }
 0x17f   : > { %4931 = vmatprep.subr.mxu0 %v5391_v2  ;;  %4972 = vmatprep.subr.mxu1 %v5391_v2 }
 0x180   : > { %4932 = vmatpush3.msra.mxu0 %v3485_v58  ;;  %4973 = vmatpush3.msra.mxu1 %v3504_v59  ;;  %v3537_v58 = vld [vmem:[%s5579_s30 + $0x56] sm:$0xff] }
 0x181   : > { %4933 = vmatprep.subr.mxu0 %v5391_v2  ;;  %4974 = vmatprep.subr.mxu1 %v5391_v2  ;;  %v3574_v59 = vld [vmem:[%s7586_s1 + $0xb78] sm:$0xff] }
 0x182   : > { %4934 = vmatpush3.msra.mxu0 %v3484_v60  ;;  %4975 = vmatpush3.msra.mxu1 %v3503_v61  ;;  %v3593_v60 = vld [vmem:[%s7586_s1 + $0xbf8] sm:$0xff]  ;;  %v3573_v61 = vld [vmem:[%s7586_s1 + $0xb70] sm:$0xff] }
 0x183   : > { %4935 = vmatprep.subr.mxu0 %v5391_v2  ;;  %4976 = vmatprep.subr.mxu1 %v5391_v2 }
 0x184   : > { %4936 = vmatpush3.msra.mxu0 %v3483_v62  ;;  %4937 = vmatprep.mubr.msk.f32.mxu0 %vm5392_vm0, %v5391_v2  ;;  %v3592_v62 = vld [vmem:[%s7586_s1 + $0xbf0] sm:$0xff] }
 0x185   : > { %4977 = vmatpush3.msra.mxu1 %v3502_v63  ;;  %4978 = vmatprep.mubr.msk.f32.mxu1 %vm5392_vm0, %v5391_v2  ;;  %v3519_v63 = vld [vmem:[%s5579_s30 + $0x5a] sm:$0xff] }
 0x186   : > { %4938 = vmatmul.mubr.f32.vlgmr.msra.gmra.mxu0 %v3480_v17  ;;  %4979 = vmatmul.mubr.f32.vlgmr.msra.gmra.mxu1 %v3499_v0 }
 0x187   : > { %4987 = vmatprep.subr.mxu0 %v5391_v2  ;;  %5028 = vmatprep.subr.mxu1 %v5391_v2 }
 0x188   : > { %4988 = vmatpush3.msra.mxu0 %v3536_v3  ;;  %5029 = vmatpush3.msra.mxu1 %v3555_v23  ;;  %v1159_v8 = vpop.f32.mrf.mxu0  ;;  %v1265_v9 = vpop.f32.mrf.mxu1  ;;  %v3572_v23 = vld [vmem:[%s7586_s1 + $0xb68] sm:$0xff] }
 0x189   : > { %4989 = vmatprep.subr.mxu0 %v5391_v2  ;;  %5030 = vmatprep.subr.mxu1 %v5391_v2  ;;  %v1173_v10 = vadd.f32 %v1159_v8, %v6839_v24  ;;  %v3532_v24 = vld [vmem:[%s7586_s1 + $0xa58] sm:$0xff]  ;;  %v3591_v8 = vld [vmem:[%s7586_s1 + $0xbe8] sm:$0xff] }
 0x18a   : > { %4940 = vmatprep.mubr.msk.f32.mxu0 %vm5392_vm0, %v5391_v2  ;;  %4990 = vmatpush3.msra.mxu0 %v3535_v4  ;;  %v4529_v12 = vpop.f32.mrf.mxu0  ;;  %v4570_v13 = vpop.f32.mrf.mxu1 }
 0x18b   : > { %5031 = vmatpush3.msra.mxu1 %v3554_v5  ;;  %4941 = vmatmul.mubr.f32.gmra.mxu0 %v6983_v6  ;;  %v6997_v15 = vadd.f32 %v1265_v9, %v1173_v10  ;;  %v7160_v10 = vld [vmem:[%s5579_s30 + $0x5e] sm:$0xff] }
 0x18c   : > { %4991 = vmatprep.subr.mxu0 %v5391_v2  ;;  %5032 = vmatprep.subr.mxu1 %v5391_v2  ;;  %v3590_v13 = vld [vmem:[%s7586_s1 + $0xbe0] sm:$0xff] }
 0x18d   : > { %4981 = vmatprep.mubr.msk.f32.mxu1 %vm5392_vm0, %v5391_v2  ;;  %4992 = vmatpush3.msra.mxu0 %v3534_v11  ;;  %v1164_v30 = vpop.f32.mrf.mxu0  ;;  %v3571_v11 = vld [vmem:[%s7586_s1 + $0xb60] sm:$0xff] }
 0x18e   : > { %5033 = vmatpush3.msra.mxu1 %v3553_v14  ;;  %4993 = vmatprep.subr.mxu0 %v5391_v2  ;;  %v1174_v21 = vadd.f32 %v1164_v30, %v6867_v7  ;;  %v3549_v7 = vld [vmem:[%s7586_s1 + $0xac8] sm:$0xff]  ;;  %v3589_v30 = vld [vmem:[%s7586_s1 + $0xbd8] sm:$0xff] }
 0x18f   : > { %4982 = vmatmul.mubr.f32.gmra.mxu1 %v3500_v16  ;;  %5034 = vmatprep.subr.mxu1 %v5391_v2  ;;  %v4532_v22 = vpop.f32.mrf.mxu0  ;;  %v3520_v14 = vld [vmem:[%s5579_s30 + $0x62] sm:$0xff] }
 0x190   : > { %4943 = vmatprep.mubr.msk.f32.mxu0 %vm5392_vm0, %v5391_v2  ;;  %4994 = vmatpush3.msra.mxu0 %v3533_v18  ;;  %v3570_v18 = vld [vmem:[%s7586_s1 + $0xb58] sm:$0xff] }
 0x191   : > { %5035 = vmatpush3.msra.mxu1 %v3552_v19  ;;  %4944 = vmatmul.mubr.f32.gmra.mxu0 %v7012_v20  ;;  %v1270_v1 = vpop.f32.mrf.mxu1 }
 0x192   : > { %4995 = vmatprep.subr.mxu0 %v5391_v2  ;;  %5036 = vmatprep.subr.mxu1 %v5391_v2  ;;  %v7028_v27 = vadd.f32 %v1270_v1, %v1174_v21  ;;  %v7186_v21 = vld [vmem:[%s5579_s30 + $0x66] sm:$0xff] }
 0x193   : > { %4984 = vmatprep.mubr.msk.f32.mxu1 %vm5392_vm0, %v5391_v2  ;;  %4996 = vmatpush3.msra.mxu0 %v3532_v24  ;;  %v1169_v31 = vpop.f32.mrf.mxu0  ;;  %v4573_v32 = vpop.f32.mrf.mxu1  ;;  %v3569_v24 = vld [vmem:[%s7586_s1 + $0xb50] sm:$0xff] }
 0x194   : > { %5037 = vmatpush3.msra.mxu1 %v3551_v25  ;;  %4997 = vmatprep.subr.mxu0 %v5391_v2  ;;  %v1175_v33 = vadd.f32 %v1169_v31, %v6894_v46  ;;  %v3545_v46 = vld [vmem:[%s7586_s1 + $0xaa8] sm:$0xff]  ;;  %v3588_v25 = vld [vmem:[%s7586_s1 + $0xbd0] sm:$0xff]  ;;  %v3567_v32 = vld [vmem:[%s7586_s1 + $0xb40] sm:$0xff] }
 0x195   : > { %4985 = vmatmul.mubr.f32.gmra.mxu1 %v3501_v26  ;;  %5038 = vmatprep.subr.mxu1 %v5391_v2  ;;  %v4535_v34 = vpop.f32.mrf.mxu0 }
 0x196   : > { %4998 = vmatpush3.msra.mxu0 %v3531_v28  ;;  %5039 = vmatpush3.msra.mxu1 %v3550_v29  ;;  %v3568_v28 = vld [vmem:[%s7586_s1 + $0xb48] sm:$0xff]  ;;  %v3566_v34 = vld [vmem:[%s7586_s1 + $0xb38] sm:$0xff] }
 0x197   : > { %4999 = vmatprep.subr.mxu0 %v5391_v2  ;;  %5040 = vmatprep.subr.mxu1 %v5391_v2  ;;  %v1275_v37 = vpop.f32.mrf.mxu1  ;;  %v3587_v29 = vld [vmem:[%s7586_s1 + $0xbc8] sm:$0xff] }
 0x198   : > { %5000 = vmatpush3.msra.mxu0 %v3530_v43  ;;  %5041 = vmatpush3.msra.mxu1 %v3549_v7  ;;  %v7055_v38 = vadd.f32 %v1275_v37, %v1175_v33  ;;  %v3586_v33 = vld [vmem:[%s7586_s1 + $0xbc0] sm:$0xff]  ;;  %v3565_v37 = vld [vmem:[%s7586_s1 + $0xb30] sm:$0xff] }
 0x199   : > { %5001 = vmatprep.subr.mxu0 %v5391_v2  ;;  %5042 = vmatprep.subr.mxu1 %v5391_v2  ;;  %v4576_v41 = vpop.f32.mrf.mxu1 }
 0x19a   : > { %5002 = vmatpush3.msra.mxu0 %v3529_v35  ;;  %5043 = vmatpush3.msra.mxu1 %v3548_v36  ;;  %v3585_v35 = vld [vmem:[%s7586_s1 + $0xbb8] sm:$0xff]  ;;  %v3563_v41 = vld [vmem:[%s7586_s1 + $0xb20] sm:$0xff] }
 0x19b   : > { %5003 = vmatprep.subr.mxu0 %v5391_v2  ;;  %5044 = vmatprep.subr.mxu1 %v5391_v2 }
 0x19c   : > { %5004 = vmatpush3.msra.mxu0 %v3528_v39  ;;  %5045 = vmatpush3.msra.mxu1 %v3547_v40  ;;  %v3564_v39 = vld [vmem:[%s7586_s1 + $0xb28] sm:$0xff] }
 0x19d   : > { %5005 = vmatprep.subr.mxu0 %v5391_v2  ;;  %5046 = vmatprep.subr.mxu1 %v5391_v2  ;;  %v3583_v40 = vld [vmem:[%s7586_s1 + $0xba8] sm:$0xff] }
 0x19e   : > { %5006 = vmatpush3.msra.mxu0 %v3527_v42  ;;  %5047 = vmatpush3.msra.mxu1 %v3546_v44  ;;  %v3582_v42 = vld [vmem:[%s7586_s1 + $0xba0] sm:$0xff]  ;;  %v3562_v44 = vld [vmem:[%s7586_s1 + $0xb18] sm:$0xff] }
 0x19f   : > { %5007 = vmatprep.subr.mxu0 %v5391_v2  ;;  %5048 = vmatprep.subr.mxu1 %v5391_v2 }
 0x1a0   : > { %5008 = vmatpush3.msra.mxu0 %v3526_v45  ;;  %5049 = vmatpush3.msra.mxu1 %v3545_v46  ;;  %v3581_v45 = vld [vmem:[%s7586_s1 + $0xb98] sm:$0xff]  ;;  %v3561_v46 = vld [vmem:[%s7586_s1 + $0xb10] sm:$0xff] }
 0x1a1   : > { %5009 = vmatprep.subr.mxu0 %v5391_v2  ;;  %5050 = vmatprep.subr.mxu1 %v5391_v2 }
 0x1a2   : > { %5010 = vmatpush3.msra.mxu0 %v3525_v47  ;;  %5051 = vmatpush3.msra.mxu1 %v3544_v48  ;;  %v3580_v47 = vld [vmem:[%s7586_s1 + $0xb90] sm:$0xff]  ;;  %v3560_v48 = vld [vmem:[%s7586_s1 + $0xb08] sm:$0xff] }
 0x1a3   : > { %5011 = vmatprep.subr.mxu0 %v5391_v2  ;;  %5052 = vmatprep.subr.mxu1 %v5391_v2 }
 0x1a4   : > { %5012 = vmatpush3.msra.mxu0 %v3524_v49  ;;  %5053 = vmatpush3.msra.mxu1 %v3543_v50  ;;  %v3579_v49 = vld [vmem:[%s7586_s1 + $0xb88] sm:$0xff]  ;;  %v3559_v50 = vld [vmem:[%s7586_s1 + $0xb00] sm:$0xff] }
 0x1a5   : > { %5013 = vmatprep.subr.mxu0 %v5391_v2  ;;  %5054 = vmatprep.subr.mxu1 %v5391_v2 }
 0x1a6   : > { %5014 = vmatpush3.msra.mxu0 %v3523_v51  ;;  %5055 = vmatpush3.msra.mxu1 %v3542_v52  ;;  %v3578_v51 = vld [vmem:[%s7586_s1 + $0xb80] sm:$0xff]  ;;  %v3556_v52 = vld [vmem:[%s5579_s30 + $0x57] sm:$0xff] }
 0x1a7   : > { %5015 = vmatprep.subr.mxu0 %v5391_v2  ;;  %5056 = vmatprep.subr.mxu1 %v5391_v2 }
 0x1a8   : > { %5016 = vmatpush3.msra.mxu0 %v3522_v53  ;;  %5057 = vmatpush3.msra.mxu1 %v3541_v54  ;;  %v3612_v53 = vld [vmem:[%s7586_s1 + $0xc78] sm:$0xff] }
 0x1a9   : > { %5017 = vmatprep.subr.mxu0 %v5391_v2  ;;  %5058 = vmatprep.subr.mxu1 %v5391_v2  ;;  %v3631_v54 = vld [vmem:[%s7586_s1 + $0xcf8] sm:$0xff] }
 0x1aa   : > { %5018 = vmatpush3.msra.mxu0 %v3521_v55  ;;  %5019 = vmatprep.mubr.msk.f32.mxu0 %vm5392_vm0, %v5391_v2  ;;  %v3611_v55 = vld [vmem:[%s7586_s1 + $0xc70] sm:$0xff] }
 0x1ab   : > { %5059 = vmatpush3.msra.mxu1 %v3540_v56  ;;  %5060 = vmatprep.mubr.msk.f32.mxu1 %vm5392_vm0, %v5391_v2  ;;  %v3630_v56 = vld [vmem:[%s7586_s1 + $0xcf0] sm:$0xff] }
 0x1ac   : > { %5020 = vmatmul.mubr.f32.vlgmr.msra.gmra.mxu0 %v3518_v57  ;;  %5061 = vmatmul.mubr.f32.vlgmr.msra.gmra.mxu1 %v3537_v58  ;;  %v3557_v57 = vld [vmem:[%s5579_s30 + $0x5f] sm:$0xff] }
 0x1ad   : > { %5069 = vmatprep.subr.mxu0 %v5391_v2  ;;  %5110 = vmatprep.subr.mxu1 %v5391_v2 }
 0x1ae   : > { %5070 = vmatpush3.msra.mxu0 %v3574_v59  ;;  %5111 = vmatpush3.msra.mxu1 %v3593_v60  ;;  %v1368_v17 = vpop.f32.mrf.mxu0  ;;  %v1471_v0 = vpop.f32.mrf.mxu1  ;;  %v3610_v60 = vld [vmem:[%s7586_s1 + $0xc68] sm:$0xff] }
 0x1af   : > { %5071 = vmatprep.subr.mxu0 %v5391_v2  ;;  %5112 = vmatprep.subr.mxu1 %v5391_v2  ;;  %v1382_v3 = vadd.f32 %v1368_v17, %v6997_v15 }
 0x1b0   : > { %5022 = vmatprep.mubr.msk.f32.mxu0 %vm5392_vm0, %v5391_v2  ;;  %5072 = vmatpush3.msra.mxu0 %v3573_v61  ;;  %v4611_v4 = vpop.f32.mrf.mxu0  ;;  %v4652_v5 = vpop.f32.mrf.mxu1 }
 0x1b1   : > { %5113 = vmatpush3.msra.mxu1 %v3592_v62  ;;  %5023 = vmatmul.mubr.f32.gmra.mxu0 %v3519_v63  ;;  %v7155_v9 = vadd.f32 %v1471_v0, %v1382_v3  ;;  %v3629_v63 = vld [vmem:[%s7586_s1 + $0xce8] sm:$0xff]  ;;  %v3609_v0 = vld [vmem:[%s7586_s1 + $0xc60] sm:$0xff] }
 0x1b2   : > { %5073 = vmatprep.subr.mxu0 %v5391_v2  ;;  %5114 = vmatprep.subr.mxu1 %v5391_v2  ;;  %v3558_v4 = vld [vmem:[%s5579_s30 + $0x67] sm:$0xff] }
 0x1b3   : > { %5063 = vmatprep.mubr.msk.f32.mxu1 %vm5392_vm0, %v5391_v2  ;;  %5074 = vmatpush3.msra.mxu0 %v3572_v23  ;;  %v1373_v12 = vpop.f32.mrf.mxu0  ;;  %v3628_v23 = vld [vmem:[%s7586_s1 + $0xce0] sm:$0xff] }
 0x1b4   : > { %5115 = vmatpush3.msra.mxu1 %v3591_v8  ;;  %5075 = vmatprep.subr.mxu0 %v5391_v2  ;;  %v1383_v15 = vadd.f32 %v1373_v12, %v7028_v27 }
 0x1b5   : > { %5064 = vmatmul.mubr.f32.gmra.mxu1 %v7160_v10  ;;  %5116 = vmatprep.subr.mxu1 %v5391_v2  ;;  %v4614_v16 = vpop.f32.mrf.mxu0 }
 0x1b6   : > { %5025 = vmatprep.mubr.msk.f32.mxu0 %vm5392_vm0, %v5391_v2  ;;  %5076 = vmatpush3.msra.mxu0 %v3571_v11  ;;  %v3627_v11 = vld [vmem:[%s7586_s1 + $0xcd8] sm:$0xff] }
 0x1b7   : > { %5117 = vmatpush3.msra.mxu1 %v3590_v13  ;;  %5026 = vmatmul.mubr.f32.gmra.mxu0 %v3520_v14  ;;  %v1476_v19 = vpop.f32.mrf.mxu1  ;;  %v3607_v14 = vld [vmem:[%s7586_s1 + $0xc50] sm:$0xff] }
 0x1b8   : > { %5077 = vmatprep.subr.mxu0 %v5391_v2  ;;  %5118 = vmatprep.subr.mxu1 %v5391_v2  ;;  %v7188_v22 = vadd.f32 %v1476_v19, %v1383_v15  ;;  %v3626_v15 = vld [vmem:[%s7586_s1 + $0xcd0] sm:$0xff]  ;;  %v3606_v19 = vld [vmem:[%s7586_s1 + $0xc48] sm:$0xff] }
 0x1b9   : > { %5066 = vmatprep.mubr.msk.f32.mxu1 %vm5392_vm0, %v5391_v2  ;;  %5078 = vmatpush3.msra.mxu0 %v3570_v18  ;;  %v1378_v1 = vpop.f32.mrf.mxu0  ;;  %v4655_v26 = vpop.f32.mrf.mxu1 }
 0x1ba   : > { %5119 = vmatpush3.msra.mxu1 %v3589_v30  ;;  %5079 = vmatprep.subr.mxu0 %v5391_v2  ;;  %v1384_v27 = vadd.f32 %v1378_v1, %v7055_v38  ;;  %v3584_v38 = vld [vmem:[%s7586_s1 + $0xbb0] sm:$0xff]  ;;  %v3624_v1 = vld [vmem:[%s7586_s1 + $0xcc0] sm:$0xff] }
 0x1bb   : > { %5067 = vmatmul.mubr.f32.gmra.mxu1 %v7186_v21  ;;  %5120 = vmatprep.subr.mxu1 %v5391_v2  ;;  %v4617_v31 = vpop.f32.mrf.mxu0 }
 0x1bc   : > { %5080 = vmatpush3.msra.mxu0 %v3569_v24  ;;  %5121 = vmatpush3.msra.mxu1 %v3588_v25  ;;  %v3605_v25 = vld [vmem:[%s7586_s1 + $0xc40] sm:$0xff] }
 0x1bd   : > { %5081 = vmatprep.subr.mxu0 %v5391_v2  ;;  %5122 = vmatprep.subr.mxu1 %v5391_v2  ;;  %v1481_v43 = vpop.f32.mrf.mxu1 }
 0x1be   : > { %5082 = vmatpush3.msra.mxu0 %v3568_v28  ;;  %5123 = vmatpush3.msra.mxu1 %v3587_v29  ;;  %v7216_v7 = vadd.f32 %v1481_v43, %v1384_v27  ;;  %v3604_v28 = vld [vmem:[%s7586_s1 + $0xc38] sm:$0xff]  ;;  %v3602_v43 = vld [vmem:[%s7586_s1 + $0xc28] sm:$0xff] }
 0x1bf   : > { %5083 = vmatprep.subr.mxu0 %v5391_v2  ;;  %5124 = vmatprep.subr.mxu1 %v5391_v2  ;;  %v4658_v36 = vpop.f32.mrf.mxu1  ;;  %v3623_v29 = vld [vmem:[%s7586_s1 + $0xcb8] sm:$0xff] }
 0x1c0   : > { %5084 = vmatpush3.msra.mxu0 %v3567_v32  ;;  %5125 = vmatpush3.msra.mxu1 %v3586_v33  ;;  %v3603_v32 = vld [vmem:[%s7586_s1 + $0xc30] sm:$0xff]  ;;  %v3600_v36 = vld [vmem:[%s7586_s1 + $0xc18] sm:$0xff] }
 0x1c1   : > { %5085 = vmatprep.subr.mxu0 %v5391_v2  ;;  %5126 = vmatprep.subr.mxu1 %v5391_v2  ;;  %v3622_v33 = vld [vmem:[%s7586_s1 + $0xcb0] sm:$0xff] }
 0x1c2   : > { %5086 = vmatpush3.msra.mxu0 %v3566_v34  ;;  %5127 = vmatpush3.msra.mxu1 %v3585_v35  ;;  %v3601_v34 = vld [vmem:[%s7586_s1 + $0xc20] sm:$0xff] }
 0x1c3   : > { %5087 = vmatprep.subr.mxu0 %v5391_v2  ;;  %5128 = vmatprep.subr.mxu1 %v5391_v2  ;;  %v3620_v35 = vld [vmem:[%s7586_s1 + $0xca0] sm:$0xff] }
 0x1c4   : > { %5088 = vmatpush3.msra.mxu0 %v3565_v37  ;;  %5129 = vmatpush3.msra.mxu1 %v3584_v38  ;;  %v3619_v37 = vld [vmem:[%s7586_s1 + $0xc98] sm:$0xff]  ;;  %v3599_v38 = vld [vmem:[%s7586_s1 + $0xc10] sm:$0xff] }
 0x1c5   : > { %5089 = vmatprep.subr.mxu0 %v5391_v2  ;;  %5130 = vmatprep.subr.mxu1 %v5391_v2 }
 0x1c6   : > { %5090 = vmatpush3.msra.mxu0 %v3564_v39  ;;  %5131 = vmatpush3.msra.mxu1 %v3583_v40  ;;  %v3618_v39 = vld [vmem:[%s7586_s1 + $0xc90] sm:$0xff]  ;;  %v3598_v40 = vld [vmem:[%s7586_s1 + $0xc08] sm:$0xff] }
 0x1c7   : > { %5091 = vmatprep.subr.mxu0 %v5391_v2  ;;  %5132 = vmatprep.subr.mxu1 %v5391_v2 }
 0x1c8   : > { %5092 = vmatpush3.msra.mxu0 %v3563_v41  ;;  %5133 = vmatpush3.msra.mxu1 %v3582_v42  ;;  %v3617_v41 = vld [vmem:[%s7586_s1 + $0xc88] sm:$0xff]  ;;  %v3597_v42 = vld [vmem:[%s7586_s1 + $0xc00] sm:$0xff] }
 0x1c9   : > { %5093 = vmatprep.subr.mxu0 %v5391_v2  ;;  %5134 = vmatprep.subr.mxu1 %v5391_v2 }
 0x1ca   : > { %5094 = vmatpush3.msra.mxu0 %v3562_v44  ;;  %5135 = vmatpush3.msra.mxu1 %v3581_v45  ;;  %v3616_v44 = vld [vmem:[%s7586_s1 + $0xc80] sm:$0xff] }
 0x1cb   : > { %5095 = vmatprep.subr.mxu0 %v5391_v2  ;;  %5136 = vmatprep.subr.mxu1 %v5391_v2  ;;  %v3594_v45 = vld [vmem:[%s5579_s30 + $0x5c] sm:$0xff] }
 0x1cc   : > { %5096 = vmatpush3.msra.mxu0 %v3561_v46  ;;  %5137 = vmatpush3.msra.mxu1 %v3580_v47  ;;  %v3613_v46 = vld [vmem:[%s5579_s30 + $0x5d] sm:$0xff] }
 0x1cd   : > { %5097 = vmatprep.subr.mxu0 %v5391_v2  ;;  %5138 = vmatprep.subr.mxu1 %v5391_v2  ;;  %v3650_v47 = vld [vmem:[%s7586_s1 + $0xd78] sm:$0xff] }
 0x1ce   : > { %5098 = vmatpush3.msra.mxu0 %v3560_v48  ;;  %5139 = vmatpush3.msra.mxu1 %v3579_v49  ;;  %v3649_v48 = vld [vmem:[%s7586_s1 + $0xd70] sm:$0xff]  ;;  %v3595_v49 = vld [vmem:[%s5579_s30 + $0x64] sm:$0xff] }
 0x1cf   : > { %5099 = vmatprep.subr.mxu0 %v5391_v2  ;;  %5140 = vmatprep.subr.mxu1 %v5391_v2 }
 0x1d0   : > { %5100 = vmatpush3.msra.mxu0 %v3559_v50  ;;  %5101 = vmatprep.mubr.msk.f32.mxu0 %vm5392_vm0, %v5391_v2 }
 0x1d1   : > { %5141 = vmatpush3.msra.mxu1 %v3578_v51  ;;  %5142 = vmatprep.mubr.msk.f32.mxu1 %vm5392_vm0, %v5391_v2 }
 0x1d2   : > { %5102 = vmatmul.mubr.f32.vlgmr.msra.gmra.mxu0 %v3556_v52  ;;  %5143 = vmatmul.mubr.f32.vlgmr.msra.gmra.mxu1 %v6983_v6 }
 0x1d3   : > { %5151 = vmatprep.subr.mxu0 %v5391_v2  ;;  %5192 = vmatprep.subr.mxu1 %v5391_v2 }
 0x1d4   : > { %5152 = vmatpush3.msra.mxu0 %v3612_v53  ;;  %5193 = vmatpush3.msra.mxu1 %v3631_v54  ;;  %v1574_v58 = vpop.f32.mrf.mxu0  ;;  %v1677_v59 = vpop.f32.mrf.mxu1  ;;  %v3648_v53 = vld [vmem:[%s7586_s1 + $0xd68] sm:$0xff] }
 0x1d5   : > { %5153 = vmatprep.subr.mxu0 %v5391_v2  ;;  %5194 = vmatprep.subr.mxu1 %v5391_v2  ;;  %v1588_v6 = vadd.f32 %v1574_v58, %v7155_v9  ;;  %v3608_v9 = vld [vmem:[%s7586_s1 + $0xc58] sm:$0xff]  ;;  %v3647_v58 = vld [vmem:[%s7586_s1 + $0xd60] sm:$0xff] }
 0x1d6   : > { %5104 = vmatprep.mubr.msk.f32.mxu0 %vm5392_vm0, %v5391_v2  ;;  %5154 = vmatpush3.msra.mxu0 %v3611_v55  ;;  %v4693_v61 = vpop.f32.mrf.mxu0  ;;  %v4734_v62 = vpop.f32.mrf.mxu1 }
 0x1d7   : > { %5195 = vmatpush3.msra.mxu1 %v3630_v56  ;;  %5105 = vmatmul.mubr.f32.gmra.mxu0 %v3557_v57  ;;  %v7316_v17 = vadd.f32 %v1677_v59, %v1588_v6  ;;  %v3614_v57 = vld [vmem:[%s5579_s30 + $0x65] sm:$0xff]  ;;  %v3646_v62 = vld [vmem:[%s7586_s1 + $0xd58] sm:$0xff] }
 0x1d8   : > { %5155 = vmatprep.subr.mxu0 %v5391_v2  ;;  %5196 = vmatprep.subr.mxu1 %v5391_v2  ;;  %v3596_v6 = vld [vmem:[%s5579_s30 + $0x6c] sm:$0xff] }
 0x1d9   : > { %5145 = vmatprep.mubr.msk.f32.mxu1 %vm5392_vm0, %v5391_v2  ;;  %5156 = vmatpush3.msra.mxu0 %v3610_v60  ;;  %v1579_v3 = vpop.f32.mrf.mxu0 }
 0x1da   : > { %5197 = vmatpush3.msra.mxu1 %v3629_v63  ;;  %5157 = vmatprep.subr.mxu0 %v5391_v2  ;;  %v1589_v5 = vadd.f32 %v1579_v3, %v7188_v22  ;;  %v3625_v22 = vld [vmem:[%s7586_s1 + $0xcc8] sm:$0xff]  ;;  %v3645_v3 = vld [vmem:[%s7586_s1 + $0xd50] sm:$0xff] }
 0x1db   : > { %5146 = vmatmul.mubr.f32.gmra.mxu1 %v7012_v20  ;;  %5198 = vmatprep.subr.mxu1 %v5391_v2  ;;  %v4696_v8 = vpop.f32.mrf.mxu0  ;;  %v3577_v20 = vld [vmem:[%s5579_s30 + $0x68] sm:$0xff] }
 0x1dc   : > { %5107 = vmatprep.mubr.msk.f32.mxu0 %vm5392_vm0, %v5391_v2  ;;  %5158 = vmatpush3.msra.mxu0 %v3609_v0  ;;  %v3644_v8 = vld [vmem:[%s7586_s1 + $0xd48] sm:$0xff] }
 0x1dd   : > { %5199 = vmatpush3.msra.mxu1 %v3628_v23  ;;  %5108 = vmatmul.mubr.f32.gmra.mxu0 %v3558_v4  ;;  %v1682_v12 = vpop.f32.mrf.mxu1 }
 0x1de   : > { %5159 = vmatprep.subr.mxu0 %v5391_v2  ;;  %5200 = vmatprep.subr.mxu1 %v5391_v2  ;;  %v7344_v13 = vadd.f32 %v1682_v12, %v1589_v5 }
 0x1df   : > { %5148 = vmatprep.mubr.msk.f32.mxu1 %vm5392_vm0, %v5391_v2  ;;  %5160 = vmatpush3.msra.mxu0 %v3608_v9  ;;  %v1584_v16 = vpop.f32.mrf.mxu0  ;;  %v4737_v18 = vpop.f32.mrf.mxu1 }
 0x1e0   : > { %5201 = vmatpush3.msra.mxu1 %v3627_v11  ;;  %5161 = vmatprep.subr.mxu0 %v5391_v2  ;;  %v1590_v30 = vadd.f32 %v1584_v16, %v7216_v7  ;;  %v3621_v7 = vld [vmem:[%s7586_s1 + $0xca8] sm:$0xff]  ;;  %v3643_v11 = vld [vmem:[%s7586_s1 + $0xd40] sm:$0xff] }
 0x1e1   : > { %5149 = vmatmul.mubr.f32.gmra.mxu1 %v3577_v20  ;;  %5202 = vmatprep.subr.mxu1 %v5391_v2  ;;  %v4699_v24 = vpop.f32.mrf.mxu0  ;;  %v3640_v16 = vld [vmem:[%s7586_s1 + $0xd28] sm:$0xff]  ;;  %v3639_v18 = vld [vmem:[%s7586_s1 + $0xd20] sm:$0xff] }
 0x1e2   : > { %5162 = vmatpush3.msra.mxu0 %v3607_v14  ;;  %5203 = vmatpush3.msra.mxu1 %v3626_v15  ;;  %v3641_v15 = vld [vmem:[%s7586_s1 + $0xd30] sm:$0xff]  ;;  %v3635_v24 = vld [vmem:[%s7586_s1 + $0xd00] sm:$0xff] }
 0x1e3   : > { %5163 = vmatprep.subr.mxu0 %v5391_v2  ;;  %5204 = vmatprep.subr.mxu1 %v5391_v2  ;;  %v1687_v26 = vpop.f32.mrf.mxu1 }
 0x1e4   : > { %5164 = vmatpush3.msra.mxu0 %v3606_v19  ;;  %5205 = vmatpush3.msra.mxu1 %v3625_v22  ;;  %v7371_v27 = vadd.f32 %v1687_v26, %v1590_v30  ;;  %v3638_v30 = vld [vmem:[%s7586_s1 + $0xd18] sm:$0xff]  ;;  %v3637_v19 = vld [vmem:[%s7586_s1 + $0xd10] sm:$0xff]  ;;  %v3636_v22 = vld [vmem:[%s7586_s1 + $0xd08] sm:$0xff] }
 0x1e5   : > { %5165 = vmatprep.subr.mxu0 %v5391_v2  ;;  %5206 = vmatprep.subr.mxu1 %v5391_v2  ;;  %v4740_v31 = vpop.f32.mrf.mxu1 }
 0x1e6   : > { %5166 = vmatpush3.msra.mxu0 %v3605_v25  ;;  %5207 = vmatpush3.msra.mxu1 %v3624_v1  ;;  %v3634_v25 = vld [vmem:[%s5579_s30 + $0x6e] sm:$0xff] }
 0x1e7   : > { %5167 = vmatprep.subr.mxu0 %v5391_v2  ;;  %5208 = vmatprep.subr.mxu1 %v5391_v2 }
 0x1e8   : > { %5168 = vmatpush3.msra.mxu0 %v3604_v28  ;;  %5209 = vmatpush3.msra.mxu1 %v3623_v29 }
 0x1e9   : > { %5169 = vmatprep.subr.mxu0 %v5391_v2  ;;  %5210 = vmatprep.subr.mxu1 %v5391_v2 }
 0x1ea   : > { %5170 = vmatpush3.msra.mxu0 %v3603_v32  ;;  %5211 = vmatpush3.msra.mxu1 %v3622_v33 }
 0x1eb   : > { %5171 = vmatprep.subr.mxu0 %v5391_v2  ;;  %5212 = vmatprep.subr.mxu1 %v5391_v2 }
 0x1ec   : > { %5172 = vmatpush3.msra.mxu0 %v3602_v43  ;;  %5213 = vmatpush3.msra.mxu1 %v3621_v7 }
 0x1ed   : > { %5173 = vmatprep.subr.mxu0 %v5391_v2  ;;  %5214 = vmatprep.subr.mxu1 %v5391_v2 }
 0x1ee   : > { %5174 = vmatpush3.msra.mxu0 %v3601_v34  ;;  %5215 = vmatpush3.msra.mxu1 %v3620_v35 }
 0x1ef   : > { %5175 = vmatprep.subr.mxu0 %v5391_v2  ;;  %5216 = vmatprep.subr.mxu1 %v5391_v2 }
 0x1f0   : > { %5176 = vmatpush3.msra.mxu0 %v3600_v36  ;;  %5217 = vmatpush3.msra.mxu1 %v3619_v37 }
 0x1f1   : > { %5177 = vmatprep.subr.mxu0 %v5391_v2  ;;  %5218 = vmatprep.subr.mxu1 %v5391_v2 }
 0x1f2   : > { %5178 = vmatpush3.msra.mxu0 %v3599_v38  ;;  %5219 = vmatpush3.msra.mxu1 %v3618_v39 }
 0x1f3   : > { %5179 = vmatprep.subr.mxu0 %v5391_v2  ;;  %5220 = vmatprep.subr.mxu1 %v5391_v2 }
 0x1f4   : > { %5180 = vmatpush3.msra.mxu0 %v3598_v40  ;;  %5221 = vmatpush3.msra.mxu1 %v3617_v41 }
 0x1f5   : > { %5181 = vmatprep.subr.mxu0 %v5391_v2  ;;  %5222 = vmatprep.subr.mxu1 %v5391_v2 }
 0x1f6   : > { %5182 = vmatpush3.msra.mxu0 %v3597_v42  ;;  %5183 = vmatprep.mubr.msk.f32.mxu0 %vm5392_vm0, %v5391_v2 }
 0x1f7   : > { %5223 = vmatpush3.msra.mxu1 %v3616_v44  ;;  %5224 = vmatprep.mubr.msk.f32.mxu1 %vm5392_vm0, %v5391_v2 }
 0x1f8   : > { %5184 = vmatmul.mubr.f32.vlgmr.msra.gmra.mxu0 %v3594_v45  ;;  %5225 = vmatmul.mubr.f32.vlgmr.msra.gmra.mxu1 %v3613_v46 }
 0x1f9   : > { %5233 = vmatprep.subr.mxu0 %v5391_v2  ;;  %5274 = vmatprep.subr.mxu1 %v5391_v2 }
 0x1fa   : > { %5234 = vmatpush3.msra.mxu0 %v3650_v47  ;;  %5290 = vmatpush3.msra.mxu1 %v3650_v47  ;;  %v1780_v50 = vpop.f32.mrf.mxu0  ;;  %v1883_v51 = vpop.f32.mrf.mxu1 }
 0x1fb   : > { %5235 = vmatprep.subr.mxu0 %v5391_v2  ;;  %5275 = vmatprep.subr.mxu1 %v5391_v2  ;;  %v1794_v52 = vadd.f32 %v1780_v50, %v7316_v17  ;;  %v3615_v17 = vld [vmem:[%s5579_s30 + $0x6d] sm:$0xff]  ;;  %s5308_s30 = smul.u32 12, %s7601_s16 }
 0x1fc   : > { %5186 = vmatprep.mubr.msk.f32.mxu0 %vm5392_vm0, %v5391_v2  ;;  %5236 = vmatpush3.msra.mxu0 %v3649_v48  ;;  %v4775_v54 = vpop.f32.mrf.mxu0  ;;  %v4816_v55 = vpop.f32.mrf.mxu1 }
 0x1fd   : > { %5291 = vmatpush3.msra.mxu1 %v3649_v48  ;;  %5187 = vmatmul.mubr.f32.gmra.mxu0 %v3595_v49  ;;  %v7462_v56 = vadd.f32 %v1883_v51, %v1794_v52  ;;  %s242_s25 = sadd.s32 %s5308_s30, %s5307_s24 }
 0x1fe   : > { %5237 = vmatprep.subr.mxu0 %v5391_v2  ;;  %5276 = vmatprep.subr.mxu1 %v5391_v2  ;;  %s3179_s26 = sshll.u32 %s242_s25, 3 }
 0x1ff   : > { %5227 = vmatprep.mubr.msk.f32.mxu1 %vm5392_vm0, %v5391_v2  ;;  %5238 = vmatpush3.msra.mxu0 %v3648_v53  ;;  %v1785_v59 = vpop.f32.mrf.mxu0  ;;  %s244_s29 = scalar_lea.vmem %s7588_s3, %s3179_s26  ;;  %s253_s7 = scalar_lea.vmem %s7589_s4, %s3179_s26 }
 0x200   : > { %5292 = vmatpush3.msra.mxu1 %v3648_v53  ;;  %5239 = vmatprep.subr.mxu0 %v5391_v2  ;;  %v1795_v60 = vadd.f32 %v1785_v59, %v7344_v13  ;;  %v3642_v13 = vld [vmem:[%s7586_s1 + $0xd38] sm:$0xff] }
 0x201   : > { %5228 = vmatmul.mubr.f32.gmra.mxu1 %v3614_v57  ;;  %5277 = vmatprep.subr.mxu1 %v5391_v2  ;;  %v4778_v61 = vpop.f32.mrf.mxu0 }
 0x202   : > { %5189 = vmatprep.mubr.msk.f32.mxu0 %vm5392_vm0, %v5391_v2  ;;  %5240 = vmatpush3.msra.mxu0 %v3647_v58 }
 0x203   : > { %5293 = vmatpush3.msra.mxu1 %v3647_v58  ;;  %5190 = vmatmul.mubr.f32.gmra.mxu0 %v3596_v6  ;;  %v1888_v63 = vpop.f32.mrf.mxu1 }
 0x204   : > { %5241 = vmatprep.subr.mxu0 %v5391_v2  ;;  %5278 = vmatprep.subr.mxu1 %v5391_v2  ;;  %v7484_v0 = vadd.f32 %v1888_v63, %v1795_v60 }
 0x205   : > { %5230 = vmatprep.mubr.msk.f32.mxu1 %vm5392_vm0, %v5391_v2  ;;  %5242 = vmatpush3.msra.mxu0 %v3646_v62  ;;  %v1790_v23 = vpop.f32.mrf.mxu0  ;;  %v4819_v4 = vpop.f32.mrf.mxu1 }
 0x206   : > { %5294 = vmatpush3.msra.mxu1 %v3646_v62  ;;  %5243 = vmatprep.subr.mxu0 %v5391_v2  ;;  %v1796_v5 = vadd.f32 %v1790_v23, %v7371_v27 }
 0x207   : > { %5231 = vmatmul.mubr.f32.gmra.mxu1 %v3615_v17  ;;  %5279 = vmatprep.subr.mxu1 %v5391_v2  ;;  %v4781_v9 = vpop.f32.mrf.mxu0 }
 0x208   : > { %5244 = vmatpush3.msra.mxu0 %v3645_v3  ;;  %5295 = vmatpush3.msra.mxu1 %v3645_v3 }
 0x209   : > { %5245 = vmatprep.subr.mxu0 %v5391_v2  ;;  %5280 = vmatprep.subr.mxu1 %v5391_v2  ;;  %v1893_v12 = vpop.f32.mrf.mxu1 }
 0x20a   : > { %5246 = vmatpush3.msra.mxu0 %v3644_v8  ;;  %5296 = vmatpush3.msra.mxu1 %v3644_v8  ;;  %v7502_v20 = vadd.f32 %v1893_v12, %v1796_v5 }
 0x20b   : > { %5247 = vmatprep.subr.mxu0 %v5391_v2  ;;  %5281 = vmatprep.subr.mxu1 %v5391_v2  ;;  %v4822_v14 = vpop.f32.mrf.mxu1 }
 0x20c   : > { %5248 = vmatpush3.msra.mxu0 %v3643_v11  ;;  %5297 = vmatpush3.msra.mxu1 %v3643_v11 }
 0x20d   : > { %5249 = vmatprep.subr.mxu0 %v5391_v2  ;;  %5282 = vmatprep.subr.mxu1 %v5391_v2 }
 0x20e   : > { %5250 = vmatpush3.msra.mxu0 %v3642_v13  ;;  %5298 = vmatpush3.msra.mxu1 %v3642_v13 }
 0x20f   : > { %5251 = vmatprep.subr.mxu0 %v5391_v2  ;;  %5283 = vmatprep.subr.mxu1 %v5391_v2 }
 0x210   : > { %5252 = vmatpush3.msra.mxu0 %v3641_v15  ;;  %5299 = vmatpush3.msra.mxu1 %v3641_v15 }
 0x211   : > { %5253 = vmatprep.subr.mxu0 %v5391_v2  ;;  %5284 = vmatprep.subr.mxu1 %v5391_v2 }
 0x212   : > { %5254 = vmatpush3.msra.mxu0 %v3640_v16  ;;  %5300 = vmatpush3.msra.mxu1 %v3640_v16 }
 0x213   : > { %5255 = vmatprep.subr.mxu0 %v5391_v2  ;;  %5285 = vmatprep.subr.mxu1 %v5391_v2 }
 0x214   : > { %5256 = vmatpush3.msra.mxu0 %v3639_v18  ;;  %5301 = vmatpush3.msra.mxu1 %v3639_v18 }
 0x215   : > { %5257 = vmatprep.subr.mxu0 %v5391_v2  ;;  %5286 = vmatprep.subr.mxu1 %v5391_v2 }
 0x216   : > { %5258 = vmatpush3.msra.mxu0 %v3638_v30  ;;  %5302 = vmatpush3.msra.mxu1 %v3638_v30 }
 0x217   : > { %5259 = vmatprep.subr.mxu0 %v5391_v2  ;;  %5287 = vmatprep.subr.mxu1 %v5391_v2 }
 0x218   : > { %5260 = vmatpush3.msra.mxu0 %v3637_v19  ;;  %5303 = vmatpush3.msra.mxu1 %v3637_v19 }
 0x219   : > { %5261 = vmatprep.subr.mxu0 %v5391_v2  ;;  %5288 = vmatprep.subr.mxu1 %v5391_v2 }
 0x21a   : > { %5262 = vmatpush3.msra.mxu0 %v3636_v22  ;;  %5304 = vmatpush3.msra.mxu1 %v3636_v22 }
 0x21b   : > { %5263 = vmatprep.subr.mxu0 %v5391_v2  ;;  %5289 = vmatprep.subr.mxu1 %v5391_v2 }
 0x21c   : > { %5264 = vmatpush3.msra.mxu0 %v3635_v24  ;;  %5305 = vmatpush3.msra.mxu1 %v3635_v24 }
 0x21d   : > { %5265 = vmatprep.mubr.msk.f32.mxu0 %vm5392_vm0, %v5391_v2  ;;  %5268 = vmatprep.mubr.msk.f32.mxu1 %vm5392_vm0, %v5391_v2 }
 0x21e   : > { %5266 = vmatmul.mubr.f32.vlgmr.msra.gmra.mxu0 %v7160_v10  ;;  %5269 = vmatmul.mubr.f32.vlgmr.msra.gmra.mxu1 %v7186_v21 }
 0x21f   : > { %5271 = vmatprep.mubr.msk.f32.mxu1 %vm5392_vm0, %v5391_v2 }
 0x220   : > { %v1986_v1 = vpop.f32.mrf.mxu0  ;;  %v2089_v26 = vpop.f32.mrf.mxu1 }
 0x221   : > { %v2000_v27 = vadd.f32 %v1986_v1, %v7462_v56 }
 0x222   : > { %5272 = vmatmul.mubr.f32.gmra.mxu1 %v3634_v25  ;;  %v4857_v28 = vpop.f32.mrf.mxu0  ;;  %v4898_v29 = vpop.f32.mrf.mxu1 }
 0x223   : > { %v2103_v31 = vadd.f32 %v2089_v26, %v2000_v27 }
 0x225   : > { %v1991_v32 = vpop.f32.mrf.mxu0 }
 0x226   : > { %v2001_v33 = vadd.f32 %v1991_v32, %v7484_v0 }
 0x227   : > { %v4860_v43 = vpop.f32.mrf.mxu0 }
 0x229   : > { %v2094_v7 = vpop.f32.mrf.mxu1 }
 0x22a   : > { %v2104_v10 = vadd.f32 %v2094_v7, %v2001_v33 }
 0x22b   : > { %v1996_v34 = vpop.f32.mrf.mxu0  ;;  %v4901_v21 = vpop.f32.mrf.mxu1 }
 0x22c   : > { %v2002_v35 = vadd.f32 %v1996_v34, %v7502_v20 }
 0x22d   : > { %v4863_v2 = vpop.f32.mrf.mxu0 }
 0x22f   : > { %v2099_v36 = vpop.f32.mrf.mxu1 }
 0x230   : > { %v2105_v37 = vadd.f32 %v2099_v36, %v2002_v35 }
 0x231   : > { %v4904_v38 = vpop.f32.mrf.mxu1 }
 0x246   : > { %v2195_v39 = vpop.f32.mrf.mxu0  ;;  %v2298_v40 = vpop.f32.mrf.mxu1 }
 0x247   : > { %v2209_v41 = vadd.f32 %v2195_v39, %v2103_v31 }
 0x248   : > { %v4939_v42 = vpop.f32.mrf.mxu0  ;;  %v4980_v44 = vpop.f32.mrf.mxu1 }
 0x249   : > { %v2312_v45 = vadd.f32 %v2298_v40, %v2209_v41 }
 0x24b   : > { %v2200_v46 = vpop.f32.mrf.mxu0 }
 0x24c   : > { %v2210_v47 = vadd.f32 %v2200_v46, %v2104_v10 }
 0x24d   : > { %v4942_v48 = vpop.f32.mrf.mxu0 }
 0x24e   : > { %v3651_v48 = vld [vmem:[%s7587_s2] ss:$0 sm:$0xff] }
 0x24f   : > { %v2303_v49 = vpop.f32.mrf.mxu1 }
 0x250   : > { %v2313_v50 = vadd.f32 %v2303_v49, %v2210_v47 }
 0x251   : > { %v2205_v51 = vpop.f32.mrf.mxu0  ;;  %v4983_v52 = vpop.f32.mrf.mxu1 }
 0x252   : > { %v2211_v53 = vadd.f32 %v2205_v51, %v2105_v37  ;;  %v3046_v52 = vld [vmem:[%s244_s29] sm:$0xff] }
 0x253   : > { %v4945_v54 = vpop.f32.mrf.mxu0 }
 0x255   : > { %v2308_v55 = vpop.f32.mrf.mxu1 }
 0x256   : > { %v2314_v56 = vadd.f32 %v2308_v55, %v2211_v53  ;;  %v3047_v53 = vld [vmem:[%s244_s29 + $0x8] sm:$0xff] }
 0x257   : > { %v4986_v57 = vpop.f32.mrf.mxu1 }
 0x26c   : > { %v2401_v58 = vpop.f32.mrf.mxu0  ;;  %v2504_v59 = vpop.f32.mrf.mxu1 }
 0x26d   : > { %v2415_v6 = vadd.f32 %v2401_v58, %v2312_v45 }
 0x26e   : > { %v5021_v60 = vpop.f32.mrf.mxu0  ;;  %v5062_v61 = vpop.f32.mrf.mxu1 }
 0x26f   : > { %v2518_v62 = vadd.f32 %v2504_v59, %v2415_v6 }
 0x271   : > { %v2406_v63 = vpop.f32.mrf.mxu0 }
 0x272   : > { %v2416_v17 = vadd.f32 %v2406_v63, %v2313_v50 }
 0x273   : > { %v5024_v0 = vpop.f32.mrf.mxu0 }
 0x275   : > { %v2509_v3 = vpop.f32.mrf.mxu1 }
 0x276   : > { %v2519_v23 = vadd.f32 %v2509_v3, %v2416_v17 }
 0x277   : > { %v2411_v4 = vpop.f32.mrf.mxu0  ;;  %v5065_v5 = vpop.f32.mrf.mxu1 }
 0x278   : > { %v2417_v8 = vadd.f32 %v2411_v4, %v2314_v56 }
 0x279   : > { %v5027_v9 = vpop.f32.mrf.mxu0 }
 0x27b   : > { %v2514_v11 = vpop.f32.mrf.mxu1 }
 0x27c   : > { %v2520_v12 = vadd.f32 %v2514_v11, %v2417_v8 }
 0x27d   : > { %v5068_v20 = vpop.f32.mrf.mxu1 }
 0x292   : > { %v2607_v13 = vpop.f32.mrf.mxu0  ;;  %v2710_v14 = vpop.f32.mrf.mxu1 }
 0x293   : > { %v2621_v15 = vadd.f32 %v2607_v13, %v2518_v62  ;;  %v3048_v62 = vld [vmem:[%s244_s29 + $0x10] sm:$0xff] }
 0x294   : > { %v5103_v16 = vpop.f32.mrf.mxu0  ;;  %v5144_v18 = vpop.f32.mrf.mxu1 }
 0x295   : > { %v2724_v30 = vadd.f32 %v2710_v14, %v2621_v15 }
 0x297   : > { %v2612_v19 = vpop.f32.mrf.mxu0 }
 0x298   : > { %v2622_v37 = vadd.f32 %v2612_v19, %v2519_v23 }
 0x299   : > { %v5106_v22 = vpop.f32.mrf.mxu0 }
 0x29b   : > { %v2715_v24 = vpop.f32.mrf.mxu1 }
 0x29c   : > { %v2725_v38 = vadd.f32 %v2715_v24, %v2622_v37 }
 0x29d   : > { %v2617_v25 = vpop.f32.mrf.mxu0  ;;  %v5147_v1 = vpop.f32.mrf.mxu1 }
 0x29e   : > { %v2623_v39 = vadd.f32 %v2617_v25, %v2520_v12 }
 0x29f   : > { %v5109_v26 = vpop.f32.mrf.mxu0 }
 0x2a1   : > { %v2720_v27 = vpop.f32.mrf.mxu1 }
 0x2a2   : > { %v2726_v42 = vadd.f32 %v2720_v27, %v2623_v39 }
 0x2a3   : > { %v5150_v28 = vpop.f32.mrf.mxu1 }
 0x2b8   : > { %v2813_v29 = vpop.f32.mrf.mxu0  ;;  %v2916_v31 = vpop.f32.mrf.mxu1 }
 0x2b9   : > { %v2827_v40 = vadd.f32 %v2813_v29, %v2724_v30 }
 0x2ba   : > { %v5185_v32 = vpop.f32.mrf.mxu0  ;;  %v5226_v33 = vpop.f32.mrf.mxu1 }
 0x2bb   : > { %v2930_v44 = vadd.f32 %v2916_v31, %v2827_v40 }
 0x2bd   : > { %v2818_v43 = vpop.f32.mrf.mxu0 }
 0x2be   : > { %v2828_v41 = vadd.f32 %v2818_v43, %v2725_v38 }
 0x2bf   : > { %v5188_v7 = vpop.f32.mrf.mxu0 }
 0x2c1   : > { %v2921_v10 = vpop.f32.mrf.mxu1 }
 0x2c2   : > { %v2931_v45 = vadd.f32 %v2921_v10, %v2828_v41 }
 0x2c3   : > { %v2823_v34 = vpop.f32.mrf.mxu0  ;;  %v5229_v21 = vpop.f32.mrf.mxu1 }
 0x2c4   : > { %v2829_v46 = vadd.f32 %v2823_v34, %v2726_v42 }
 0x2c5   : > { %v5191_v35 = vpop.f32.mrf.mxu0 }
 0x2c7   : > { %v2926_v2 = vpop.f32.mrf.mxu1 }
 0x2c8   : > { %v2932_v56 = vadd.f32 %v2926_v2, %v2829_v46 }
 0x2c9   : > { %v5232_v36 = vpop.f32.mrf.mxu1 }
 0x2de   : > { %v3019_v47 = vpop.f32.mrf.mxu0  ;;  %v3024_v49 = vpop.f32.mrf.mxu1 }
 0x2df   : > { %v3033_v50 = vadd.f32 %v3019_v47, %v2930_v44  ;;  %v3034_v51 = vadd.f32 %v3024_v49, %v2931_v45 }
 0x2e0   : > { %v5270_v54 = vpop.f32.mrf.mxu1  ;;  %v5267_v55 = vpop.f32.mrf.mxu0 }
 0x2e1   : > { %v3043_v57 = vadd.f32 %v3651_v48, %v3033_v50  ;;  %v3044_v58 = vadd.f32 %v3651_v48, %v3034_v51 }
 0x2e2   : > { %v3029_v59 = vpop.f32.mrf.mxu1 }
 0x2e3   : > { %v3049_v6 = vadd.f32 %v3046_v52, %v3043_v57  ;;  %v3050_v60 = vadd.f32 %v3047_v53, %v3044_v58  ;;  %v3035_v61 = vadd.f32 %v3029_v59, %v2932_v56 }
 0x2e4   : > { %v5273_v63 = vpop.f32.mrf.mxu1 }
 0x2e5   : > { %v3052_v17 = vmax.f32 %v3049_v6, 0.0  ;;  %v3053_v0 = vmax.f32 %v3050_v60, 0.0  ;;  %v3045_v3 = vadd.f32 %v3651_v48, %v3035_v61 }
 0x2e7   : > { %3055 = vst [vmem:[%s253_s7] sm:$0xff] %v3052_v17  ;;  %3056 = vst [vmem:[%s253_s7 + $0x8] sm:$0xff] %v3053_v0  ;;  %v3051_v23 = vadd.f32 %v3048_v62, %v3045_v3 }
 0x2e9   : > { %v3054_v4 = vmax.f32 %v3051_v23, 0.0 }
 0x2eb   : > { %3057 = vst [vmem:[%s253_s7 + $0x10] sm:$0xff] %v3054_v4 }
 0x2ec PF: > { %s14_s19 = sadd.s32 1, %s5389_s19   ;;  %s7590_s15 = smov %s5381_s17 }
 0x2ed   : > { %p11_p7 = scmp.ge.s32.totalorder %s14_s19, 10   ;;  %s7591_s16 = smov %s5385_s18 }
 0x2ee   : > { %s7592_s17 = smov %s7595_s20  ;;  %s7593_s18 = smov %s7599_s21 }
 0x2ef   :  { %13 = sbr.rel (!%p11_p7) target bundleno = 3 (0x3), region = 98 }

</bundles_post_ra>
